<compile_context>
chip_gen: v5e
topology: v5e:2x2
jax: 0.10.0
libtpu: 0.0.40
codegen_flags: <defaults>
</compile_context>

<pallas_src>
import jax
import jax.numpy as jnp
from jax.experimental import pallas as pl
from jax.experimental.pallas import tpu as pltpu

LATENT = 32          # latent_dim
LATENT_PAD = 128     # lane-dense padded latent width
ACTIONS = 6          # actions_num
HIDDEN = 400         # real hidden width from fc_nn_generator(..., 400, 5, ...)
HIDDEN_PAD = 512     # lane/MXU-aligned hidden width (padded lanes are exact zeros)
OUT_PAD = 128        # lane-dense padded output width (>= 2*ACTIONS)
N_HID = 3            # 5 Linears total = input layer + 3 hidden + output layer
MIN_STD = 0.1        # DistLayer('normal_trunc') minimum std
LN_EPS = 1e-5        # nn.LayerNorm default eps
INV_HIDDEN = 1.0 / HIDDEN


def _round_up(n, m):
    return ((n + m - 1) // m) * m


def _has_bf16_vpu():
    # v6e / v7x VPUs support bf16 elementwise; v5e/v5p/v4 do not.
    try:
        kind = jax.devices()[0].device_kind.lower()
    except Exception:
        return False
    return ("v6" in kind) or ("v7" in kind) or ("7x" in kind)


def _choose_tiles(B):
    """Batch tile TB (multiple of 8, <=512) and padded batch size.

    Keeps >= 2 grid tiles once the batch can be split so the 'parallel' grid
    axis gives the second TensorCore (v7x) work; larger tiles amortize the
    per-grid-step fixed cost.
    """
    B8 = _round_up(max(B, 8), 8)
    TB = min(512, max(8, _round_up((B8 + 1) // 2, 8)))
    if B8 <= 8:
        TB = 8
    B_pad = _round_up(B8, TB)
    return TB, B_pad


def _make_actor_kernel(compute_dtype):
    """compute_dtype: dtype for the LN-affine + ELU elementwise chain
    (bf16 on v6e/v7x, f32 on v5e). LN stats / matmul accumulation stay f32."""

    def ln_elu(h, g, b):
        # One-pass statistics over the 400 real features. Padded lanes of h are
        # exactly zero (zero weight cols / bias), so full-width sums equal the
        # real sums; divide by 400 explicitly. Padded gamma/beta are zero, so
        # padded lanes stay exactly zero after the affine and ELU.
        s1 = jnp.sum(h, axis=-1, keepdims=True)
        s2 = jnp.sum(h * h, axis=-1, keepdims=True)
        mu = s1 * INV_HIDDEN
        var = s2 * INV_HIDDEN - mu * mu
        hn = ((h - mu) * jax.lax.rsqrt(var + LN_EPS)).astype(compute_dtype)
        hn = hn * g.astype(compute_dtype) + b.astype(compute_dtype)
        # nn.ELU (alpha=1): x if x > 0 else exp(x) - 1 (clamp discarded branch)
        act = jnp.where(hn > 0, hn, jnp.exp(jnp.minimum(hn, 0)) - 1)
        return act.astype(jnp.bfloat16)   # bf16 MXU operand for the next layer

    def actor_kernel(z_ref,
                     w_in_ref, b_in_ref, g_in_ref, be_in_ref,
                     w_h_ref, b_h_ref, g_h_ref, be_h_ref,
                     w_out_ref, b_out_ref,
                     out_ref):
        # input layer: Linear(latent,400[512]) -> LN -> ELU (bf16 MXU, f32 acc)
        h = jnp.dot(z_ref[...].astype(jnp.bfloat16), w_in_ref[...],
                    preferred_element_type=jnp.float32) + b_in_ref[...]
        h = ln_elu(h, g_in_ref[...], be_in_ref[...])

        # 3 hidden layers: Linear(400,400)[512x512] -> LN -> ELU
        for i in range(N_HID):
            h = jnp.dot(h, w_h_ref[i],
                        preferred_element_type=jnp.float32) + b_h_ref[i]
            h = ln_elu(h, g_h_ref[i], be_h_ref[i])

        # output layer: Linear(400, 2*actions) padded to 128 lanes (pad = 0)
        out = jnp.dot(h, w_out_ref[...],
                      preferred_element_type=jnp.float32) + b_out_ref[...]

        # DistLayer('normal_trunc') parameterization, single-sigmoid epilogue:
        #   lanes [0, ACTIONS)         : mean = tanh(mu)       = 2*sigmoid(2*mu) - 1
        #   lanes [ACTIONS, 2*ACTIONS) : std  = 2*sigmoid(s/2) + min_std
        lane = jax.lax.broadcasted_iota(jnp.int32, out.shape, 1)
        is_mean = lane < ACTIONS
        arg = jnp.where(is_mean, 2.0 * out, 0.5 * out)
        sig = jax.nn.sigmoid(arg)
        out_ref[...] = jnp.where(is_mean, 2.0 * sig - 1.0, 2.0 * sig + MIN_STD)
        # TODO(synk): td.Independent(TruncatedNormal(...), 1) distribution object
        # (rsample/log_prob/entropy) has no Pallas equivalent — the kernel
        # returns the (mean, std) parameters instead.

    return actor_kernel


def imaginative_actor_forward(z, params, compute_dtype=None):
    if compute_dtype is None:
        compute_dtype = jnp.bfloat16 if _has_bf16_vpu() else jnp.float32

    B = z.shape[0]
    TB, B_pad = _choose_tiles(B)
    # Pad batch to a tile multiple and latent to the lane-dense 128 width.
    z = jnp.pad(z.astype(jnp.float32),
                ((0, B_pad - B), (0, LATENT_PAD - z.shape[1])))
    grid = (B_pad // TB,)

    def whole(arr):
        # Full-extent block with a constant index_map: DMA'd once, stays
        # VMEM-resident across batch tiles (block index never changes).
        nd = arr.ndim
        return pl.BlockSpec(arr.shape, lambda i, _nd=nd: (0,) * _nd)

    (w_in, b_in, g_in, be_in, w_h, b_h, g_h, be_h, w_out, b_out) = params

    in_specs = [
        pl.BlockSpec((TB, LATENT_PAD), lambda i: (i, 0)),
        whole(w_in), whole(b_in), whole(g_in), whole(be_in),
        whole(w_h), whole(b_h), whole(g_h), whole(be_h),
        whole(w_out), whole(b_out),
    ]
    out_spec = pl.BlockSpec((TB, OUT_PAD), lambda i: (i, 0))

    out = pl.pallas_call(
        _make_actor_kernel(compute_dtype),
        out_shape=jax.ShapeDtypeStruct((B_pad, OUT_PAD), jnp.float32),
        grid=grid,
        in_specs=in_specs,
        out_specs=out_spec,
        compiler_params=pltpu.CompilerParams(
            dimension_semantics=("parallel",)),
    )(z, *params)

    mean = out[:B, :ACTIONS]
    std = out[:B, ACTIONS:2 * ACTIONS]
    return mean, std


def init_params(key):
    """PyTorch nn.Linear-style init (U(-1/sqrt(fan_in), ..)), zero-padded to the
    aligned shapes, weights quantized to bf16 (biases/LN params stay f32)."""
    def linear(key, fan_in, fan_out, fan_in_pad, fan_out_pad):
        kw, kb = jax.random.split(key)
        bound = 1.0 / jnp.sqrt(fan_in)
        w = jax.random.uniform(kw, (fan_in, fan_out), jnp.float32, -bound, bound)
        b = jax.random.uniform(kb, (1, fan_out), jnp.float32, -bound, bound)
        w = jnp.pad(w, ((0, fan_in_pad - fan_in), (0, fan_out_pad - fan_out)))
        b = jnp.pad(b, ((0, 0), (0, fan_out_pad - fan_out)))
        return w.astype(jnp.bfloat16), b

    keys = jax.random.split(key, 2 + N_HID)

    w_in, b_in = linear(keys[0], LATENT, HIDDEN, LATENT_PAD, HIDDEN_PAD)
    # gamma = 1 on real lanes, 0 on padded lanes (keeps padded activations at 0)
    g_in = jnp.pad(jnp.ones((1, HIDDEN), jnp.float32),
                   ((0, 0), (0, HIDDEN_PAD - HIDDEN)))
    be_in = jnp.zeros((1, HIDDEN_PAD), jnp.float32)

    w_h_list, b_h_list = [], []
    for i in range(N_HID):
        w, b = linear(keys[1 + i], HIDDEN, HIDDEN, HIDDEN_PAD, HIDDEN_PAD)
        w_h_list.append(w)
        b_h_list.append(b)
    w_h = jnp.stack(w_h_list)                                     # [3,512,512] bf16
    b_h = jnp.stack(b_h_list)                                     # [3,1,512]  f32
    g_h = jnp.tile(g_in[None], (N_HID, 1, 1))                     # [3,1,512]
    be_h = jnp.zeros((N_HID, 1, HIDDEN_PAD), jnp.float32)

    w_out, b_out = linear(keys[-1], HIDDEN, 2 * ACTIONS, HIDDEN_PAD, OUT_PAD)

    return (w_in, b_in, g_in, be_in, w_h, b_h, g_h, be_h, w_out, b_out)


def reference_forward(z, params, compute_dtype):
    """Pure-JAX reference of the same forward pass (identical bf16 matmul and
    LN-affine/ELU quantization) for validation. Note: bf16 weights/activations
    make this differ from the f32 PyTorch ImaginativeActor by O(1e-3)."""
    (w_in, b_in, g_in, be_in, w_h, b_h, g_h, be_h, w_out, b_out) = params

    def ln_elu(h, g, be):
        hr = h[:, :HIDDEN]
        s1 = jnp.sum(hr, axis=-1, keepdims=True)
        s2 = jnp.sum(hr * hr, axis=-1, keepdims=True)
        mu = s1 * INV_HIDDEN
        var = s2 * INV_HIDDEN - mu * mu
        hn = ((h - mu) * jax.lax.rsqrt(var + LN_EPS)).astype(compute_dtype)
        hn = hn * g.astype(compute_dtype) + be.astype(compute_dtype)
        act = jnp.where(hn > 0, hn, jnp.exp(jnp.minimum(hn, 0)) - 1)
        return act.astype(jnp.bfloat16)

    zp = jnp.pad(z.astype(jnp.float32), ((0, 0), (0, LATENT_PAD - LATENT)))
    h = jnp.dot(zp.astype(jnp.bfloat16), w_in,
                preferred_element_type=jnp.float32) + b_in
    h = ln_elu(h, g_in, be_in)
    for i in range(N_HID):
        h = jnp.dot(h, w_h[i], preferred_element_type=jnp.float32) + b_h[i]
        h = ln_elu(h, g_h[i], be_h[i])
    out = jnp.dot(h, w_out, preferred_element_type=jnp.float32) + b_out
    mean = jnp.tanh(out[:, :ACTIONS])
    std = 2.0 * jax.nn.sigmoid(out[:, ACTIONS:2 * ACTIONS] * 0.5) + MIN_STD
    return mean, std


if __name__ == "__main__":
    key = jax.random.PRNGKey(0)
    kz, kp = jax.random.split(key)

    params = init_params(kp)
    compute_dtype = jnp.bfloat16 if _has_bf16_vpu() else jnp.float32

    # B=8: single-tile path.  B=300: padded, 2-tile grid (both TCs on v7x).
    for B in (8, 300):
        z = jax.random.normal(jax.random.fold_in(kz, B), (B, LATENT), jnp.float32)
        mean, std = imaginative_actor_forward(z, params, compute_dtype)
        jax.block_until_ready((mean, std))

        mean_ref, std_ref = reference_forward(z, params, compute_dtype)
        assert mean.shape == (B, ACTIONS) and std.shape == (B, ACTIONS)
        assert jnp.allclose(mean, mean_ref, rtol=5e-3, atol=5e-3), (
            float(jnp.max(jnp.abs(mean - mean_ref))))
        assert jnp.allclose(std, std_ref, rtol=5e-3, atol=5e-3), (
            float(jnp.max(jnp.abs(std - std_ref))))
        assert bool(jnp.all(std > MIN_STD - 1e-6))

    print("KERNEL_OK")
</pallas_src>

<mosaic_0001>
module attributes {stable_mosaic.version = 11 : i64} {
  func.func @actor_kernel(%arg0: i32, %arg1: memref<8x128xf32, #tpu.memory_space<vmem>>, %arg2: memref<128x512xbf16, #tpu.memory_space<vmem>>, %arg3: memref<1x512xf32, #tpu.memory_space<vmem>>, %arg4: memref<1x512xf32, #tpu.memory_space<vmem>>, %arg5: memref<1x512xf32, #tpu.memory_space<vmem>>, %arg6: memref<3x512x512xbf16, #tpu.memory_space<vmem>>, %arg7: memref<3x1x512xf32, #tpu.memory_space<vmem>>, %arg8: memref<3x1x512xf32, #tpu.memory_space<vmem>>, %arg9: memref<3x1x512xf32, #tpu.memory_space<vmem>>, %arg10: memref<512x128xbf16, #tpu.memory_space<vmem>>, %arg11: memref<1x128xf32, #tpu.memory_space<vmem>>, %arg12: memref<8x128xf32, #tpu.memory_space<vmem>>) attributes {dimension_semantics = [#tpu.dimension_semantics<parallel>], iteration_bounds = array<i64: 1>, scalar_prefetch = 0 : i64, scratch_operands = 0 : i64, tpu.core_type = #tpu.core_type<tc>, window_params = [{transform_indices = @transform_0, window_bounds = array<i64: 8, 128>}, {pipeline_mode = #tpu.pipeline_mode<synchronous>, transform_indices = @transform_1, window_bounds = array<i64: 128, 512>}, {pipeline_mode = #tpu.pipeline_mode<synchronous>, transform_indices = @transform_2, window_bounds = array<i64: 1, 512>}, {pipeline_mode = #tpu.pipeline_mode<synchronous>, transform_indices = @transform_3, window_bounds = array<i64: 1, 512>}, {pipeline_mode = #tpu.pipeline_mode<synchronous>, transform_indices = @transform_4, window_bounds = array<i64: 1, 512>}, {pipeline_mode = #tpu.pipeline_mode<synchronous>, transform_indices = @transform_5, window_bounds = array<i64: 3, 512, 512>}, {pipeline_mode = #tpu.pipeline_mode<synchronous>, transform_indices = @transform_6, window_bounds = array<i64: 3, 1, 512>}, {pipeline_mode = #tpu.pipeline_mode<synchronous>, transform_indices = @transform_7, window_bounds = array<i64: 3, 1, 512>}, {pipeline_mode = #tpu.pipeline_mode<synchronous>, transform_indices = @transform_8, window_bounds = array<i64: 3, 1, 512>}, {pipeline_mode = #tpu.pipeline_mode<synchronous>, transform_indices = @transform_9, window_bounds = array<i64: 512, 128>}, {pipeline_mode = #tpu.pipeline_mode<synchronous>, transform_indices = @transform_10, window_bounds = array<i64: 1, 128>}, {transform_indices = @transform_11, window_bounds = array<i64: 8, 128>}]} {
    %c0 = arith.constant 0 : index
    %c0_0 = arith.constant 0 : index
    %0 = vector.load %arg1[%c0, %c0_0] : memref<8x128xf32, #tpu.memory_space<vmem>>, vector<8x128xf32>
    %1 = arith.truncf %0 : vector<8x128xf32> to vector<8x128xbf16>
    %c0_1 = arith.constant 0 : index
    %c0_2 = arith.constant 0 : index
    %2 = vector.load %arg2[%c0_1, %c0_2] : memref<128x512xbf16, #tpu.memory_space<vmem>>, vector<128x512xbf16>
    %cst = arith.constant dense<0.000000e+00> : vector<8x512xf32>
    %3 = tpu.matmul %1, %2, %cst {dimension_numbers = #tpu.dot_dimension_numbers<[1], [0], [0], [1], [0, 0, 1, 1], [], []>} : vector<8x128xbf16>, vector<128x512xbf16>, vector<8x512xf32> -> vector<8x512xf32>
    %c0_3 = arith.constant 0 : index
    %c0_4 = arith.constant 0 : index
    %4 = vector.load %arg3[%c0_3, %c0_4] : memref<1x512xf32, #tpu.memory_space<vmem>>, vector<1x512xf32>
    %5 = vector.broadcast %4 : vector<1x512xf32> to vector<8x512xf32>
    %6 = arith.addf %3, %5 : vector<8x512xf32>
    %c0_5 = arith.constant 0 : index
    %c0_6 = arith.constant 0 : index
    %7 = vector.load %arg4[%c0_5, %c0_6] : memref<1x512xf32, #tpu.memory_space<vmem>>, vector<1x512xf32>
    %c0_7 = arith.constant 0 : index
    %c0_8 = arith.constant 0 : index
    %8 = vector.load %arg5[%c0_7, %c0_8] : memref<1x512xf32, #tpu.memory_space<vmem>>, vector<1x512xf32>
    %cst_9 = arith.constant dense<0.000000e+00> : vector<8xf32>
    %9 = vector.multi_reduction <add>, %6, %cst_9 [1] : vector<8x512xf32> to vector<8xf32>
    %10 = vector.shape_cast %9 : vector<8xf32> to vector<8x1xf32>
    %11 = arith.mulf %6, %6 : vector<8x512xf32>
    %cst_10 = arith.constant dense<0.000000e+00> : vector<8xf32>
    %12 = vector.multi_reduction <add>, %11, %cst_10 [1] : vector<8x512xf32> to vector<8xf32>
    %13 = vector.shape_cast %12 : vector<8xf32> to vector<8x1xf32>
    %cst_11 = arith.constant 2.500000e-03 : f32
    %14 = vector.broadcast %cst_11 : f32 to vector<8x1xf32>
    %15 = arith.mulf %10, %14 : vector<8x1xf32>
    %cst_12 = arith.constant 2.500000e-03 : f32
    %16 = vector.broadcast %cst_12 : f32 to vector<8x1xf32>
    %17 = arith.mulf %13, %16 : vector<8x1xf32>
    %18 = arith.mulf %15, %15 : vector<8x1xf32>
    %19 = arith.subf %17, %18 : vector<8x1xf32>
    %20 = vector.broadcast %15 : vector<8x1xf32> to vector<8x512xf32>
    %21 = arith.subf %6, %20 : vector<8x512xf32>
    %cst_13 = arith.constant 9.99999974E-6 : f32
    %22 = vector.broadcast %cst_13 : f32 to vector<8x1xf32>
    %23 = arith.addf %19, %22 : vector<8x1xf32>
    %24 = math.rsqrt %23 : vector<8x1xf32>
    %25 = vector.broadcast %24 : vector<8x1xf32> to vector<8x512xf32>
    %26 = arith.mulf %21, %25 : vector<8x512xf32>
    %27 = vector.broadcast %7 : vector<1x512xf32> to vector<8x512xf32>
    %28 = arith.mulf %26, %27 : vector<8x512xf32>
    %29 = vector.broadcast %8 : vector<1x512xf32> to vector<8x512xf32>
    %30 = arith.addf %28, %29 : vector<8x512xf32>
    %cst_14 = arith.constant 0.000000e+00 : f32
    %31 = vector.broadcast %cst_14 : f32 to vector<8x512xf32>
    %32 = arith.cmpf ogt, %30, %31 : vector<8x512xf32>
    %cst_15 = arith.constant 0.000000e+00 : f32
    %33 = vector.broadcast %cst_15 : f32 to vector<8x512xf32>
    %34 = arith.minimumf %30, %33 : vector<8x512xf32>
    %35 = math.exp %34 : vector<8x512xf32>
    %cst_16 = arith.constant 1.000000e+00 : f32
    %36 = vector.broadcast %cst_16 : f32 to vector<8x512xf32>
    %37 = arith.subf %35, %36 : vector<8x512xf32>
    %38 = arith.select %32, %30, %37 : vector<8x512xi1>, vector<8x512xf32>
    %39 = arith.truncf %38 : vector<8x512xf32> to vector<8x512xbf16>
    %c0_17 = arith.constant 0 : index
    %c0_18 = arith.constant 0 : index
    %c0_19 = arith.constant 0 : index
    %40 = vector.load %arg6[%c0_17, %c0_18, %c0_19] : memref<3x512x512xbf16, #tpu.memory_space<vmem>>, vector<1x512x512xbf16>
    %41 = vector.shape_cast %40 : vector<1x512x512xbf16> to vector<512x512xbf16>
    %cst_20 = arith.constant dense<0.000000e+00> : vector<8x512xf32>
    %42 = tpu.matmul %39, %41, %cst_20 {dimension_numbers = #tpu.dot_dimension_numbers<[1], [0], [0], [1], [0, 0, 1, 1], [], []>} : vector<8x512xbf16>, vector<512x512xbf16>, vector<8x512xf32> -> vector<8x512xf32>
    %c0_21 = arith.constant 0 : index
    %c0_22 = arith.constant 0 : index
    %c0_23 = arith.constant 0 : index
    %43 = vector.load %arg7[%c0_21, %c0_22, %c0_23] : memref<3x1x512xf32, #tpu.memory_space<vmem>>, vector<1x1x512xf32>
    %44 = vector.shape_cast %43 : vector<1x1x512xf32> to vector<1x512xf32>
    %45 = vector.broadcast %44 : vector<1x512xf32> to vector<8x512xf32>
    %46 = arith.addf %42, %45 : vector<8x512xf32>
    %c0_24 = arith.constant 0 : index
    %c0_25 = arith.constant 0 : index
    %c0_26 = arith.constant 0 : index
    %47 = vector.load %arg8[%c0_24, %c0_25, %c0_26] : memref<3x1x512xf32, #tpu.memory_space<vmem>>, vector<1x1x512xf32>
    %48 = vector.shape_cast %47 : vector<1x1x512xf32> to vector<1x512xf32>
    %c0_27 = arith.constant 0 : index
    %c0_28 = arith.constant 0 : index
    %c0_29 = arith.constant 0 : index
    %49 = vector.load %arg9[%c0_27, %c0_28, %c0_29] : memref<3x1x512xf32, #tpu.memory_space<vmem>>, vector<1x1x512xf32>
    %50 = vector.shape_cast %49 : vector<1x1x512xf32> to vector<1x512xf32>
    %cst_30 = arith.constant dense<0.000000e+00> : vector<8xf32>
    %51 = vector.multi_reduction <add>, %46, %cst_30 [1] : vector<8x512xf32> to vector<8xf32>
    %52 = vector.shape_cast %51 : vector<8xf32> to vector<8x1xf32>
    %53 = arith.mulf %46, %46 : vector<8x512xf32>
    %cst_31 = arith.constant dense<0.000000e+00> : vector<8xf32>
    %54 = vector.multi_reduction <add>, %53, %cst_31 [1] : vector<8x512xf32> to vector<8xf32>
    %55 = vector.shape_cast %54 : vector<8xf32> to vector<8x1xf32>
    %cst_32 = arith.constant 2.500000e-03 : f32
    %56 = vector.broadcast %cst_32 : f32 to vector<8x1xf32>
    %57 = arith.mulf %52, %56 : vector<8x1xf32>
    %cst_33 = arith.constant 2.500000e-03 : f32
    %58 = vector.broadcast %cst_33 : f32 to vector<8x1xf32>
    %59 = arith.mulf %55, %58 : vector<8x1xf32>
    %60 = arith.mulf %57, %57 : vector<8x1xf32>
    %61 = arith.subf %59, %60 : vector<8x1xf32>
    %62 = vector.broadcast %57 : vector<8x1xf32> to vector<8x512xf32>
    %63 = arith.subf %46, %62 : vector<8x512xf32>
    %cst_34 = arith.constant 9.99999974E-6 : f32
    %64 = vector.broadcast %cst_34 : f32 to vector<8x1xf32>
    %65 = arith.addf %61, %64 : vector<8x1xf32>
    %66 = math.rsqrt %65 : vector<8x1xf32>
    %67 = vector.broadcast %66 : vector<8x1xf32> to vector<8x512xf32>
    %68 = arith.mulf %63, %67 : vector<8x512xf32>
    %69 = vector.broadcast %48 : vector<1x512xf32> to vector<8x512xf32>
    %70 = arith.mulf %68, %69 : vector<8x512xf32>
    %71 = vector.broadcast %50 : vector<1x512xf32> to vector<8x512xf32>
    %72 = arith.addf %70, %71 : vector<8x512xf32>
    %cst_35 = arith.constant 0.000000e+00 : f32
    %73 = vector.broadcast %cst_35 : f32 to vector<8x512xf32>
    %74 = arith.cmpf ogt, %72, %73 : vector<8x512xf32>
    %cst_36 = arith.constant 0.000000e+00 : f32
    %75 = vector.broadcast %cst_36 : f32 to vector<8x512xf32>
    %76 = arith.minimumf %72, %75 : vector<8x512xf32>
    %77 = math.exp %76 : vector<8x512xf32>
    %cst_37 = arith.constant 1.000000e+00 : f32
    %78 = vector.broadcast %cst_37 : f32 to vector<8x512xf32>
    %79 = arith.subf %77, %78 : vector<8x512xf32>
    %80 = arith.select %74, %72, %79 : vector<8x512xi1>, vector<8x512xf32>
    %81 = arith.truncf %80 : vector<8x512xf32> to vector<8x512xbf16>
    %c1 = arith.constant 1 : index
    %c0_38 = arith.constant 0 : index
    %c0_39 = arith.constant 0 : index
    %82 = vector.load %arg6[%c1, %c0_38, %c0_39] : memref<3x512x512xbf16, #tpu.memory_space<vmem>>, vector<1x512x512xbf16>
    %83 = vector.shape_cast %82 : vector<1x512x512xbf16> to vector<512x512xbf16>
    %cst_40 = arith.constant dense<0.000000e+00> : vector<8x512xf32>
    %84 = tpu.matmul %81, %83, %cst_40 {dimension_numbers = #tpu.dot_dimension_numbers<[1], [0], [0], [1], [0, 0, 1, 1], [], []>} : vector<8x512xbf16>, vector<512x512xbf16>, vector<8x512xf32> -> vector<8x512xf32>
    %c1_41 = arith.constant 1 : index
    %c0_42 = arith.constant 0 : index
    %c0_43 = arith.constant 0 : index
    %85 = vector.load %arg7[%c1_41, %c0_42, %c0_43] : memref<3x1x512xf32, #tpu.memory_space<vmem>>, vector<1x1x512xf32>
    %86 = vector.shape_cast %85 : vector<1x1x512xf32> to vector<1x512xf32>
    %87 = vector.broadcast %86 : vector<1x512xf32> to vector<8x512xf32>
    %88 = arith.addf %84, %87 : vector<8x512xf32>
    %c1_44 = arith.constant 1 : index
    %c0_45 = arith.constant 0 : index
    %c0_46 = arith.constant 0 : index
    %89 = vector.load %arg8[%c1_44, %c0_45, %c0_46] : memref<3x1x512xf32, #tpu.memory_space<vmem>>, vector<1x1x512xf32>
    %90 = vector.shape_cast %89 : vector<1x1x512xf32> to vector<1x512xf32>
    %c1_47 = arith.constant 1 : index
    %c0_48 = arith.constant 0 : index
    %c0_49 = arith.constant 0 : index
    %91 = vector.load %arg9[%c1_47, %c0_48, %c0_49] : memref<3x1x512xf32, #tpu.memory_space<vmem>>, vector<1x1x512xf32>
    %92 = vector.shape_cast %91 : vector<1x1x512xf32> to vector<1x512xf32>
    %cst_50 = arith.constant dense<0.000000e+00> : vector<8xf32>
    %93 = vector.multi_reduction <add>, %88, %cst_50 [1] : vector<8x512xf32> to vector<8xf32>
    %94 = vector.shape_cast %93 : vector<8xf32> to vector<8x1xf32>
    %95 = arith.mulf %88, %88 : vector<8x512xf32>
    %cst_51 = arith.constant dense<0.000000e+00> : vector<8xf32>
    %96 = vector.multi_reduction <add>, %95, %cst_51 [1] : vector<8x512xf32> to vector<8xf32>
    %97 = vector.shape_cast %96 : vector<8xf32> to vector<8x1xf32>
    %cst_52 = arith.constant 2.500000e-03 : f32
    %98 = vector.broadcast %cst_52 : f32 to vector<8x1xf32>
    %99 = arith.mulf %94, %98 : vector<8x1xf32>
    %cst_53 = arith.constant 2.500000e-03 : f32
    %100 = vector.broadcast %cst_53 : f32 to vector<8x1xf32>
    %101 = arith.mulf %97, %100 : vector<8x1xf32>
    %102 = arith.mulf %99, %99 : vector<8x1xf32>
    %103 = arith.subf %101, %102 : vector<8x1xf32>
    %104 = vector.broadcast %99 : vector<8x1xf32> to vector<8x512xf32>
    %105 = arith.subf %88, %104 : vector<8x512xf32>
    %cst_54 = arith.constant 9.99999974E-6 : f32
    %106 = vector.broadcast %cst_54 : f32 to vector<8x1xf32>
    %107 = arith.addf %103, %106 : vector<8x1xf32>
    %108 = math.rsqrt %107 : vector<8x1xf32>
    %109 = vector.broadcast %108 : vector<8x1xf32> to vector<8x512xf32>
    %110 = arith.mulf %105, %109 : vector<8x512xf32>
    %111 = vector.broadcast %90 : vector<1x512xf32> to vector<8x512xf32>
    %112 = arith.mulf %110, %111 : vector<8x512xf32>
    %113 = vector.broadcast %92 : vector<1x512xf32> to vector<8x512xf32>
    %114 = arith.addf %112, %113 : vector<8x512xf32>
    %cst_55 = arith.constant 0.000000e+00 : f32
    %115 = vector.broadcast %cst_55 : f32 to vector<8x512xf32>
    %116 = arith.cmpf ogt, %114, %115 : vector<8x512xf32>
    %cst_56 = arith.constant 0.000000e+00 : f32
    %117 = vector.broadcast %cst_56 : f32 to vector<8x512xf32>
    %118 = arith.minimumf %114, %117 : vector<8x512xf32>
    %119 = math.exp %118 : vector<8x512xf32>
    %cst_57 = arith.constant 1.000000e+00 : f32
    %120 = vector.broadcast %cst_57 : f32 to vector<8x512xf32>
    %121 = arith.subf %119, %120 : vector<8x512xf32>
    %122 = arith.select %116, %114, %121 : vector<8x512xi1>, vector<8x512xf32>
    %123 = arith.truncf %122 : vector<8x512xf32> to vector<8x512xbf16>
    %c2 = arith.constant 2 : index
    %c0_58 = arith.constant 0 : index
    %c0_59 = arith.constant 0 : index
    %124 = vector.load %arg6[%c2, %c0_58, %c0_59] : memref<3x512x512xbf16, #tpu.memory_space<vmem>>, vector<1x512x512xbf16>
    %125 = vector.shape_cast %124 : vector<1x512x512xbf16> to vector<512x512xbf16>
    %cst_60 = arith.constant dense<0.000000e+00> : vector<8x512xf32>
    %126 = tpu.matmul %123, %125, %cst_60 {dimension_numbers = #tpu.dot_dimension_numbers<[1], [0], [0], [1], [0, 0, 1, 1], [], []>} : vector<8x512xbf16>, vector<512x512xbf16>, vector<8x512xf32> -> vector<8x512xf32>
    %c2_61 = arith.constant 2 : index
    %c0_62 = arith.constant 0 : index
    %c0_63 = arith.constant 0 : index
    %127 = vector.load %arg7[%c2_61, %c0_62, %c0_63] : memref<3x1x512xf32, #tpu.memory_space<vmem>>, vector<1x1x512xf32>
    %128 = vector.shape_cast %127 : vector<1x1x512xf32> to vector<1x512xf32>
    %129 = vector.broadcast %128 : vector<1x512xf32> to vector<8x512xf32>
    %130 = arith.addf %126, %129 : vector<8x512xf32>
    %c2_64 = arith.constant 2 : index
    %c0_65 = arith.constant 0 : index
    %c0_66 = arith.constant 0 : index
    %131 = vector.load %arg8[%c2_64, %c0_65, %c0_66] : memref<3x1x512xf32, #tpu.memory_space<vmem>>, vector<1x1x512xf32>
    %132 = vector.shape_cast %131 : vector<1x1x512xf32> to vector<1x512xf32>
    %c2_67 = arith.constant 2 : index
    %c0_68 = arith.constant 0 : index
    %c0_69 = arith.constant 0 : index
    %133 = vector.load %arg9[%c2_67, %c0_68, %c0_69] : memref<3x1x512xf32, #tpu.memory_space<vmem>>, vector<1x1x512xf32>
    %134 = vector.shape_cast %133 : vector<1x1x512xf32> to vector<1x512xf32>
    %cst_70 = arith.constant dense<0.000000e+00> : vector<8xf32>
    %135 = vector.multi_reduction <add>, %130, %cst_70 [1] : vector<8x512xf32> to vector<8xf32>
    %136 = vector.shape_cast %135 : vector<8xf32> to vector<8x1xf32>
    %137 = arith.mulf %130, %130 : vector<8x512xf32>
    %cst_71 = arith.constant dense<0.000000e+00> : vector<8xf32>
    %138 = vector.multi_reduction <add>, %137, %cst_71 [1] : vector<8x512xf32> to vector<8xf32>
    %139 = vector.shape_cast %138 : vector<8xf32> to vector<8x1xf32>
    %cst_72 = arith.constant 2.500000e-03 : f32
    %140 = vector.broadcast %cst_72 : f32 to vector<8x1xf32>
    %141 = arith.mulf %136, %140 : vector<8x1xf32>
    %cst_73 = arith.constant 2.500000e-03 : f32
    %142 = vector.broadcast %cst_73 : f32 to vector<8x1xf32>
    %143 = arith.mulf %139, %142 : vector<8x1xf32>
    %144 = arith.mulf %141, %141 : vector<8x1xf32>
    %145 = arith.subf %143, %144 : vector<8x1xf32>
    %146 = vector.broadcast %141 : vector<8x1xf32> to vector<8x512xf32>
    %147 = arith.subf %130, %146 : vector<8x512xf32>
    %cst_74 = arith.constant 9.99999974E-6 : f32
    %148 = vector.broadcast %cst_74 : f32 to vector<8x1xf32>
    %149 = arith.addf %145, %148 : vector<8x1xf32>
    %150 = math.rsqrt %149 : vector<8x1xf32>
    %151 = vector.broadcast %150 : vector<8x1xf32> to vector<8x512xf32>
    %152 = arith.mulf %147, %151 : vector<8x512xf32>
    %153 = vector.broadcast %132 : vector<1x512xf32> to vector<8x512xf32>
    %154 = arith.mulf %152, %153 : vector<8x512xf32>
    %155 = vector.broadcast %134 : vector<1x512xf32> to vector<8x512xf32>
    %156 = arith.addf %154, %155 : vector<8x512xf32>
    %cst_75 = arith.constant 0.000000e+00 : f32
    %157 = vector.broadcast %cst_75 : f32 to vector<8x512xf32>
    %158 = arith.cmpf ogt, %156, %157 : vector<8x512xf32>
    %cst_76 = arith.constant 0.000000e+00 : f32
    %159 = vector.broadcast %cst_76 : f32 to vector<8x512xf32>
    %160 = arith.minimumf %156, %159 : vector<8x512xf32>
    %161 = math.exp %160 : vector<8x512xf32>
    %cst_77 = arith.constant 1.000000e+00 : f32
    %162 = vector.broadcast %cst_77 : f32 to vector<8x512xf32>
    %163 = arith.subf %161, %162 : vector<8x512xf32>
    %164 = arith.select %158, %156, %163 : vector<8x512xi1>, vector<8x512xf32>
    %165 = arith.truncf %164 : vector<8x512xf32> to vector<8x512xbf16>
    %c0_78 = arith.constant 0 : index
    %c0_79 = arith.constant 0 : index
    %166 = vector.load %arg10[%c0_78, %c0_79] : memref<512x128xbf16, #tpu.memory_space<vmem>>, vector<512x128xbf16>
    %cst_80 = arith.constant dense<0.000000e+00> : vector<8x128xf32>
    %167 = tpu.matmul %165, %166, %cst_80 {dimension_numbers = #tpu.dot_dimension_numbers<[1], [0], [0], [1], [0, 0, 1, 1], [], []>} : vector<8x512xbf16>, vector<512x128xbf16>, vector<8x128xf32> -> vector<8x128xf32>
    %c0_81 = arith.constant 0 : index
    %c0_82 = arith.constant 0 : index
    %168 = vector.load %arg11[%c0_81, %c0_82] : memref<1x128xf32, #tpu.memory_space<vmem>>, vector<1x128xf32>
    %169 = vector.broadcast %168 : vector<1x128xf32> to vector<8x128xf32>
    %170 = arith.addf %167, %169 : vector<8x128xf32>
    %171 = tpu.iota {dimensions = array<i32: 1>} : vector<8x128xi32>
    %c6_i32 = arith.constant 6 : i32
    %172 = vector.broadcast %c6_i32 : i32 to vector<8x128xi32>
    %173 = arith.cmpi slt, %171, %172 : vector<8x128xi32>
    %cst_83 = arith.constant 2.000000e+00 : f32
    %174 = vector.broadcast %cst_83 : f32 to vector<8x128xf32>
    %175 = arith.mulf %174, %170 : vector<8x128xf32>
    %cst_84 = arith.constant 5.000000e-01 : f32
    %176 = vector.broadcast %cst_84 : f32 to vector<8x128xf32>
    %177 = arith.mulf %176, %170 : vector<8x128xf32>
    %178 = arith.select %173, %175, %177 : vector<8x128xi1>, vector<8x128xf32>
    %179 = arith.negf %178 : vector<8x128xf32>
    %180 = math.exp %179 : vector<8x128xf32>
    %cst_85 = arith.constant 1.000000e+00 : f32
    %181 = vector.broadcast %cst_85 : f32 to vector<8x128xf32>
    %182 = arith.addf %181, %180 : vector<8x128xf32>
    %183 = arith.divf %181, %182 : vector<8x128xf32>
    %cst_86 = arith.constant 2.000000e+00 : f32
    %184 = vector.broadcast %cst_86 : f32 to vector<8x128xf32>
    %185 = arith.mulf %184, %183 : vector<8x128xf32>
    %cst_87 = arith.constant 1.000000e+00 : f32
    %186 = vector.broadcast %cst_87 : f32 to vector<8x128xf32>
    %187 = arith.subf %185, %186 : vector<8x128xf32>
    %cst_88 = arith.constant 2.000000e+00 : f32
    %188 = vector.broadcast %cst_88 : f32 to vector<8x128xf32>
    %189 = arith.mulf %188, %183 : vector<8x128xf32>
    %cst_89 = arith.constant 1.000000e-01 : f32
    %190 = vector.broadcast %cst_89 : f32 to vector<8x128xf32>
    %191 = arith.addf %189, %190 : vector<8x128xf32>
    %192 = arith.select %173, %187, %191 : vector<8x128xi1>, vector<8x128xf32>
    %c0_90 = arith.constant 0 : index
    %c0_91 = arith.constant 0 : index
    %193 = vector.load %arg12[%c0_90, %c0_91] : memref<8x128xf32, #tpu.memory_space<vmem>>, vector<8x128xf32>
    tpu.vector_store %arg12[%c0_90, %c0_91], %192 {strides = array<i32>} : memref<8x128xf32, #tpu.memory_space<vmem>>, vector<8x128xf32>,
    return
  }
  func.func @transform_0(%arg0: i32) -> (i32, i32) {
    %c0_i32 = arith.constant 0 : i32
    %c0_i32_0 = arith.constant 0 : i32
    return %arg0, %c0_i32 : i32, i32
  }
  func.func @transform_1(%arg0: i32) -> (i32, i32) {
    %c0_i32 = arith.constant 0 : i32
    %c0_i32_0 = arith.constant 0 : i32
    %c0_i32_1 = arith.constant 0 : i32
    return %c0_i32, %c0_i32_0 : i32, i32
  }
  func.func @transform_2(%arg0: i32) -> (i32, i32) {
    %c0_i32 = arith.constant 0 : i32
    %c0_i32_0 = arith.constant 0 : i32
    %c0_i32_1 = arith.constant 0 : i32
    return %c0_i32, %c0_i32_0 : i32, i32
  }
  func.func @transform_3(%arg0: i32) -> (i32, i32) {
    %c0_i32 = arith.constant 0 : i32
    %c0_i32_0 = arith.constant 0 : i32
    %c0_i32_1 = arith.constant 0 : i32
    return %c0_i32, %c0_i32_0 : i32, i32
  }
  func.func @transform_4(%arg0: i32) -> (i32, i32) {
    %c0_i32 = arith.constant 0 : i32
    %c0_i32_0 = arith.constant 0 : i32
    %c0_i32_1 = arith.constant 0 : i32
    return %c0_i32, %c0_i32_0 : i32, i32
  }
  func.func @transform_5(%arg0: i32) -> (i32, i32, i32) {
    %c0_i32 = arith.constant 0 : i32
    %c0_i32_0 = arith.constant 0 : i32
    %c0_i32_1 = arith.constant 0 : i32
    %c0_i32_2 = arith.constant 0 : i32
    return %c0_i32, %c0_i32_0, %c0_i32_1 : i32, i32, i32
  }
  func.func @transform_6(%arg0: i32) -> (i32, i32, i32) {
    %c0_i32 = arith.constant 0 : i32
    %c0_i32_0 = arith.constant 0 : i32
    %c0_i32_1 = arith.constant 0 : i32
    %c0_i32_2 = arith.constant 0 : i32
    return %c0_i32, %c0_i32_0, %c0_i32_1 : i32, i32, i32
  }
  func.func @transform_7(%arg0: i32) -> (i32, i32, i32) {
    %c0_i32 = arith.constant 0 : i32
    %c0_i32_0 = arith.constant 0 : i32
    %c0_i32_1 = arith.constant 0 : i32
    %c0_i32_2 = arith.constant 0 : i32
    return %c0_i32, %c0_i32_0, %c0_i32_1 : i32, i32, i32
  }
  func.func @transform_8(%arg0: i32) -> (i32, i32, i32) {
    %c0_i32 = arith.constant 0 : i32
    %c0_i32_0 = arith.constant 0 : i32
    %c0_i32_1 = arith.constant 0 : i32
    %c0_i32_2 = arith.constant 0 : i32
    return %c0_i32, %c0_i32_0, %c0_i32_1 : i32, i32, i32
  }
  func.func @transform_9(%arg0: i32) -> (i32, i32) {
    %c0_i32 = arith.constant 0 : i32
    %c0_i32_0 = arith.constant 0 : i32
    %c0_i32_1 = arith.constant 0 : i32
    return %c0_i32, %c0_i32_0 : i32, i32
  }
  func.func @transform_10(%arg0: i32) -> (i32, i32) {
    %c0_i32 = arith.constant 0 : i32
    %c0_i32_0 = arith.constant 0 : i32
    %c0_i32_1 = arith.constant 0 : i32
    return %c0_i32, %c0_i32_0 : i32, i32
  }
  func.func @transform_11(%arg0: i32) -> (i32, i32) {
    %c0_i32 = arith.constant 0 : i32
    %c0_i32_0 = arith.constant 0 : i32
    return %arg0, %c0_i32 : i32, i32
  }
}

</mosaic_0001>

<bundles_post_ra>
// kernel: tpu_custom_call.1
= control target key start
LH: loop header
LB: loop body
LE: loop exit
PB: predicated region body
PF: predicated region fallthrough
CT: control target
= control target key end

     0   :  { %16 = vsyncpa [#allocation3], 0  ;;  %s7105_s0 = inlined_call_operand.hbm [shape: f32[8,128], index: 0, kind: input, shape index: {}]   ;;  %s7106_s1 = inlined_call_operand.hbm [shape: bf16[128,512], index: 1, kind: input, shape index: {}]   ;;  %s7107_s2 = inlined_call_operand.hbm [shape: f32[1,512], index: 2, kind: input, shape index: {}]   ;;  %s7108_s3 = inlined_call_operand.hbm [shape: f32[1,512], index: 3, kind: input, shape index: {}]   ;;  %s7109_s4 = inlined_call_operand.hbm [shape: f32[1,512], index: 4, kind: input, shape index: {}]   ;;  %s7110_s5 = inlined_call_operand.hbm [shape: bf16[3,512,512], index: 5, kind: input, shape index: {}]   ;;  %s7111_s6 = inlined_call_operand.hbm [shape: f32[3,1,512], index: 6, kind: input, shape index: {}]   ;;  %s7112_s7 = inlined_call_operand.hbm [shape: f32[3,1,512], index: 7, kind: input, shape index: {}]   ;;  %s7113_s8 = inlined_call_operand.hbm [shape: f32[3,1,512], index: 8, kind: input, shape index: {}]   ;;  %s7114_s9 = inlined_call_operand.hbm [shape: bf16[512,128], index: 9, kind: input, shape index: {}]   ;;  %s7115_s10 = inlined_call_operand.hbm [shape: f32[1,128], index: 10, kind: input, shape index: {}]   ;;  %s7116_s11 = inlined_call_operand.hbm [shape: f32[8,128], index: 11, kind: output, shape index: {}]  }
   0x1   :  { %17 = vsyncpa [#allocation6], 0 }
   0x2   :  { %18 = vsyncpa [#allocation9], 0 }
   0x3   :  { %19 = vsyncpa [#allocation12], 0 }
   0x4   :  { %20 = vsyncpa [#allocation15], 0 }
   0x5   :  { %21 = vsyncpa [#allocation18], 0  ;;  %s38_s19 = sshll.u32 %s7106_s1, 4  ;;  %s39_s19 = int_to_ptr.hbm [resolvable:$true] %s38_s19 }
   0x6   :  { %22 = vsyncpa [#allocation4], 0  ;;  %s6779_s20 = smov [#allocation5]   ;;  %s63_s24 = sshll.u32 %s7108_s3, 4  ;;  %s64_s24 = int_to_ptr.hbm [resolvable:$true] %s63_s24 }
   0x7   :  { %s40_s21 = sshll.u32 %s6779_s20, 4  ;;  %s6780_s25 = smov 256   ;;  %s41_s21 = int_to_ptr.vmem [resolvable:$true] %s40_s21 }
   0x8   :  { %s6781_s26 = smov 16   ;;  %s6782_s27 = smov [#allocation8]  }
   0x9   :  { %46 = dma.hbm_to_vmem [thread:$0]  %s39_s19, 4096, %s41_s21, [#allocation6], %s6780_s25, %s6780_s25, %s6781_s26  }
   0xa   :  { %s65_s28 = sshll.u32 %s6782_s27, 4  ;;  %s84_s12 = sshll.u32 %s7110_s5, 4  ;;  %s66_s28 = int_to_ptr.vmem [resolvable:$true] %s65_s28  ;;  %s85_s12 = int_to_ptr.hbm [resolvable:$true] %s84_s12 }
   0xb   :  { %68 = dma.hbm_to_vmem [thread:$0]  %s64_s24, 64, %s66_s28, [#allocation9]  }
   0xc   :  { %s6783_s1 = smov [#allocation11]   ;;  %s110_s3 = sshll.u32 %s7112_s7, 4  ;;  %s111_s3 = int_to_ptr.hbm [resolvable:$true] %s110_s3 }
   0xd   :  { %s86_s13 = sshll.u32 %s6783_s1, 4  ;;  %s6784_s16 = smov [#allocation14]   ;;  %s87_s13 = int_to_ptr.vmem [resolvable:$true] %s86_s13 }
   0xe   :  { %92 = dma.hbm_to_vmem [thread:$0]  %s85_s12, 49152, %s87_s13, [#allocation12], %s6780_s25, %s6780_s25, %s6781_s26  }
   0xf   :  { %s112_s17 = sshll.u32 %s6784_s16, 4  ;;  %s136_s20 = sshll.u32 %s7114_s9, 4  ;;  %s113_s17 = int_to_ptr.vmem [resolvable:$true] %s112_s17  ;;  %s137_s20 = int_to_ptr.hbm [resolvable:$true] %s136_s20 }
  0x10   :  { %s6785_s5 = smov 64   ;;  %s6786_s21 = smov 4  }
  0x11   :  { %118 = dma.hbm_to_vmem [thread:$0]  %s111_s3, 192, %s113_s17, [#allocation15], %s6785_s5, %s6785_s5, %s6786_s21  }
  0x12   :  { %s28_s7 = sshll.u32 %s7105_s0, 4  ;;  %s6787_s24 = smov [#allocation17]   ;;  %s29_s7 = int_to_ptr.hbm [resolvable:$true] %s28_s7 }
  0x13   :  { %s138_s25 = sshll.u32 %s6787_s24, 4  ;;  %s6788_s9 = smov [#allocation2]   ;;  %s139_s25 = int_to_ptr.vmem [resolvable:$true] %s138_s25 }
  0x14   :  { %144 = dma.hbm_to_vmem [thread:$0]  %s137_s20, 4096, %s139_s25, [#allocation18], %s6785_s5, %s6785_s5, %s6786_s21  }
  0x15   :  { %s30_s26 = sshll.u32 %s6788_s9, 4  ;;  %s52_s29 = sshll.u32 %s7107_s2, 4  ;;  %s31_s26 = int_to_ptr.vmem [resolvable:$true] %s30_s26  ;;  %s53_s29 = int_to_ptr.hbm [resolvable:$true] %s52_s29 }
  0x16   :  { %33 = dma.hbm_to_vmem [thread:$0]  %s29_s7, 128, %s31_s26, [#allocation3]  }
  0x17   :  { %s74_s0 = sshll.u32 %s7109_s4, 4  ;;  %s6789_s1 = smov [#allocation7]   ;;  %s75_s0 = int_to_ptr.hbm [resolvable:$true] %s74_s0 }
  0x18   :  { %s54_s13 = sshll.u32 %s6789_s1, 4  ;;  %s6790_s14 = smov [#allocation10]   ;;  %s55_s13 = int_to_ptr.vmem [resolvable:$true] %s54_s13 }
  0x19   :  { %57 = dma.hbm_to_vmem [thread:$0]  %s53_s29, 64, %s55_s13, [#allocation6]  }
  0x1a   :  { %s76_s15 = sshll.u32 %s6790_s14, 4  ;;  %s97_s17 = sshll.u32 %s7111_s6, 4  ;;  %s77_s15 = int_to_ptr.vmem [resolvable:$true] %s76_s15  ;;  %s98_s17 = int_to_ptr.hbm [resolvable:$true] %s97_s17 }
  0x1b   :  { %79 = dma.hbm_to_vmem [thread:$0]  %s75_s0, 64, %s77_s15, [#allocation9]  }
  0x1c   :  { %s123_s19 = sshll.u32 %s7113_s8, 4  ;;  %s6791_s20 = smov [#allocation13]   ;;  %s124_s19 = int_to_ptr.hbm [resolvable:$true] %s123_s19 }
  0x1d   :  { %s99_s4 = sshll.u32 %s6791_s20, 4  ;;  %s6792_s22 = smov [#allocation16]   ;;  %s100_s4 = int_to_ptr.vmem [resolvable:$true] %s99_s4 }
  0x1e   :  { %105 = dma.hbm_to_vmem [thread:$0]  %s98_s17, 192, %s100_s4, [#allocation12], %s6785_s5, %s6785_s5, %s6786_s21  }
  0x1f   :  { %s125_s23 = sshll.u32 %s6792_s22, 4  ;;  %s150_s6 = sshll.u32 %s7115_s10, 4  ;;  %s126_s23 = int_to_ptr.vmem [resolvable:$true] %s125_s23  ;;  %s151_s6 = int_to_ptr.hbm [resolvable:$true] %s150_s6 }
  0x20   :  { %131 = dma.hbm_to_vmem [thread:$0]  %s124_s19, 192, %s126_s23, [#allocation15], %s6785_s5, %s6785_s5, %s6786_s21  }
  0x21   :  { %s6793_s8 = smov [#allocation19]  }
  0x22   :  { %s152_s25 = sshll.u32 %s6793_s8, 4  ;;  %s153_s25 = int_to_ptr.vmem [resolvable:$true] %s152_s25 }
  0x23   :  { %155 = dma.hbm_to_vmem [thread:$0]  %s151_s6, 16, %s153_s25, [#allocation18]  }
  0x24   :  { %6765 = dma.done.wait [#allocation3], 128  }
  0x25   :  { %6766 = vsyncadd [#allocation3], 4294967168 }
  0x26   :  { %6767 = dma.done.wait [#allocation6], 4160  }
  0x27   :  { %6768 = vsyncadd [#allocation6], 4294963136 }
  0x28   :  { %6769 = dma.done.wait [#allocation9], 128  }
  0x29   :  { %6770 = vsyncadd [#allocation9], 4294967168 }
  0x2a   :  { %6771 = dma.done.wait [#allocation12], 49344  }
  0x2b   :  { %6772 = vsyncadd [#allocation12], 4294917952 }
  0x2c   :  { %6773 = dma.done.wait [#allocation15], 384  }
  0x2d   :  { %6774 = vsyncadd [#allocation15], 4294966912 }
  0x2e   :  { %6775 = dma.done.wait [#allocation18], 4112  }
  0x2f   :  { %6776 = vsyncadd [#allocation18], 4294963184  ;;  %v4272_v0 = vld [vmem:[#allocation5 + $0xe0] sm:$0xf]  ;;  %v5998_v1 = vld [vmem:[#allocation5 + $0xec] sm:$0xf0] }
  0x30   :  { %v5996_v2 = vld [vmem:[#allocation5 + $0xe4] sm:$0xf]  ;;  %v4273_v3 = vor.u32 %v5998_v1, %v4272_v0  ;;  %v4274_v4 = vld [vmem:[#allocation5 + $0xf0] sm:$0xf0]  ;;  %v4280_v5 = vld [vmem:[#allocation5 + $0xe8] sm:$0xf] }
  0x31   :  { %v5999_v6 = vld [vmem:[#allocation5 + $0xf4] sm:$0xf0]  ;;  %v4277_v7 = vor.u32 %v5996_v2, %v4274_v4  ;;  %v5997_v9 = vld [vmem:[#allocation5 + $0xec] sm:$0xf]  ;;  %v4282_v10 = vld [vmem:[#allocation5 + $0xf8] sm:$0xf0] }
  0x32   :  { %v4281_v8 = vor.u32 %v5999_v6, %v4280_v5  ;;  %v4256_v11 = vld [vmem:[#allocation5 + $0xc0] sm:$0xf]  ;;  %404 = vmatpush.bf16.msra.mxu0 %v4273_v3  ;;  %v4285_v12 = vor.u32 %v5997_v9, %v4282_v10  ;;  %v5994_v13 = vld [vmem:[#allocation5 + $0xcc] sm:$0xf0]  ;;  %v5992_v14 = vld [vmem:[#allocation5 + $0xc4] sm:$0xf] }
  0x33   :  { %v4258_v15 = vld [vmem:[#allocation5 + $0xd0] sm:$0xf0]  ;;  %417 = vmatpush.bf16.msra.mxu1 %v4277_v7  ;;  %v4257_v16 = vor.u32 %v5994_v13, %v4256_v11  ;;  %v4264_v18 = vld [vmem:[#allocation5 + $0xc8] sm:$0xf]  ;;  %v5995_v19 = vld [vmem:[#allocation5 + $0xd4] sm:$0xf0] }
  0x34   :  { %430 = vmatpush.bf16.msra.mxu2 %v4281_v8  ;;  %v4261_v17 = vor.u32 %v5992_v14, %v4258_v15  ;;  %v5993_v20 = vld [vmem:[#allocation5 + $0xcc] sm:$0xf]  ;;  %443 = vmatpush.bf16.msra.mxu3 %v4285_v12  ;;  %v4265_v21 = vor.u32 %v5995_v19, %v4264_v18  ;;  %v4266_v22 = vld [vmem:[#allocation5 + $0xd8] sm:$0xf0]  ;;  %v4240_v23 = vld [vmem:[#allocation5 + $0xa0] sm:$0xf] }
  0x35   :  { %v5990_v24 = vld [vmem:[#allocation5 + $0xac] sm:$0xf0]  ;;  %v4269_v25 = vor.u32 %v5993_v20, %v4266_v22  ;;  %v5988_v26 = vld [vmem:[#allocation5 + $0xa4] sm:$0xf]  ;;  %v4242_v27 = vld [vmem:[#allocation5 + $0xb0] sm:$0xf0] }
  0x36   :  { %v4248_v28 = vld [vmem:[#allocation5 + $0xa8] sm:$0xf]  ;;  %405 = vmatpush.bf16.msra.mxu0 %v4257_v16  ;;  %v4241_v29 = vor.u32 %v5990_v24, %v4240_v23  ;;  %v5991_v30 = vld [vmem:[#allocation5 + $0xb4] sm:$0xf0]  ;;  %v5989_v31 = vld [vmem:[#allocation5 + $0xac] sm:$0xf]  ;;  %v4245_v33 = vor.u32 %v5988_v26, %v4242_v27 }
  0x37   :  { %v4250_v32 = vld [vmem:[#allocation5 + $0xb8] sm:$0xf0]  ;;  %418 = vmatpush.bf16.msra.mxu1 %v4261_v17  ;;  %v4249_v34 = vor.u32 %v5991_v30, %v4248_v28  ;;  %v4224_v35 = vld [vmem:[#allocation5 + $0x80] sm:$0xf]  ;;  %v5986_v36 = vld [vmem:[#allocation5 + $0x8c] sm:$0xf0] }
  0x38   :  { %431 = vmatpush.bf16.msra.mxu2 %v4265_v21  ;;  %v5984_v37 = vld [vmem:[#allocation5 + $0x84] sm:$0xf]  ;;  %444 = vmatpush.bf16.msra.mxu3 %v4269_v25  ;;  %v4253_v38 = vor.u32 %v5989_v31, %v4250_v32  ;;  %v4226_v39 = vld [vmem:[#allocation5 + $0x90] sm:$0xf0]  ;;  %v4232_v40 = vld [vmem:[#allocation5 + $0x88] sm:$0xf]  ;;  %v4225_v44 = vor.u32 %v5986_v36, %v4224_v35 }
  0x39   :  { %v5987_v41 = vld [vmem:[#allocation5 + $0x94] sm:$0xf0]  ;;  %v5985_v42 = vld [vmem:[#allocation5 + $0x8c] sm:$0xf]  ;;  %v4234_v43 = vld [vmem:[#allocation5 + $0x98] sm:$0xf0]  ;;  %v4229_v45 = vor.u32 %v5984_v37, %v4226_v39 }
  0x3a   :  { %406 = vmatpush.bf16.msra.mxu0 %v4241_v29  ;;  %v4233_v46 = vor.u32 %v5987_v41, %v4232_v40  ;;  %v4208_v47 = vld [vmem:[#allocation5 + $0x60] sm:$0xf]  ;;  %v5982_v48 = vld [vmem:[#allocation5 + $0x6c] sm:$0xf0]  ;;  %v5980_v49 = vld [vmem:[#allocation5 + $0x64] sm:$0xf]  ;;  %v4237_v50 = vor.u32 %v5985_v42, %v4234_v43 }
  0x3b   :  { %419 = vmatpush.bf16.msra.mxu1 %v4245_v33  ;;  %v4210_v51 = vld [vmem:[#allocation5 + $0x70] sm:$0xf0]  ;;  %v4216_v52 = vld [vmem:[#allocation5 + $0x68] sm:$0xf]  ;;  %v5983_v53 = vld [vmem:[#allocation5 + $0x74] sm:$0xf0]  ;;  %v4209_v56 = vor.u32 %v5982_v48, %v4208_v47 }
  0x3c   :  { %432 = vmatpush.bf16.msra.mxu2 %v4249_v34  ;;  %445 = vmatpush.bf16.msra.mxu3 %v4253_v38  ;;  %v5981_v54 = vld [vmem:[#allocation5 + $0x6c] sm:$0xf]  ;;  %v4218_v55 = vld [vmem:[#allocation5 + $0x78] sm:$0xf0]  ;;  %v4213_v57 = vor.u32 %v5980_v49, %v4210_v51  ;;  %v4217_v58 = vor.u32 %v5983_v53, %v4216_v52  ;;  %v4192_v59 = vld [vmem:[#allocation5 + $0x40] sm:$0xf] }
  0x3d   :  { %v5978_v60 = vld [vmem:[#allocation5 + $0x4c] sm:$0xf0]  ;;  %v5976_v61 = vld [vmem:[#allocation5 + $0x44] sm:$0xf]  ;;  %v4221_v62 = vor.u32 %v5981_v54, %v4218_v55  ;;  %v4194_v63 = vld [vmem:[#allocation5 + $0x50] sm:$0xf0] }
  0x3e   :  { %407 = vmatpush.bf16.msra.mxu0 %v4225_v44  ;;  %v4200_v0 = vld [vmem:[#allocation5 + $0x48] sm:$0xf]  ;;  %v5979_v1 = vld [vmem:[#allocation5 + $0x54] sm:$0xf0]  ;;  %v5977_v2 = vld [vmem:[#allocation5 + $0x4c] sm:$0xf]  ;;  %v4193_v4 = vor.u32 %v5978_v60, %v4192_v59  ;;  %v4197_v5 = vor.u32 %v5976_v61, %v4194_v63 }
  0x3f   :  { %420 = vmatpush.bf16.msra.mxu1 %v4229_v45  ;;  %v4202_v3 = vld [vmem:[#allocation5 + $0x58] sm:$0xf0]  ;;  %v4201_v6 = vor.u32 %v5979_v1, %v4200_v0  ;;  %v4176_v7 = vld [vmem:[#allocation5 + $0x20] sm:$0xf]  ;;  %v5974_v8 = vld [vmem:[#allocation5 + $0x2c] sm:$0xf0] }
  0x40   :  { %433 = vmatpush.bf16.msra.mxu2 %v4233_v46  ;;  %446 = vmatpush.bf16.msra.mxu3 %v4237_v50  ;;  %v5972_v9 = vld [vmem:[#allocation5 + $0x24] sm:$0xf]  ;;  %v4205_v10 = vor.u32 %v5977_v2, %v4202_v3  ;;  %v4178_v11 = vld [vmem:[#allocation5 + $0x30] sm:$0xf0]  ;;  %v4184_v12 = vld [vmem:[#allocation5 + $0x28] sm:$0xf]  ;;  %v4177_v16 = vor.u32 %v5974_v8, %v4176_v7 }
  0x41   :  { %v5975_v13 = vld [vmem:[#allocation5 + $0x34] sm:$0xf0]  ;;  %v5973_v14 = vld [vmem:[#allocation5 + $0x2c] sm:$0xf]  ;;  %v4186_v15 = vld [vmem:[#allocation5 + $0x38] sm:$0xf0]  ;;  %v4181_v17 = vor.u32 %v5972_v9, %v4178_v11 }
  0x42   :  { %408 = vmatpush.bf16.msra.mxu0 %v4209_v56  ;;  %v4185_v18 = vor.u32 %v5975_v13, %v4184_v12  ;;  %v4160_v19 = vld [vmem:[#allocation5] sm:$0xf]  ;;  %v5970_v20 = vld [vmem:[#allocation5 + $0xc] sm:$0xf0]  ;;  %v5968_v21 = vld [vmem:[#allocation5 + $0x4] sm:$0xf]  ;;  %v4189_v22 = vor.u32 %v5973_v14, %v4186_v15 }
  0x43   :  { %421 = vmatpush.bf16.msra.mxu1 %v4213_v57  ;;  %v4162_v23 = vld [vmem:[#allocation5 + $0x10] sm:$0xf0]  ;;  %v4168_v24 = vld [vmem:[#allocation5 + $0x8] sm:$0xf]  ;;  %v5971_v25 = vld [vmem:[#allocation5 + $0x14] sm:$0xf0]  ;;  %v4161_v28 = vor.u32 %v5970_v20, %v4160_v19 }
  0x44   :  { %434 = vmatpush.bf16.msra.mxu2 %v4217_v58  ;;  %447 = vmatpush.bf16.msra.mxu3 %v4221_v62  ;;  %v5969_v26 = vld [vmem:[#allocation5 + $0xc] sm:$0xf]  ;;  %v4170_v27 = vld [vmem:[#allocation5 + $0x18] sm:$0xf0]  ;;  %v4165_v30 = vor.u32 %v5968_v21, %v4162_v23  ;;  %v4169_v31 = vor.u32 %v5971_v25, %v4168_v24  ;;  %v234_v46 = vld [vmem:[#allocation7] sm:$0xf] }
  0x45   :  { %v200_v29 = vld [vmem:[#allocation2] sm:$0xff]  ;;  %v4173_v32 = vor.u32 %v5969_v26, %v4170_v27  ;;  %v4404_v34 = vld [vmem:[#allocation11 + $0xe0] sm:$0xf]  ;;  %v236_v47 = vperm.slane %v234_v46, 0  ;;  %v237_v48 = vperm.slane %v234_v46, 1  ;;  %v238_v53 = vperm.slane %v234_v46, 2 }
  0x46   :  { %409 = vmatpush.bf16.msra.mxu0 %v4193_v4  ;;  %v201_v33 = vpack.c.bf16 %v200_v29, %v200_v29  ;;  %v6030_v35 = vld [vmem:[#allocation11 + $0xec] sm:$0xf0]  ;;  %v4532_v36 = vld [vmem:[#allocation11 + $0x1e0] sm:$0xf]  ;;  %v239_v54 = vperm.slane %v234_v46, 3  ;;  %s6794_s10 = smov [#allocation20]  }
  0x47   :  { %422 = vmatpush.bf16.msra.mxu1 %v4197_v5  ;;  %v4405_v37 = vor.u32 %v6030_v35, %v4404_v34  ;;  %v6062_v38 = vld [vmem:[#allocation11 + $0x1ec] sm:$0xf0]  ;;  %v4660_v39 = vld [vmem:[#allocation11 + $0x2e0] sm:$0xf]  ;;  %s4141_s5 = sshll.u32 %s6794_s10, 4  ;;  %s4143_s26 = sshll.u32 %s7116_s11, 4  ;;  %s4142_s5 = int_to_ptr.vmem [resolvable:$true] %s4141_s5  ;;  %s4144_s26 = int_to_ptr.hbm [resolvable:$true] %s4143_s26 }
  0x48   :  { %435 = vmatpush.bf16.msra.mxu2 %v4201_v6  ;;  %448 = vmatpush.bf16.msra.mxu3 %v4205_v10  ;;  %v6094_v40 = vld [vmem:[#allocation11 + $0x2ec] sm:$0xf0]  ;;  %v4533_v41 = vor.u32 %v6062_v38, %v4532_v36  ;;  %v4788_v43 = vld [vmem:[#allocation11 + $0x3e0] sm:$0xf] }
  0x49   :  { %v4661_v42 = vor.u32 %v6094_v40, %v4660_v39  ;;  %v6126_v44 = vld [vmem:[#allocation11 + $0x3ec] sm:$0xf0]  ;;  %v4388_v9 = vld [vmem:[#allocation11 + $0xc0] sm:$0xf] }
  0x4a   :  { %410 = vmatpush.bf16.msra.mxu0 %v4177_v16  ;;  %v4789_v45 = vor.u32 %v6126_v44, %v4788_v43  ;;  %v6026_v10 = vld [vmem:[#allocation11 + $0xcc] sm:$0xf0]  ;;  %v4516_v11 = vld [vmem:[#allocation11 + $0x1c0] sm:$0xf] }
  0x4b   :  { %423 = vmatpush.bf16.msra.mxu1 %v4181_v17  ;;  %v4389_v12 = vor.u32 %v6026_v10, %v4388_v9  ;;  %v6058_v13 = vld [vmem:[#allocation11 + $0x1cc] sm:$0xf0]  ;;  %v4644_v14 = vld [vmem:[#allocation11 + $0x2c0] sm:$0xf] }
  0x4c   :  { %436 = vmatpush.bf16.msra.mxu2 %v4185_v18  ;;  %449 = vmatpush.bf16.msra.mxu3 %v4189_v22  ;;  %v6090_v15 = vld [vmem:[#allocation11 + $0x2cc] sm:$0xf0]  ;;  %v4517_v16 = vor.u32 %v6058_v13, %v4516_v11  ;;  %v4772_v18 = vld [vmem:[#allocation11 + $0x3c0] sm:$0xf] }
  0x4d   :  { %v4645_v17 = vor.u32 %v6090_v15, %v4644_v14  ;;  %v6122_v19 = vld [vmem:[#allocation11 + $0x3cc] sm:$0xf0]  ;;  %v4372_v21 = vld [vmem:[#allocation11 + $0xa0] sm:$0xf] }
  0x4e   :  { %411 = vmatpush.bf16.msra.mxu0 %v4161_v28  ;;  %v4773_v20 = vor.u32 %v6122_v19, %v4772_v18  ;;  %v6022_v22 = vld [vmem:[#allocation11 + $0xac] sm:$0xf0]  ;;  %v4500_v23 = vld [vmem:[#allocation11 + $0x1a0] sm:$0xf] }
  0x4f   :  { %424 = vmatpush.bf16.msra.mxu1 %v4165_v30  ;;  %v4373_v24 = vor.u32 %v6022_v22, %v4372_v21  ;;  %v6054_v25 = vld [vmem:[#allocation11 + $0x1ac] sm:$0xf0]  ;;  %v4628_v26 = vld [vmem:[#allocation11 + $0x2a0] sm:$0xf] }
  0x50   :  { %437 = vmatpush.bf16.msra.mxu2 %v4169_v31  ;;  %450 = vmatpush.bf16.msra.mxu3 %v4173_v32  ;;  %v6086_v27 = vld [vmem:[#allocation11 + $0x2ac] sm:$0xf0]  ;;  %v4501_v28 = vor.u32 %v6054_v25, %v4500_v23  ;;  %v4756_v30 = vld [vmem:[#allocation11 + $0x3a0] sm:$0xf] }
  0x51   :  { %412 = vmatmul.bf16.vlgmr.msra.gmra.mxu0 %v201_v33  ;;  %v4629_v29 = vor.u32 %v6086_v27, %v4628_v26  ;;  %v6118_v31 = vld [vmem:[#allocation11 + $0x3ac] sm:$0xf0]  ;;  %v4484_v35 = vld [vmem:[#allocation11 + $0x180] sm:$0xf] }
  0x52   :  { %425 = vmatmul.bf16.vlgmr.msra.gmra.mxu1 %v201_v33  ;;  %1327 = vmatpush.bf16.msrb.mxu0 %v4405_v37  ;;  %v4757_v32 = vor.u32 %v6118_v31, %v4756_v30  ;;  %v6018_v34 = vld [vmem:[#allocation11 + $0x8c] sm:$0xf0]  ;;  %v4612_v38 = vld [vmem:[#allocation11 + $0x280] sm:$0xf] }
  0x53   :  { %438 = vmatmul.bf16.vlgmr.msra.gmra.mxu2 %v201_v33  ;;  %451 = vmatmul.bf16.vlgmr.msra.gmra.mxu3 %v201_v33  ;;  %v4356_v33 = vld [vmem:[#allocation11 + $0x80] sm:$0xf]  ;;  %v6050_v37 = vld [vmem:[#allocation11 + $0x18c] sm:$0xf0] }
  0x54   :  { %1340 = vmatpush.bf16.msrb.mxu1 %v4533_v41  ;;  %1353 = vmatpush.bf16.msrb.mxu2 %v4661_v42  ;;  %v4357_v36 = vor.u32 %v6018_v34, %v4356_v33  ;;  %v6082_v39 = vld [vmem:[#allocation11 + $0x28c] sm:$0xf0]  ;;  %v4485_v40 = vor.u32 %v6050_v37, %v4484_v35  ;;  %v4740_v42 = vld [vmem:[#allocation11 + $0x380] sm:$0xf]  ;;  %v4406_v34 = vld [vmem:[#allocation11 + $0xf0] sm:$0xf0] }
  0x55   :  { %1366 = vmatpush.bf16.msrb.mxu3 %v4789_v45  ;;  %v4613_v41 = vor.u32 %v6082_v39, %v4612_v38  ;;  %v6114_v43 = vld [vmem:[#allocation11 + $0x38c] sm:$0xf0]  ;;  %v4340_v45 = vld [vmem:[#allocation11 + $0x60] sm:$0xf]  ;;  %v6060_v35 = vld [vmem:[#allocation11 + $0x1e4] sm:$0xf] }
  0x56   :  { %1328 = vmatpush.bf16.msrb.mxu0 %v4389_v12  ;;  %v4741_v44 = vor.u32 %v6114_v43, %v4740_v42  ;;  %v6014_v46 = vld [vmem:[#allocation11 + $0x6c] sm:$0xf0]  ;;  %v4308_v9 = vld [vmem:[#allocation11 + $0x20] sm:$0xf]  ;;  %v6092_v39 = vld [vmem:[#allocation11 + $0x2e4] sm:$0xf] }
  0x57   :  { %v6006_v10 = vld [vmem:[#allocation11 + $0x2c] sm:$0xf0]  ;;  %v4436_v11 = vld [vmem:[#allocation11 + $0x120] sm:$0xf]  ;;  %v4790_v43 = vld [vmem:[#allocation11 + $0x3f0] sm:$0xf0] }
  0x58   :  { %1341 = vmatpush.bf16.msrb.mxu1 %v4517_v16  ;;  %1354 = vmatpush.bf16.msrb.mxu2 %v4645_v17  ;;  %v4309_v12 = vor.u32 %v6006_v10, %v4308_v9  ;;  %v6038_v13 = vld [vmem:[#allocation11 + $0x12c] sm:$0xf0]  ;;  %v4564_v14 = vld [vmem:[#allocation11 + $0x220] sm:$0xf]  ;;  %v6016_v9 = vld [vmem:[#allocation11 + $0x84] sm:$0xf] }
  0x59   :  { %1367 = vmatpush.bf16.msrb.mxu3 %v4773_v20  ;;  %v6070_v15 = vld [vmem:[#allocation11 + $0x22c] sm:$0xf0]  ;;  %v4437_v16 = vor.u32 %v6038_v13, %v4436_v11  ;;  %v4692_v18 = vld [vmem:[#allocation11 + $0x320] sm:$0xf]  ;;  %v4358_v10 = vld [vmem:[#allocation11 + $0x90] sm:$0xf0] }
  0x5a   :  { %1329 = vmatpush.bf16.msrb.mxu0 %v4373_v24  ;;  %v4565_v17 = vor.u32 %v6070_v15, %v4564_v14  ;;  %v6102_v19 = vld [vmem:[#allocation11 + $0x32c] sm:$0xf0]  ;;  %v4292_v21 = vld [vmem:[#allocation11] sm:$0xf]  ;;  %v6048_v11 = vld [vmem:[#allocation11 + $0x184] sm:$0xf] }
  0x5b   :  { %v4693_v20 = vor.u32 %v6102_v19, %v4692_v18  ;;  %v6002_v22 = vld [vmem:[#allocation11 + $0xc] sm:$0xf0]  ;;  %v4420_v23 = vld [vmem:[#allocation11 + $0x100] sm:$0xf]  ;;  %v4486_v14 = vld [vmem:[#allocation11 + $0x190] sm:$0xf0] }
  0x5c   :  { %1342 = vmatpush.bf16.msrb.mxu1 %v4501_v28  ;;  %1355 = vmatpush.bf16.msrb.mxu2 %v4629_v29  ;;  %v4293_v24 = vor.u32 %v6002_v22, %v4292_v21  ;;  %v6034_v25 = vld [vmem:[#allocation11 + $0x10c] sm:$0xf0]  ;;  %v4548_v26 = vld [vmem:[#allocation11 + $0x200] sm:$0xf]  ;;  %v6080_v15 = vld [vmem:[#allocation11 + $0x284] sm:$0xf]  ;;  %v4489_v18 = vor.u32 %v6048_v11, %v4486_v14 }
  0x5d   :  { %1368 = vmatpush.bf16.msrb.mxu3 %v4757_v32  ;;  %v6066_v27 = vld [vmem:[#allocation11 + $0x20c] sm:$0xf0]  ;;  %v4421_v28 = vor.u32 %v6034_v25, %v4420_v23  ;;  %v4676_v30 = vld [vmem:[#allocation11 + $0x300] sm:$0xf]  ;;  %v6028_v32 = vld [vmem:[#allocation11 + $0xe4] sm:$0xf] }
  0x5e   :  { %1330 = vmatpush.bf16.msrb.mxu0 %v4357_v36  ;;  %v4549_v29 = vor.u32 %v6066_v27, %v4548_v26  ;;  %v6098_v31 = vld [vmem:[#allocation11 + $0x30c] sm:$0xf0]  ;;  %v4534_v36 = vld [vmem:[#allocation11 + $0x1f0] sm:$0xf0]  ;;  %v4409_v37 = vor.u32 %v6028_v32, %v4406_v34  ;;  %v6112_v19 = vld [vmem:[#allocation11 + $0x384] sm:$0xf] }
  0x5f   :  { %v4677_v33 = vor.u32 %v6098_v31, %v4676_v30  ;;  %v4537_v38 = vor.u32 %v6060_v35, %v4534_v36  ;;  %v6012_v21 = vld [vmem:[#allocation11 + $0x64] sm:$0xf]  ;;  %v4342_v23 = vld [vmem:[#allocation11 + $0x70] sm:$0xf0] }
  0x60   :  { %1343 = vmatpush.bf16.msrb.mxu1 %v4485_v40  ;;  %1356 = vmatpush.bf16.msrb.mxu2 %v4613_v41  ;;  %v4662_v40 = vld [vmem:[#allocation11 + $0x2f0] sm:$0xf0]  ;;  %v6124_v41 = vld [vmem:[#allocation11 + $0x3e4] sm:$0xf]  ;;  %v4345_v34 = vor.u32 %v6012_v21, %v4342_v23  ;;  %v456_v21 = vld [vmem:[#allocation8] sm:$0xf] }
  0x61   :  { %1369 = vmatpush.bf16.msrb.mxu3 %v4741_v44  ;;  %v4665_v42 = vor.u32 %v6092_v39, %v4662_v40  ;;  %v6024_v44 = vld [vmem:[#allocation11 + $0xc4] sm:$0xf]  ;;  %v4470_v25 = vld [vmem:[#allocation11 + $0x170] sm:$0xf0]  ;;  %v457_v23 = vld [vmem:[#allocation10] sm:$0xf] }
  0x62   :  { %v6076_v27 = vld [vmem:[#allocation11 + $0x264] sm:$0xf]  ;;  %v4726_v31 = vld [vmem:[#allocation11 + $0x370] sm:$0xf0] }
  0x63   :  { %v6108_v30 = vld [vmem:[#allocation11 + $0x364] sm:$0xf]  ;;  %v4454_v40 = vld [vmem:[#allocation11 + $0x150] sm:$0xf0] }
  0x64   :  { %v6008_v36 = vld [vmem:[#allocation11 + $0x44] sm:$0xf] }
  0x65   :  { %v6040_v39 = vld [vmem:[#allocation11 + $0x144] sm:$0xf] }
  0x66   :  { %v6096_v11 = vld [vmem:[#allocation11 + $0x304] sm:$0xf] }
  0xce   :  { %v413_v49 = vpop.f32.mrf.mxu0 }
  0xcf   :  { %v426_v50 = vpop.f32.mrf.mxu1  ;;  %v6900_v51 = vadd.f32 %v413_v49, %v236_v47  ;;  %v4468_v47 = vld [vmem:[#allocation11 + $0x160] sm:$0xf]  ;;  %v6046_v49 = vld [vmem:[#allocation11 + $0x16c] sm:$0xf0] }
  0xd0   :  { %v6902_v52 = vadd.f32 %v426_v50, %v237_v48  ;;  %v4341_v48 = vor.u32 %v6014_v46, %v4340_v45  ;;  %v4596_v50 = vld [vmem:[#allocation11 + $0x260] sm:$0xf]  ;;  %v4390_v45 = vld [vmem:[#allocation11 + $0xd0] sm:$0xf0]  ;;  %v4793_v46 = vor.u32 %v6124_v41, %v4790_v43  ;;  %v6072_v43 = vld [vmem:[#allocation11 + $0x244] sm:$0xf] }
  0xd1   :  { %v463_v57 = vmul.f32 %v6900_v51, %v6900_v51 }
  0xd2   :  { %v458_v55 = vadd.f32 %v6902_v52, %v6900_v51  ;;  %v464_v58 = vmul.f32 %v6902_v52, %v6902_v52  ;;  %1331 = vmatpush.bf16.msrb.mxu0 %v4341_v48  ;;  %v6056_v48 = vld [vmem:[#allocation11 + $0x1c4] sm:$0xf] }
  0xd4   :  { %v467_v3 = vadd.f32 %v464_v58, %v463_v57  ;;  %v6110_v57 = vld [vmem:[#allocation11 + $0x36c] sm:$0xf0] }
  0xd6   :  { %v439_v56 = vpop.f32.mrf.mxu2  ;;  %v452_v60 = vpop.f32.mrf.mxu3 }
  0xd7   :  { %v6910_v59 = vadd.f32 %v439_v56, %v238_v53  ;;  %v415_v61 = vpop.f32.mrf.mxu0  ;;  %v6912_v62 = vadd.f32 %v452_v60, %v239_v54  ;;  %v428_v63 = vpop.f32.mrf.mxu1  ;;  %v6078_v53 = vld [vmem:[#allocation11 + $0x26c] sm:$0xf0]  ;;  %v4469_v54 = vor.u32 %v6046_v49, %v4468_v47  ;;  %v4724_v56 = vld [vmem:[#allocation11 + $0x360] sm:$0xf]  ;;  %v4393_v47 = vor.u32 %v6024_v44, %v4390_v45  ;;  %v4518_v49 = vld [vmem:[#allocation11 + $0x1d0] sm:$0xf0] }
  0xd8   :  { %v4725_v58 = vor.u32 %v6110_v57, %v4724_v56  ;;  %v4324_v60 = vld [vmem:[#allocation11 + $0x40] sm:$0xf]  ;;  %v6010_v61 = vld [vmem:[#allocation11 + $0x4c] sm:$0xf0]  ;;  %v4774_v56 = vld [vmem:[#allocation11 + $0x3d0] sm:$0xf0] }
  0xd9   :  { %v459_v0 = vadd.f32 %v458_v55, %v6910_v59  ;;  %v465_v1 = vmul.f32 %v6910_v59, %v6910_v59  ;;  %v466_v6 = vmul.f32 %v6912_v62, %v6912_v62  ;;  %v4597_v55 = vor.u32 %v6078_v53, %v4596_v50  ;;  %1344 = vmatpush.bf16.msrb.mxu1 %v4469_v54  ;;  %v4452_v63 = vld [vmem:[#allocation11 + $0x140] sm:$0xf]  ;;  %v6088_v50 = vld [vmem:[#allocation11 + $0x2c4] sm:$0xf]  ;;  %v4646_v54 = vld [vmem:[#allocation11 + $0x2d0] sm:$0xf0] }
  0xda   :  { %1370 = vmatpush.bf16.msrb.mxu3 %v4725_v58  ;;  %v4521_v53 = vor.u32 %v6056_v48, %v4518_v49  ;;  %v4649_v57 = vor.u32 %v6088_v50, %v4646_v54  ;;  %v4582_v44 = vld [vmem:[#allocation11 + $0x250] sm:$0xf0]  ;;  %v6104_v45 = vld [vmem:[#allocation11 + $0x344] sm:$0xf]  ;;  %v4457_v49 = vor.u32 %v6040_v39, %v4454_v40 }
  0xdb   :  { %v460_v2 = vadd.f32 %v459_v0, %v6912_v62  ;;  %v468_v7 = vadd.f32 %v467_v3, %v465_v1  ;;  %1357 = vmatpush.bf16.msrb.mxu2 %v4597_v55  ;;  %v4325_v0 = vor.u32 %v6010_v61, %v4324_v60  ;;  %v6042_v1 = vld [vmem:[#allocation11 + $0x14c] sm:$0xf0]  ;;  %v6120_v55 = vld [vmem:[#allocation11 + $0x3c4] sm:$0xf]  ;;  %v4310_v54 = vld [vmem:[#allocation11 + $0x30] sm:$0xf0] }
  0xdc   :  { %v6074_v3 = vld [vmem:[#allocation11 + $0x24c] sm:$0xf0]  ;;  %v4777_v58 = vor.u32 %v6120_v55, %v4774_v56  ;;  %v6020_v61 = vld [vmem:[#allocation11 + $0xa4] sm:$0xf]  ;;  %v4438_v56 = vld [vmem:[#allocation11 + $0x130] sm:$0xf0] }
  0xdd   :  { %461 = vadd.xlane.f32.xlu0 %v460_v2  ;;  %v469_v8 = vadd.f32 %v468_v7, %v466_v6  ;;  %v4580_v2 = vld [vmem:[#allocation11 + $0x240] sm:$0xf]  ;;  %v6106_v7 = vld [vmem:[#allocation11 + $0x34c] sm:$0xf0]  ;;  %1332 = vmatpush.bf16.msrb.mxu0 %v4325_v0  ;;  %v6052_v0 = vld [vmem:[#allocation11 + $0x1a4] sm:$0xf] }
  0xde   :  { %v441_v4 = vpop.f32.mrf.mxu2  ;;  %v454_v5 = vpop.f32.mrf.mxu3  ;;  %v4708_v6 = vld [vmem:[#allocation11 + $0x340] sm:$0xf]  ;;  %v6004_v50 = vld [vmem:[#allocation11 + $0x24] sm:$0xf] }
  0xdf   :  { %v4453_v4 = vor.u32 %v6042_v1, %v4452_v63  ;;  %v4581_v5 = vor.u32 %v6074_v3, %v4580_v2  ;;  %v4374_v63 = vld [vmem:[#allocation11 + $0xb0] sm:$0xf0]  ;;  %v6036_v55 = vld [vmem:[#allocation11 + $0x124] sm:$0xf] }
  0xe0   :  { %v4377_v2 = vor.u32 %v6020_v61, %v4374_v63  ;;  %v4502_v3 = vld [vmem:[#allocation11 + $0x1b0] sm:$0xf0]  ;;  %v6100_v61 = vld [vmem:[#allocation11 + $0x324] sm:$0xf] }
  0xe1   :  { %1345 = vmatpush.bf16.msrb.mxu1 %v4453_v4  ;;  %1358 = vmatpush.bf16.msrb.mxu2 %v4581_v5  ;;  %v6084_v4 = vld [vmem:[#allocation11 + $0x2a4] sm:$0xf]  ;;  %v4505_v5 = vor.u32 %v6052_v0, %v4502_v3  ;;  %v4694_v63 = vld [vmem:[#allocation11 + $0x330] sm:$0xf0]  ;;  %v4313_v0 = vor.u32 %v6004_v50, %v4310_v54 }
  0xe2   :  { %1333 = vmatpush.bf16.msrb.mxu0 %v4309_v12  ;;  %v6000_v3 = vld [vmem:[#allocation11 + $0x4] sm:$0xf] }
  0xe5   :  { %470 = vadd.xlane.f32.xlu0 %v469_v8  ;;  %v4709_v8 = vor.u32 %v6106_v7, %v4708_v6  ;;  %1346 = vmatpush.bf16.msrb.mxu1 %v4437_v16  ;;  %v4630_v6 = vld [vmem:[#allocation11 + $0x2b0] sm:$0xf0]  ;;  %v6116_v7 = vld [vmem:[#allocation11 + $0x3a4] sm:$0xf] }
  0xe6   :  { %1359 = vmatpush.bf16.msrb.mxu2 %v4565_v17  ;;  %1334 = vmatpush.bf16.msrb.mxu0 %v4293_v24  ;;  %v4633_v12 = vor.u32 %v6084_v4, %v4630_v6  ;;  %v4614_v16 = vld [vmem:[#allocation11 + $0x290] sm:$0xf0]  ;;  %v4361_v17 = vor.u32 %v6016_v9, %v4358_v10  ;;  %v6044_v24 = vld [vmem:[#allocation11 + $0x164] sm:$0xf] }
  0xe7   :  { %1371 = vmatpush.bf16.msrb.mxu3 %v4709_v8  ;;  %v4758_v8 = vld [vmem:[#allocation11 + $0x3b0] sm:$0xf0]  ;;  %v4617_v22 = vor.u32 %v6080_v15, %v4614_v16  ;;  %v4473_v35 = vor.u32 %v6044_v24, %v4470_v25  ;;  %v6032_v6 = vld [vmem:[#allocation11 + $0x104] sm:$0xf] }
  0xe8   :  { %v4761_v13 = vor.u32 %v6116_v7, %v4758_v8  ;;  %v4422_v7 = vld [vmem:[#allocation11 + $0x110] sm:$0xf0]  ;;  %v4697_v8 = vor.u32 %v6100_v61, %v4694_v63  ;;  %v6064_v9 = vld [vmem:[#allocation11 + $0x204] sm:$0xf] }
  0xe9   :  { %1347 = vmatpush.bf16.msrb.mxu1 %v4421_v28  ;;  %v4598_v28 = vld [vmem:[#allocation11 + $0x270] sm:$0xf0]  ;;  %v4425_v15 = vor.u32 %v6032_v6, %v4422_v7 }
  0xea   :  { %1360 = vmatpush.bf16.msrb.mxu2 %v4549_v29  ;;  %1379 = vmatpush.bf16.msra.mxu0 %v4409_v37  ;;  %v4601_v37 = vor.u32 %v6076_v27, %v4598_v28  ;;  %v4550_v10 = vld [vmem:[#allocation11 + $0x210] sm:$0xf0] }
  0xeb   :  { %1372 = vmatpush.bf16.msrb.mxu3 %v4693_v20  ;;  %v4742_v20 = vld [vmem:[#allocation11 + $0x390] sm:$0xf0] }
  0xec   :  { %v4745_v26 = vor.u32 %v6112_v19, %v4742_v20 }
  0xed   :  { %1392 = vmatpush.bf16.msra.mxu1 %v4537_v38  ;;  %v4326_v38 = vld [vmem:[#allocation11 + $0x50] sm:$0xf0] }
  0xee   :  { %1405 = vmatpush.bf16.msra.mxu2 %v4665_v42  ;;  %1380 = vmatpush.bf16.msra.mxu0 %v4393_v47  ;;  %v4729_v42 = vor.u32 %v6108_v30, %v4726_v31  ;;  %v4329_v48 = vor.u32 %v6008_v36, %v4326_v38  ;;  %v509_v30 = vperm.slane %v457_v23, 0  ;;  %v497_v31 = vperm.slane %v456_v21, 1 }
  0xef   :  { %1373 = vmatpush.bf16.msrb.mxu3 %v4677_v33  ;;  %v512_v36 = vperm.slane %v457_v23, 3 }
  0xf1   :  { %1393 = vmatpush.bf16.msra.mxu1 %v4521_v53  ;;  %v4585_v53 = vor.u32 %v6072_v43, %v4582_v44 }
  0xf2   :  { %1406 = vmatpush.bf16.msra.mxu2 %v4649_v57  ;;  %1381 = vmatpush.bf16.msra.mxu0 %v4377_v2  ;;  %v4441_v2 = vor.u32 %v6036_v55, %v4438_v56  ;;  %v4412_v55 = vld [vmem:[#allocation11 + $0xe8] sm:$0xf]  ;;  %v6031_v56 = vld [vmem:[#allocation11 + $0xf4] sm:$0xf0] }
  0xf3   :  { %1418 = vmatpush.bf16.msra.mxu3 %v4793_v46  ;;  %v4710_v46 = vld [vmem:[#allocation11 + $0x350] sm:$0xf0] }
  0xf4   :  { %v4713_v57 = vor.u32 %v6104_v45, %v4710_v46 }
  0xf5   :  { %1394 = vmatpush.bf16.msra.mxu1 %v4505_v5  ;;  %v4294_v5 = vld [vmem:[#allocation11 + $0x10] sm:$0xf0] }
  0xf6   :  { %1407 = vmatpush.bf16.msra.mxu2 %v4633_v12  ;;  %1382 = vmatpush.bf16.msra.mxu0 %v4361_v17  ;;  %v4678_v12 = vld [vmem:[#allocation11 + $0x310] sm:$0xf0]  ;;  %v4297_v14 = vor.u32 %v6000_v3, %v4294_v5  ;;  %v4553_v17 = vor.u32 %v6064_v9, %v4550_v10  ;;  %v4413_v3 = vor.u32 %v6031_v56, %v4412_v55  ;;  %v6095_v5 = vld [vmem:[#allocation11 + $0x2f4] sm:$0xf0]  ;;  %v4796_v10 = vld [vmem:[#allocation11 + $0x3e8] sm:$0xf] }
  0xf7   :  { %1419 = vmatpush.bf16.msra.mxu3 %v4777_v58  ;;  %v6068_v58 = vld [vmem:[#allocation11 + $0x224] sm:$0xf]  ;;  %v4476_v56 = vld [vmem:[#allocation11 + $0x168] sm:$0xf] }
  0xf9   :  { %1395 = vmatpush.bf16.msra.mxu1 %v4489_v18  ;;  %v4681_v18 = vor.u32 %v6096_v11, %v4678_v12  ;;  %v6127_v11 = vld [vmem:[#allocation11 + $0x3f4] sm:$0xf0] }
  0xfa   :  { %1408 = vmatpush.bf16.msra.mxu2 %v4617_v22  ;;  %1383 = vmatpush.bf16.msra.mxu0 %v4345_v34 }
  0xfb   :  { %1420 = vmatpush.bf16.msra.mxu3 %v4761_v13 }
  0xfd   :  { %1396 = vmatpush.bf16.msra.mxu1 %v4473_v35  ;;  %v510_v35 = vperm.slane %v457_v23, 1 }
  0xfe   :  { %1409 = vmatpush.bf16.msra.mxu2 %v4601_v37  ;;  %1384 = vmatpush.bf16.msra.mxu0 %v4329_v48 }
  0xff   :  { %1421 = vmatpush.bf16.msra.mxu3 %v4745_v26 }
 0x101   :  { %1397 = vmatpush.bf16.msra.mxu1 %v4457_v49 }
 0x102   :  { %1410 = vmatpush.bf16.msra.mxu2 %v4585_v53  ;;  %1385 = vmatpush.bf16.msra.mxu0 %v4313_v0 }
 0x103   :  { %1422 = vmatpush.bf16.msra.mxu3 %v4729_v42 }
 0x105   :  { %1398 = vmatpush.bf16.msra.mxu1 %v4441_v2 }
 0x106   :  { %1386 = vmatpush.bf16.msra.mxu0 %v4297_v14 }
 0x107   :  { %1423 = vmatpush.bf16.msra.mxu3 %v4713_v57 }
 0x109   :  { %1399 = vmatpush.bf16.msra.mxu1 %v4425_v15  ;;  %v4396_v15 = vld [vmem:[#allocation11 + $0xc8] sm:$0xf] }
 0x10b   :  { %1424 = vmatpush.bf16.msra.mxu3 %v4697_v8 }
 0x10f   :  { %1425 = vmatpush.bf16.msra.mxu3 %v4681_v18 }
 0x150   :  { %v462_v60 = vpop.xlane.xlu0 %461 }
 0x151   :  { %v6920_v1 = vmul.f32 0.0025, %v462_v60  ;;  %v4566_v60 = vld [vmem:[#allocation11 + $0x230] sm:$0xf0] }
 0x152   :  { %v4569_v4 = vor.u32 %v6068_v58, %v4566_v60  ;;  %v4540_v58 = vld [vmem:[#allocation11 + $0x1e8] sm:$0xf]  ;;  %v6063_v60 = vld [vmem:[#allocation11 + $0x1f4] sm:$0xf0] }
 0x153   :  { %v474_v32 = vmul.f32 %v6920_v1, %v6920_v1  ;;  %v476_v24 = vsub.f32 %v6900_v51, %v6920_v1  ;;  %v477_v25 = vsub.f32 %v6902_v52, %v6920_v1  ;;  %v478_v26 = vsub.f32 %v6910_v59, %v6920_v1 }
 0x154   :  { %1411 = vmatpush.bf16.msra.mxu2 %v4569_v4  ;;  %v479_v27 = vsub.f32 %v6912_v62, %v6920_v1  ;;  %v511_v51 = vperm.slane %v457_v23, 2  ;;  %v4668_v4 = vld [vmem:[#allocation11 + $0x2e8] sm:$0xf]  ;;  %v4541_v9 = vor.u32 %v6063_v60, %v4540_v58 }
 0x155   :  { %v4604_v60 = vld [vmem:[#allocation11 + $0x268] sm:$0xf] }
 0x158   :  { %v471_v29 = vpop.xlane.xlu0 %470  ;;  %1412 = vmatpush.bf16.msra.mxu2 %v4553_v17 }
 0x159   :  { %v473_v33 = vmul.f32 0.0025, %v471_v29  ;;  %v496_v29 = vperm.slane %v456_v21, 0 }
 0x15b   :  { %v475_v41 = vsub.f32 %v473_v33, %v474_v32  ;;  %v498_v32 = vperm.slane %v456_v21, 2  ;;  %v499_v33 = vperm.slane %v456_v21, 3  ;;  %v6059_v21 = vld [vmem:[#allocation11 + $0x1d4] sm:$0xf0] }
 0x15d   :  { %v480_v47 = vadd.f32 1e-05, %v475_v41 }
 0x15f   :  { %6433 = vrsqrt.f32 %v480_v47  ;;  %vm487_vm1 = vweird.f32 %v480_v47 }
 0x165   :  { %v6434_v13 = vpop.eup %6433 }
 0x166   :  { %v482_v16 = vmul.f32 %v6434_v13, %v480_v47  ;;  %vm488_vm0 = vweird.f32 %v6434_v13 }
 0x167   :  { %vm489_vm2 = vmor %vm487_vm1, %vm488_vm0 }
 0x168   :  { %v483_v19 = vmul.f32 %v6434_v13, %v482_v16  ;;  %v6027_v16 = vld [vmem:[#allocation11 + $0xd4] sm:$0xf0] }
 0x16a   :  { %v484_v20 = vmul.f32 0.5, %v483_v19  ;;  %v4669_v19 = vor.u32 %v6095_v5, %v4668_v4  ;;  %v4332_v4 = vld [vmem:[#allocation11 + $0x48] sm:$0xf]  ;;  %v6011_v5 = vld [vmem:[#allocation11 + $0x54] sm:$0xf0] }
 0x16c   :  { %v485_v22 = vsub.f32 1.5, %v484_v20  ;;  %v4524_v20 = vld [vmem:[#allocation11 + $0x1c8] sm:$0xf] }
 0x16e   :  { %v486_v28 = vmul.f32 %v6434_v13, %v485_v22 }
 0x170   :  { %v490_v34 = vsel %vm489_vm2, %v6434_v13, %v486_v28  ;;  %v4397_v28 = vor.u32 %v6027_v16, %v4396_v15  ;;  %v6107_v15 = vld [vmem:[#allocation11 + $0x354] sm:$0xf0] }
 0x171   :  { %v491_v37 = vmul.f32 %v490_v34, %v476_v24  ;;  %v492_v52 = vmul.f32 %v490_v34, %v477_v25  ;;  %v493_v38 = vmul.f32 %v490_v34, %v478_v26  ;;  %v494_v39 = vmul.f32 %v490_v34, %v479_v27  ;;  %v4652_v25 = vld [vmem:[#allocation11 + $0x2c8] sm:$0xf]  ;;  %v6091_v26 = vld [vmem:[#allocation11 + $0x2d4] sm:$0xf0] }
 0x172   :  { %v4797_v24 = vor.u32 %v6127_v11, %v4796_v10  ;;  %v4653_v34 = vor.u32 %v6091_v26, %v4652_v25  ;;  %v4588_v10 = vld [vmem:[#allocation11 + $0x248] sm:$0xf]  ;;  %v6075_v11 = vld [vmem:[#allocation11 + $0x254] sm:$0xf0] }
 0x173   :  { %v504_v59 = vmul.f32 %v496_v29, %v491_v37  ;;  %v505_v40 = vmul.f32 %v497_v31, %v492_v52  ;;  %v506_v41 = vmul.f32 %v498_v32, %v493_v38  ;;  %v507_v62 = vmul.f32 %v499_v33, %v494_v39  ;;  %v4780_v29 = vld [vmem:[#allocation11 + $0x3c8] sm:$0xf]  ;;  %v6023_v33 = vld [vmem:[#allocation11 + $0xb4] sm:$0xf0] }
 0x174   :  { %v4525_v31 = vor.u32 %v6059_v21, %v4524_v20  ;;  %v4380_v32 = vld [vmem:[#allocation11 + $0xa8] sm:$0xf]  ;;  %v6087_v52 = vld [vmem:[#allocation11 + $0x2b4] sm:$0xf0]  ;;  %v4589_v20 = vor.u32 %v6075_v11, %v4588_v10  ;;  %v6085_v10 = vld [vmem:[#allocation11 + $0x2ac] sm:$0xf] }
 0x175   :  { %v517_v1 = vadd.f32 %v509_v30, %v504_v59  ;;  %v518_v42 = vadd.f32 %v510_v35, %v505_v40  ;;  %v519_v43 = vadd.f32 %v511_v51, %v506_v41  ;;  %v520_v44 = vadd.f32 %v512_v36, %v507_v62  ;;  %v6123_v30 = vld [vmem:[#allocation11 + $0x3d4] sm:$0xf0]  ;;  %v4508_v35 = vld [vmem:[#allocation11 + $0x1a8] sm:$0xf]  ;;  %v4638_v11 = vld [vmem:[#allocation11 + $0x2b8] sm:$0xf0] }
 0x176   :  { %v6055_v51 = vld [vmem:[#allocation11 + $0x1b4] sm:$0xf0]  ;;  %v4781_v36 = vor.u32 %v6123_v30, %v4780_v29  ;;  %v4636_v37 = vld [vmem:[#allocation11 + $0x2a8] sm:$0xf]  ;;  %v4381_v38 = vor.u32 %v6023_v33, %v4380_v32 }
 0x177   :  { %v525_v45 = vmin.f32 %v517_v1, 0.0  ;;  %v526_v46 = vmin.f32 %v518_v42, 0.0  ;;  %v527_v47 = vmin.f32 %v519_v43, 0.0  ;;  %v528_v48 = vmin.f32 %v520_v44, 0.0  ;;  %v4764_v39 = vld [vmem:[#allocation11 + $0x3a8] sm:$0xf] }
 0x178   :  { %vm521_vm3 = vcmp.gt.f32.partialorder %v517_v1, 0.0  ;;  %vm522_vm4 = vcmp.gt.f32.partialorder %v518_v42, 0.0  ;;  %vm523_vm5 = vcmp.gt.f32.partialorder %v519_v43, 0.0  ;;  %vm524_vm6 = vcmp.gt.f32.partialorder %v520_v44, 0.0  ;;  %v6119_v59 = vld [vmem:[#allocation11 + $0x3b4] sm:$0xf0] }
 0x179   :  { %v529_v49 = vmul.f32 1.442695, %v525_v45  ;;  %v531_v50 = vmul.f32 1.442695, %v526_v46  ;;  %v533_v53 = vmul.f32 1.442695, %v527_v47  ;;  %v4509_v40 = vor.u32 %v6055_v51, %v4508_v35 }
 0x17a   :  { %v535_v54 = vmul.f32 1.442695, %v528_v48  ;;  %v4364_v41 = vld [vmem:[#allocation11 + $0x88] sm:$0xf]  ;;  %v6019_v62 = vld [vmem:[#allocation11 + $0x94] sm:$0xf0] }
 0x17b   :  { %6435 = vpow2.f32 %v529_v49  ;;  %v4620_v45 = vld [vmem:[#allocation11 + $0x288] sm:$0xf]  ;;  %v6083_v46 = vld [vmem:[#allocation11 + $0x294] sm:$0xf0]  ;;  %v4365_v47 = vor.u32 %v6019_v62, %v4364_v41  ;;  %v4542_v41 = vld [vmem:[#allocation11 + $0x1f8] sm:$0xf0] }
 0x17c   :  { %6437 = vpow2.f32 %v531_v50  ;;  %v4748_v48 = vld [vmem:[#allocation11 + $0x388] sm:$0xf]  ;;  %v6115_v49 = vld [vmem:[#allocation11 + $0x394] sm:$0xf0]  ;;  %v4621_v55 = vor.u32 %v6083_v46, %v4620_v45  ;;  %v6125_v46 = vld [vmem:[#allocation11 + $0x3ec] sm:$0xf] }
 0x17d   :  { %6439 = vpow2.f32 %v533_v53  ;;  %v4348_v53 = vld [vmem:[#allocation11 + $0x68] sm:$0xf]  ;;  %v4749_v58 = vor.u32 %v6115_v49, %v4748_v48  ;;  %v6071_v26 = vld [vmem:[#allocation11 + $0x234] sm:$0xf0] }
 0x17e   :  { %6441 = vpow2.f32 %v535_v54  ;;  %v6015_v54 = vld [vmem:[#allocation11 + $0x74] sm:$0xf0]  ;;  %v4444_v21 = vld [vmem:[#allocation11 + $0x128] sm:$0xf] }
 0x17f   :  { %v4572_v25 = vld [vmem:[#allocation11 + $0x228] sm:$0xf]  ;;  %v6103_v30 = vld [vmem:[#allocation11 + $0x334] sm:$0xf0] }
 0x180   :  { %v6003_v32 = vld [vmem:[#allocation11 + $0x14] sm:$0xf0]  ;;  %v4556_v51 = vld [vmem:[#allocation11 + $0x208] sm:$0xf] }
 0x181   :  { %v6436_v57 = vpop.eup %6435  ;;  %v6035_v35 = vld [vmem:[#allocation11 + $0x114] sm:$0xf0] }
 0x182   :  { %v6438_v61 = vpop.eup %6437  ;;  %v4286_v63 = vadd.f32 -1.0, %v6436_v57  ;;  %v6047_v57 = vld [vmem:[#allocation11 + $0x174] sm:$0xf0] }
 0x183   :  { %v6440_v0 = vpop.eup %6439  ;;  %v4287_v2 = vadd.f32 -1.0, %v6438_v61  ;;  %v6079_v61 = vld [vmem:[#allocation11 + $0x274] sm:$0xf0] }
 0x184   :  { %v6442_v6 = vpop.eup %6441  ;;  %v541_v7 = vsel %vm521_vm3, %v517_v1, %v4286_v63  ;;  %v4288_v8 = vadd.f32 -1.0, %v6440_v0  ;;  %v4637_v1 = vor.u32 %v6087_v52, %v4636_v37  ;;  %v4349_v63 = vor.u32 %v6015_v54, %v4348_v53  ;;  %v4732_v0 = vld [vmem:[#allocation11 + $0x368] sm:$0xf]  ;;  %v6067_v37 = vld [vmem:[#allocation11 + $0x214] sm:$0xf0] }
 0x185   :  { %v6932_v12 = vpack.c.bf16 %v541_v7, %v541_v7  ;;  %v542_v13 = vsel %vm522_vm4, %v518_v42, %v4287_v2  ;;  %v4289_v14 = vadd.f32 -1.0, %v6442_v6  ;;  %v4492_v42 = vld [vmem:[#allocation11 + $0x188] sm:$0xf]  ;;  %v6111_v2 = vld [vmem:[#allocation11 + $0x374] sm:$0xf0]  ;;  %v4605_v6 = vor.u32 %v6079_v61, %v4604_v60 }
 0x186   :  { %v6934_v17 = vpack.c.bf16 %v542_v13, %v542_v13  ;;  %v543_v18 = vsel %vm523_vm5, %v519_v43, %v4288_v8  ;;  %v6051_v43 = vld [vmem:[#allocation11 + $0x194] sm:$0xf0]  ;;  %v4460_v7 = vld [vmem:[#allocation11 + $0x148] sm:$0xf]  ;;  %v4333_v13 = vor.u32 %v6011_v5, %v4332_v4  ;;  %v6029_v52 = vld [vmem:[#allocation11 + $0xec] sm:$0xf]  ;;  %v4557_v48 = vor.u32 %v6067_v37, %v4556_v51 }
 0x187   :  { %1335 = vmatmul.bf16.vlgmr.msrb.gmra.mxu0 %v6932_v12  ;;  %v6937_v22 = vpack.c.bf16 %v543_v18, %v543_v18  ;;  %v544_v23 = vsel %vm524_vm6, %v520_v44, %v4289_v14  ;;  %v4765_v44 = vor.u32 %v6119_v59, %v4764_v39  ;;  %v4493_v50 = vor.u32 %v6051_v43, %v4492_v42  ;;  %v6043_v8 = vld [vmem:[#allocation11 + $0x154] sm:$0xf0]  ;;  %v4716_v14 = vld [vmem:[#allocation11 + $0x348] sm:$0xf]  ;;  %v6093_v42 = vld [vmem:[#allocation11 + $0x2ec] sm:$0xf] }
 0x188   :  { %1348 = vmatmul.bf16.vlgmr.msrb.gmra.mxu1 %v6934_v17  ;;  %v6940_v27 = vpack.c.bf16 %v544_v23, %v544_v23  ;;  %1431 = vmatpush.bf16.msrb.mxu0 %v4413_v3  ;;  %v4477_v3 = vor.u32 %v6047_v57, %v4476_v56  ;;  %v4461_v16 = vor.u32 %v6043_v8, %v4460_v7  ;;  %v4316_v18 = vld [vmem:[#allocation11 + $0x28] sm:$0xf]  ;;  %v6039_v23 = vld [vmem:[#allocation11 + $0x134] sm:$0xf0]  ;;  %v4670_v43 = vld [vmem:[#allocation11 + $0x2f8] sm:$0xf0] }
 0x189   :  { %1361 = vmatmul.bf16.vlgmr.msrb.gmra.mxu2 %v6937_v22  ;;  %1444 = vmatpush.bf16.msrb.mxu1 %v4541_v9  ;;  %v4733_v9 = vor.u32 %v6111_v2, %v4732_v0  ;;  %v4445_v33 = vor.u32 %v6039_v23, %v4444_v21  ;;  %v4684_v59 = vld [vmem:[#allocation11 + $0x308] sm:$0xf]  ;;  %v4673_v53 = vor.u32 %v6093_v42, %v4670_v43  ;;  %v6025_v54 = vld [vmem:[#allocation11 + $0xcc] sm:$0xf]  ;;  %v4654_v61 = vld [vmem:[#allocation11 + $0x2d8] sm:$0xf0] }
 0x18a   :  { %1374 = vmatmul.bf16.vlgmr.msrb.gmra.mxu3 %v6940_v27  ;;  %1457 = vmatpush.bf16.msrb.mxu2 %v4669_v19  ;;  %v6007_v19 = vld [vmem:[#allocation11 + $0x34] sm:$0xf0]  ;;  %v6057_v56 = vld [vmem:[#allocation11 + $0x1cc] sm:$0xf]  ;;  %v4782_v0 = vld [vmem:[#allocation11 + $0x3d8] sm:$0xf0] }
 0x18b   :  { %1470 = vmatpush.bf16.msrb.mxu3 %v4797_v24  ;;  %v4717_v24 = vor.u32 %v6107_v15, %v4716_v14  ;;  %v4317_v29 = vor.u32 %v6007_v19, %v4316_v18  ;;  %v6089_v60 = vld [vmem:[#allocation11 + $0x2cc] sm:$0xf]  ;;  %v4766_v14 = vld [vmem:[#allocation11 + $0x3b8] sm:$0xf0]  ;;  %v4641_v18 = vor.u32 %v6085_v10, %v4638_v11 }
 0x18c   :  { %1432 = vmatpush.bf16.msrb.mxu0 %v4397_v28  ;;  %v4700_v28 = vld [vmem:[#allocation11 + $0x328] sm:$0xf]  ;;  %v4657_v4 = vor.u32 %v6089_v60, %v4654_v61  ;;  %v6021_v5 = vld [vmem:[#allocation11 + $0xac] sm:$0xf]  ;;  %v4574_v61 = vld [vmem:[#allocation11 + $0x238] sm:$0xf0] }
 0x18d   :  { %1445 = vmatpush.bf16.msrb.mxu1 %v4525_v31  ;;  %v4300_v31 = vld [vmem:[#allocation11 + $0x8] sm:$0xf]  ;;  %v4701_v39 = vor.u32 %v6103_v30, %v4700_v28  ;;  %v6053_v7 = vld [vmem:[#allocation11 + $0x1ac] sm:$0xf]  ;;  %v4558_v11 = vld [vmem:[#allocation11 + $0x218] sm:$0xf0] }
 0x18e   :  { %1458 = vmatpush.bf16.msrb.mxu2 %v4653_v34  ;;  %v4428_v34 = vld [vmem:[#allocation11 + $0x108] sm:$0xf]  ;;  %v4301_v62 = vor.u32 %v6003_v32, %v4300_v31  ;;  %v6017_v19 = vld [vmem:[#allocation11 + $0x8c] sm:$0xf] }
 0x18f   :  { %1471 = vmatpush.bf16.msrb.mxu3 %v4781_v36  ;;  %v4573_v36 = vor.u32 %v6071_v26, %v4572_v25  ;;  %v6049_v21 = vld [vmem:[#allocation11 + $0x18c] sm:$0xf]  ;;  %v4622_v26 = vld [vmem:[#allocation11 + $0x298] sm:$0xf0] }
 0x190   :  { %1433 = vmatpush.bf16.msrb.mxu0 %v4381_v38  ;;  %v4414_v38 = vld [vmem:[#allocation11 + $0xf8] sm:$0xf0]  ;;  %v6081_v25 = vld [vmem:[#allocation11 + $0x28c] sm:$0xf] }
 0x191   :  { %1446 = vmatpush.bf16.msrb.mxu1 %v4509_v40  ;;  %v6061_v40 = vld [vmem:[#allocation11 + $0x1ec] sm:$0xf]  ;;  %v4417_v45 = vor.u32 %v6029_v52, %v4414_v38  ;;  %v4625_v32 = vor.u32 %v6081_v25, %v4622_v26  ;;  %v4606_v52 = vld [vmem:[#allocation11 + $0x278] sm:$0xf0] }
 0x192   :  { %1459 = vmatpush.bf16.msrb.mxu2 %v4637_v1  ;;  %v6099_v1 = vld [vmem:[#allocation11 + $0x314] sm:$0xf0]  ;;  %v4545_v49 = vor.u32 %v6061_v40, %v4542_v41  ;;  %v6113_v28 = vld [vmem:[#allocation11 + $0x38c] sm:$0xf] }
 0x193   :  { %1472 = vmatpush.bf16.msrb.mxu3 %v4765_v44  ;;  %v4429_v44 = vor.u32 %v6035_v35, %v4428_v34  ;;  %v4350_v34 = vld [vmem:[#allocation11 + $0x78] sm:$0xf0]  ;;  %v6045_v35 = vld [vmem:[#allocation11 + $0x16c] sm:$0xf] }
 0x194   :  { %1434 = vmatpush.bf16.msrb.mxu0 %v4365_v47  ;;  %v4798_v47 = vld [vmem:[#allocation11 + $0x3f8] sm:$0xf0]  ;;  %v6077_v37 = vld [vmem:[#allocation11 + $0x26c] sm:$0xf] }
 0x195   :  { %1447 = vmatpush.bf16.msrb.mxu1 %v4493_v50  ;;  %v4685_v50 = vor.u32 %v6099_v1, %v4684_v59  ;;  %v4801_v57 = vor.u32 %v6125_v46, %v4798_v47  ;;  %v6109_v38 = vld [vmem:[#allocation11 + $0x36c] sm:$0xf]  ;;  %v4609_v41 = vor.u32 %v6077_v37, %v4606_v52  ;;  %v4334_v1 = vld [vmem:[#allocation11 + $0x58] sm:$0xf0] }
 0x196   :  { %1460 = vmatpush.bf16.msrb.mxu2 %v4621_v55  ;;  %v4398_v55 = vld [vmem:[#allocation11 + $0xd8] sm:$0xf0]  ;;  %v6041_v42 = vld [vmem:[#allocation11 + $0x14c] sm:$0xf] }
 0x197   :  { %1473 = vmatpush.bf16.msrb.mxu3 %v4749_v58  ;;  %1387 = vmatmul.bf16.vlgmr.msra.gmra.mxu0 %v6932_v12  ;;  %v4526_v58 = vld [vmem:[#allocation11 + $0x1d8] sm:$0xf0]  ;;  %v4401_v2 = vor.u32 %v6025_v54, %v4398_v55  ;;  %v6105_v47 = vld [vmem:[#allocation11 + $0x34c] sm:$0xf] }
 0x198   :  { %1400 = vmatmul.bf16.vlgmr.msra.gmra.mxu1 %v6934_v17  ;;  %1435 = vmatpush.bf16.msrb.mxu0 %v4349_v63  ;;  %v6121_v63 = vld [vmem:[#allocation11 + $0x3cc] sm:$0xf]  ;;  %v4590_v46 = vld [vmem:[#allocation11 + $0x258] sm:$0xf0] }
 0x199   :  { %1413 = vmatmul.bf16.vlgmr.msra.gmra.mxu2 %v6937_v22  ;;  %1448 = vmatpush.bf16.msrb.mxu1 %v4477_v3  ;;  %v4529_v3 = vor.u32 %v6057_v56, %v4526_v58  ;;  %v4785_v8 = vor.u32 %v6121_v63, %v4782_v0  ;;  %v6005_v54 = vld [vmem:[#allocation11 + $0x2c] sm:$0xf]  ;;  %v4318_v55 = vld [vmem:[#allocation11 + $0x38] sm:$0xf0] }
 0x19a   :  { %1426 = vmatmul.bf16.vlgmr.msra.gmra.mxu3 %v6940_v27  ;;  %1461 = vmatpush.bf16.msrb.mxu2 %v4605_v6  ;;  %v4382_v6 = vld [vmem:[#allocation11 + $0xb8] sm:$0xf0]  ;;  %v6037_v56 = vld [vmem:[#allocation11 + $0x12c] sm:$0xf] }
 0x19b   :  { %1474 = vmatpush.bf16.msrb.mxu3 %v4733_v9  ;;  %v4510_v9 = vld [vmem:[#allocation11 + $0x1b8] sm:$0xf0]  ;;  %v4385_v15 = vor.u32 %v6021_v5, %v4382_v6  ;;  %v6069_v60 = vld [vmem:[#allocation11 + $0x22c] sm:$0xf] }
 0x19c   :  { %1436 = vmatpush.bf16.msrb.mxu0 %v4333_v13  ;;  %v6117_v13 = vld [vmem:[#allocation11 + $0x3ac] sm:$0xf]  ;;  %v4446_v58 = vld [vmem:[#allocation11 + $0x138] sm:$0xf0] }
 0x19d   :  { %1449 = vmatpush.bf16.msrb.mxu1 %v4461_v16  ;;  %v4513_v16 = vor.u32 %v6053_v7, %v4510_v9  ;;  %v4769_v23 = vor.u32 %v6117_v13, %v4766_v14  ;;  %v6101_v63 = vld [vmem:[#allocation11 + $0x32c] sm:$0xf]  ;;  %v4702_v0 = vld [vmem:[#allocation11 + $0x338] sm:$0xf0] }
 0x19e   :  { %1462 = vmatpush.bf16.msrb.mxu2 %v4589_v20  ;;  %v4366_v20 = vld [vmem:[#allocation11 + $0x98] sm:$0xf0]  ;;  %v6001_v5 = vld [vmem:[#allocation11 + $0xc] sm:$0xf] }
 0x19f   :  { %1475 = vmatpush.bf16.msrb.mxu3 %v4717_v24  ;;  %v4494_v24 = vld [vmem:[#allocation11 + $0x198] sm:$0xf0]  ;;  %v4369_v30 = vor.u32 %v6017_v19, %v4366_v20  ;;  %v6033_v7 = vld [vmem:[#allocation11 + $0x10c] sm:$0xf] }
 0x1a0   :  { %1437 = vmatpush.bf16.msrb.mxu0 %v4317_v29  ;;  %v4750_v29 = vld [vmem:[#allocation11 + $0x398] sm:$0xf0]  ;;  %v4497_v31 = vor.u32 %v6049_v21, %v4494_v24  ;;  %v6065_v10 = vld [vmem:[#allocation11 + $0x20c] sm:$0xf] }
 0x1a1   :  { %1450 = vmatpush.bf16.msrb.mxu1 %v4445_v33  ;;  %v6013_v33 = vld [vmem:[#allocation11 + $0x6c] sm:$0xf]  ;;  %v4753_v51 = vor.u32 %v6113_v28, %v4750_v29  ;;  %v4302_v6 = vld [vmem:[#allocation11 + $0x18] sm:$0xf0] }
 0x1a2   :  { %1463 = vmatpush.bf16.msrb.mxu2 %v4573_v36  ;;  %v4478_v36 = vld [vmem:[#allocation11 + $0x178] sm:$0xf0]  ;;  %v4353_v59 = vor.u32 %v6013_v33, %v4350_v34  ;;  %v6097_v13 = vld [vmem:[#allocation11 + $0x30c] sm:$0xf] }
 0x1a3   :  { %1476 = vmatpush.bf16.msrb.mxu3 %v4701_v39  ;;  %v4734_v39 = vld [vmem:[#allocation11 + $0x378] sm:$0xf0]  ;;  %v4481_v40 = vor.u32 %v6045_v35, %v4478_v36 }
 0x1a4   :  { %1438 = vmatpush.bf16.msrb.mxu0 %v4301_v62  ;;  %v6009_v62 = vld [vmem:[#allocation11 + $0x4c] sm:$0xf]  ;;  %v4737_v43 = vor.u32 %v6109_v38, %v4734_v39  ;;  %v4430_v9 = vld [vmem:[#allocation11 + $0x118] sm:$0xf0] }
 0x1a5   :  { %1451 = vmatpush.bf16.msrb.mxu1 %v4429_v44  ;;  %v4462_v44 = vld [vmem:[#allocation11 + $0x158] sm:$0xf0] }
 0x1a6   :  { %1464 = vmatpush.bf16.msrb.mxu2 %v4557_v48  ;;  %v4718_v48 = vld [vmem:[#allocation11 + $0x358] sm:$0xf0] }
 0x1a7   :  { %1477 = vmatpush.bf16.msrb.mxu3 %v4685_v50  ;;  %1439 = vmatmul.bf16.vlgmr.msrb.gmra.mxu0 %v6932_v12  ;;  %v4465_v50 = vor.u32 %v6041_v42, %v4462_v44  ;;  %v4686_v14 = vld [vmem:[#allocation11 + $0x318] sm:$0xf0]  ;;  %v5176_v44 = vld [vmem:[#allocation11 + $0x6e0] sm:$0xf] }
 0x1a8   :  { %1483 = vmatpush.bf16.msra.mxu0 %v4417_v45  ;;  %1452 = vmatmul.bf16.vlgmr.msrb.gmra.mxu1 %v6934_v17  ;;  %v6073_v45 = vld [vmem:[#allocation11 + $0x24c] sm:$0xf]  ;;  %v4689_v19 = vor.u32 %v6097_v13, %v4686_v14 }
 0x1a9   :  { %1496 = vmatpush.bf16.msra.mxu1 %v4545_v49  ;;  %1465 = vmatmul.bf16.vlgmr.msrb.gmra.mxu2 %v6937_v22  ;;  %v4337_v49 = vor.u32 %v6009_v62, %v4334_v1  ;;  %v6158_v62 = vld [vmem:[#allocation11 + $0x4ec] sm:$0xf0]  ;;  %v5048_v1 = vld [vmem:[#allocation11 + $0x5e0] sm:$0xf] }
 0x1aa   :  { %1509 = vmatpush.bf16.msra.mxu2 %v4673_v53  ;;  %1478 = vmatmul.bf16.vlgmr.msrb.gmra.mxu3 %v6940_v27  ;;  %v4593_v53 = vor.u32 %v6073_v45, %v4590_v46  ;;  %v6222_v45 = vld [vmem:[#allocation11 + $0x6ec] sm:$0xf0] }
 0x1ab   :  { %1522 = vmatpush.bf16.msra.mxu3 %v4801_v57  ;;  %v4721_v57 = vor.u32 %v6105_v47, %v4718_v48 }
 0x1ac   :  { %1484 = vmatpush.bf16.msra.mxu0 %v4401_v2  ;;  %v4321_v2 = vor.u32 %v6005_v54, %v4318_v55 }
 0x1ad   :  { %1497 = vmatpush.bf16.msra.mxu1 %v4529_v3  ;;  %v4449_v3 = vor.u32 %v6037_v56, %v4446_v58 }
 0x1ae   :  { %1510 = vmatpush.bf16.msra.mxu2 %v4657_v4  ;;  %v4577_v4 = vor.u32 %v6069_v60, %v4574_v61 }
 0x1af   :  { %1523 = vmatpush.bf16.msra.mxu3 %v4785_v8  ;;  %v4705_v8 = vor.u32 %v6101_v63, %v4702_v0 }
 0x1b0   :  { %1485 = vmatpush.bf16.msra.mxu0 %v4385_v15  ;;  %v4305_v15 = vor.u32 %v6001_v5, %v4302_v6 }
 0x1b1   :  { %1498 = vmatpush.bf16.msra.mxu1 %v4513_v16  ;;  %v4433_v16 = vor.u32 %v6033_v7, %v4430_v9 }
 0x1b2   :  { %1511 = vmatpush.bf16.msra.mxu2 %v4641_v18  ;;  %v4561_v18 = vor.u32 %v6065_v10, %v4558_v11 }
 0x1b3   :  { %1524 = vmatpush.bf16.msra.mxu3 %v4769_v23 }
 0x1b4   :  { %1486 = vmatpush.bf16.msra.mxu0 %v4369_v30 }
 0x1b5   :  { %1499 = vmatpush.bf16.msra.mxu1 %v4497_v31 }
 0x1b6   :  { %1512 = vmatpush.bf16.msra.mxu2 %v4625_v32 }
 0x1b7   :  { %1525 = vmatpush.bf16.msra.mxu3 %v4753_v51 }
 0x1b8   :  { %1487 = vmatpush.bf16.msra.mxu0 %v4353_v59  ;;  %v677_v59 = vld [vmem:[#allocation13] sm:$0xf] }
 0x1b9   :  { %1500 = vmatpush.bf16.msra.mxu1 %v4481_v40  ;;  %v680_v40 = vperm.slane %v677_v59, 1  ;;  %v679_v46 = vperm.slane %v677_v59, 0  ;;  %v681_v47 = vperm.slane %v677_v59, 2  ;;  %v682_v60 = vperm.slane %v677_v59, 3  ;;  %v6150_v59 = vld [vmem:[#allocation11 + $0x4ac] sm:$0xf0] }
 0x1ba   :  { %1513 = vmatpush.bf16.msra.mxu2 %v4609_v41  ;;  %v4920_v41 = vld [vmem:[#allocation11 + $0x4e0] sm:$0xf] }
 0x1bb   :  { %1526 = vmatpush.bf16.msra.mxu3 %v4737_v43  ;;  %v4921_v42 = vor.u32 %v6158_v62, %v4920_v41  ;;  %v6190_v43 = vld [vmem:[#allocation11 + $0x5ec] sm:$0xf0] }
 0x1bc   :  { %1488 = vmatpush.bf16.msra.mxu0 %v4337_v49  ;;  %v5049_v48 = vor.u32 %v6190_v43, %v5048_v1  ;;  %v5177_v49 = vor.u32 %v6222_v45, %v5176_v44  ;;  %v6182_v62 = vld [vmem:[#allocation11 + $0x5ac] sm:$0xf0]  ;;  %v5144_v1 = vld [vmem:[#allocation11 + $0x6a0] sm:$0xf] }
 0x1bd   :  { %1501 = vmatpush.bf16.msra.mxu1 %v4465_v50  ;;  %v5304_v50 = vld [vmem:[#allocation11 + $0x7e0] sm:$0xf] }
 0x1be   :  { %1514 = vmatpush.bf16.msra.mxu2 %v4593_v53  ;;  %v6254_v53 = vld [vmem:[#allocation11 + $0x7ec] sm:$0xf0]  ;;  %v5272_v45 = vld [vmem:[#allocation11 + $0x7a0] sm:$0xf] }
 0x1bf   :  { %1527 = vmatpush.bf16.msra.mxu3 %v4721_v57  ;;  %v5305_v54 = vor.u32 %v6254_v53, %v5304_v50  ;;  %v5000_v50 = vld [vmem:[#allocation11 + $0x580] sm:$0xf] }
 0x1c0   :  { %1489 = vmatpush.bf16.msra.mxu0 %v4321_v2 }
 0x1c1   :  { %1502 = vmatpush.bf16.msra.mxu1 %v4449_v3 }
 0x1c2   :  { %1515 = vmatpush.bf16.msra.mxu2 %v4577_v4 }
 0x1c3   :  { %1528 = vmatpush.bf16.msra.mxu3 %v4705_v8 }
 0x1c4   :  { %1490 = vmatpush.bf16.msra.mxu0 %v4305_v15 }
 0x1c5   :  { %1503 = vmatpush.bf16.msra.mxu1 %v4433_v16 }
 0x1c6   :  { %1516 = vmatpush.bf16.msra.mxu2 %v4561_v18 }
 0x1c7   :  { %1529 = vmatpush.bf16.msra.mxu3 %v4689_v19  ;;  %1491 = vmatmul.bf16.vlgmr.msra.gmra.mxu0 %v6932_v12 }
 0x1c8   :  { %1504 = vmatmul.bf16.vlgmr.msra.gmra.mxu1 %v6934_v17  ;;  %2408 = vmatpush.bf16.msrb.mxu0 %v4921_v42  ;;  %v6214_v42 = vld [vmem:[#allocation11 + $0x6ac] sm:$0xf0] }
 0x1c9   :  { %1517 = vmatmul.bf16.vlgmr.msra.gmra.mxu2 %v6937_v22  ;;  %2421 = vmatpush.bf16.msrb.mxu1 %v5049_v48  ;;  %v5145_v44 = vor.u32 %v6214_v42, %v5144_v1  ;;  %v4872_v48 = vld [vmem:[#allocation11 + $0x480] sm:$0xf]  ;;  %v6194_v42 = vld [vmem:[#allocation11 + $0x60c] sm:$0xf0] }
 0x1ca   :  { %1530 = vmatmul.bf16.vlgmr.msra.gmra.mxu3 %v6940_v27  ;;  %2434 = vmatpush.bf16.msrb.mxu2 %v5177_v49  ;;  %v6146_v49 = vld [vmem:[#allocation11 + $0x48c] sm:$0xf0]  ;;  %v5064_v1 = vld [vmem:[#allocation11 + $0x600] sm:$0xf] }
 0x1cb   :  { %2447 = vmatpush.bf16.msrb.mxu3 %v5305_v54  ;;  %v4873_v53 = vor.u32 %v6146_v49, %v4872_v48  ;;  %v6178_v54 = vld [vmem:[#allocation11 + $0x58c] sm:$0xf0]  ;;  %v4922_v49 = vld [vmem:[#allocation11 + $0x4f0] sm:$0xf0] }
 0x204   :  { %v1336_v20 = vpop.f32.mrf.mxu0 }
 0x205   :  { %v1349_v21 = vpop.f32.mrf.mxu1  ;;  %v1337_v56 = vadd.f32 %v1336_v20, %v679_v46  ;;  %v6246_v46 = vld [vmem:[#allocation11 + $0x7ac] sm:$0xf0] }
 0x207   :  { %v1350_v61 = vadd.f32 %v1349_v21, %v1337_v56  ;;  %v6210_v56 = vld [vmem:[#allocation11 + $0x68c] sm:$0xf0] }
 0x20c   :  { %v1362_v23 = vpop.f32.mrf.mxu2  ;;  %v1338_v24 = vpop.f32.mrf.mxu0 }
 0x20d   :  { %v1375_v25 = vpop.f32.mrf.mxu3  ;;  %v1351_v26 = vpop.f32.mrf.mxu1  ;;  %v1363_v4 = vadd.f32 %v1362_v23, %v1350_v61  ;;  %v6242_v61 = vld [vmem:[#allocation11 + $0x78c] sm:$0xf0] }
 0x20f   :  { %v6958_v8 = vadd.f32 %v1375_v25, %v1363_v4 }
 0x211   :  { %v1542_v24 = vmul.f32 %v6958_v8, %v6958_v8 }
 0x214   :  { %v1364_v28 = vpop.f32.mrf.mxu2  ;;  %v1388_v29 = vpop.f32.mrf.mxu0 }
 0x215   :  { %v1377_v30 = vpop.f32.mrf.mxu3  ;;  %v1401_v31 = vpop.f32.mrf.mxu1  ;;  %v1389_v55 = vadd.f32 %v1388_v29, %v680_v40  ;;  %v5016_v40 = vld [vmem:[#allocation11 + $0x5a0] sm:$0xf] }
 0x216   :  { %v5017_v43 = vor.u32 %v6182_v62, %v5016_v40  ;;  %v4936_v40 = vld [vmem:[#allocation11 + $0x500] sm:$0xf]  ;;  %v6162_v62 = vld [vmem:[#allocation11 + $0x50c] sm:$0xf0] }
 0x217   :  { %v1402_v58 = vadd.f32 %v1401_v31, %v1389_v55  ;;  %v5128_v55 = vld [vmem:[#allocation11 + $0x680] sm:$0xf] }
 0x21c   :  { %v1414_v32 = vpop.f32.mrf.mxu2  ;;  %v1390_v33 = vpop.f32.mrf.mxu0 }
 0x21d   :  { %v1427_v34 = vpop.f32.mrf.mxu3  ;;  %v1403_v12 = vpop.f32.mrf.mxu1  ;;  %v1415_v63 = vadd.f32 %v1414_v32, %v1402_v58  ;;  %v4904_v33 = vld [vmem:[#allocation11 + $0x4c0] sm:$0xf]  ;;  %v5129_v58 = vor.u32 %v6210_v56, %v5128_v55  ;;  %v6220_v56 = vld [vmem:[#allocation11 + $0x6e4] sm:$0xf] }
 0x21e   :  { %v5032_v12 = vld [vmem:[#allocation11 + $0x5c0] sm:$0xf] }
 0x21f   :  { %v6956_v7 = vadd.f32 %v1427_v34, %v1415_v63  ;;  %v6154_v34 = vld [vmem:[#allocation11 + $0x4cc] sm:$0xf0] }
 0x221   :  { %v1537_v16 = vadd.f32 %v6956_v7, %v6958_v8  ;;  %v1543_v21 = vmul.f32 %v6956_v7, %v6956_v7 }
 0x223   :  { %v1546_v30 = vadd.f32 %v1543_v21, %v1542_v24  ;;  %v4968_v21 = vld [vmem:[#allocation11 + $0x540] sm:$0xf]  ;;  %v6170_v24 = vld [vmem:[#allocation11 + $0x54c] sm:$0xf0] }
 0x224   :  { %v1416_v35 = vpop.f32.mrf.mxu2  ;;  %v1440_v51 = vpop.f32.mrf.mxu0 }
 0x225   :  { %v1429_v17 = vpop.f32.mrf.mxu3  ;;  %v1453_v22 = vpop.f32.mrf.mxu1  ;;  %v1441_v57 = vadd.f32 %v1440_v51, %v681_v47  ;;  %v4905_v35 = vor.u32 %v6154_v34, %v4904_v33  ;;  %v5160_v51 = vld [vmem:[#allocation11 + $0x6c0] sm:$0xf]  ;;  %v5273_v47 = vor.u32 %v6246_v46, %v5272_v45  ;;  %v6134_v34 = vld [vmem:[#allocation11 + $0x42c] sm:$0xf0] }
 0x226   :  { %v6186_v17 = vld [vmem:[#allocation11 + $0x5cc] sm:$0xf0]  ;;  %v4824_v33 = vld [vmem:[#allocation11 + $0x420] sm:$0xf] }
 0x227   :  { %v1454_v0 = vadd.f32 %v1453_v22, %v1441_v57  ;;  %v6218_v22 = vld [vmem:[#allocation11 + $0x6cc] sm:$0xf0]  ;;  %2409 = vmatpush.bf16.msrb.mxu0 %v4905_v35  ;;  %v5001_v57 = vor.u32 %v6178_v54, %v5000_v50  ;;  %v4825_v35 = vor.u32 %v6134_v34, %v4824_v33  ;;  %v5192_v45 = vld [vmem:[#allocation11 + $0x700] sm:$0xf]  ;;  %v6188_v50 = vld [vmem:[#allocation11 + $0x5e4] sm:$0xf] }
 0x228   :  { %v6226_v46 = vld [vmem:[#allocation11 + $0x70c] sm:$0xf0]  ;;  %v6144_v33 = vld [vmem:[#allocation11 + $0x484] sm:$0xf]  ;;  %v4874_v34 = vld [vmem:[#allocation11 + $0x490] sm:$0xf0] }
 0x229   :  { %v5193_v48 = vor.u32 %v6226_v46, %v5192_v45  ;;  %v6236_v45 = vld [vmem:[#allocation11 + $0x764] sm:$0xf]  ;;  %v5242_v46 = vld [vmem:[#allocation11 + $0x770] sm:$0xf0] }
 0x22c   :  { %v1466_v36 = vpop.f32.mrf.mxu2  ;;  %v1442_v37 = vpop.f32.mrf.mxu0 }
 0x22d   :  { %v1479_v27 = vpop.f32.mrf.mxu3  ;;  %v1455_v52 = vpop.f32.mrf.mxu1  ;;  %v1467_v5 = vadd.f32 %v1466_v36, %v1454_v0  ;;  %v5033_v36 = vor.u32 %v6186_v17, %v5032_v12  ;;  %v5288_v37 = vld [vmem:[#allocation11 + $0x7c0] sm:$0xf]  ;;  %v6166_v17 = vld [vmem:[#allocation11 + $0x52c] sm:$0xf0] }
 0x22e   :  { %v6250_v52 = vld [vmem:[#allocation11 + $0x7cc] sm:$0xf0]  ;;  %v4856_v0 = vld [vmem:[#allocation11 + $0x460] sm:$0xf] }
 0x22f   :  { %v6960_v9 = vadd.f32 %v1479_v27, %v1467_v5  ;;  %v5161_v27 = vor.u32 %v6218_v22, %v5160_v51  ;;  %2422 = vmatpush.bf16.msrb.mxu1 %v5033_v36  ;;  %v6174_v5 = vld [vmem:[#allocation11 + $0x56c] sm:$0xf0]  ;;  %v4952_v12 = vld [vmem:[#allocation11 + $0x520] sm:$0xf] }
 0x230   :  { %v5080_v51 = vld [vmem:[#allocation11 + $0x620] sm:$0xf]  ;;  %v6198_v22 = vld [vmem:[#allocation11 + $0x62c] sm:$0xf0]  ;;  %v4953_v36 = vor.u32 %v6166_v17, %v4952_v12  ;;  %v6176_v12 = vld [vmem:[#allocation11 + $0x584] sm:$0xf] }
 0x231   :  { %v1538_v20 = vadd.f32 %v1537_v16, %v6960_v9  ;;  %v1544_v25 = vmul.f32 %v6960_v9, %v6960_v9  ;;  %2435 = vmatpush.bf16.msrb.mxu2 %v5161_v27  ;;  %v5081_v27 = vor.u32 %v6198_v22, %v5080_v51  ;;  %v5002_v51 = vld [vmem:[#allocation11 + $0x590] sm:$0xf0]  ;;  %v6208_v22 = vld [vmem:[#allocation11 + $0x684] sm:$0xf] }
 0x233   :  { %v1547_v31 = vadd.f32 %v1546_v30, %v1544_v25  ;;  %2423 = vmatpush.bf16.msrb.mxu1 %v5017_v43  ;;  %v5096_v25 = vld [vmem:[#allocation11 + $0x640] sm:$0xf]  ;;  %v4937_v43 = vor.u32 %v6162_v62, %v4936_v40  ;;  %v4858_v40 = vld [vmem:[#allocation11 + $0x470] sm:$0xf0] }
 0x234   :  { %v1468_v38 = vpop.f32.mrf.mxu2  ;;  %v5224_v30 = vld [vmem:[#allocation11 + $0x740] sm:$0xf]  ;;  %v4986_v62 = vld [vmem:[#allocation11 + $0x570] sm:$0xf0] }
 0x235   :  { %v1481_v39 = vpop.f32.mrf.mxu3  ;;  %v5289_v38 = vor.u32 %v6250_v52, %v5288_v37  ;;  %2436 = vmatpush.bf16.msrb.mxu2 %v5145_v44  ;;  %v5208_v37 = vld [vmem:[#allocation11 + $0x720] sm:$0xf]  ;;  %v6230_v52 = vld [vmem:[#allocation11 + $0x72c] sm:$0xf0]  ;;  %v5065_v44 = vor.u32 %v6194_v42, %v5064_v1  ;;  %v6204_v42 = vld [vmem:[#allocation11 + $0x664] sm:$0xf] }
 0x236   :  { %v4888_v39 = vld [vmem:[#allocation11 + $0x4a0] sm:$0xf] }
 0x237   :  { %2448 = vmatpush.bf16.msrb.mxu3 %v5289_v38  ;;  %v4889_v41 = vor.u32 %v6150_v59, %v4888_v39  ;;  %2424 = vmatpush.bf16.msrb.mxu1 %v5001_v57  ;;  %v5209_v38 = vor.u32 %v6230_v52, %v5208_v37  ;;  %v4808_v39 = vld [vmem:[#allocation11 + $0x400] sm:$0xf]  ;;  %v6130_v59 = vld [vmem:[#allocation11 + $0x40c] sm:$0xf0]  ;;  %v5178_v57 = vld [vmem:[#allocation11 + $0x6f0] sm:$0xf0]  ;;  %v5005_v37 = vor.u32 %v6176_v12, %v5002_v51 }
 0x238   :  { %v6240_v52 = vld [vmem:[#allocation11 + $0x784] sm:$0xf] }
 0x239   :  { %2410 = vmatpush.bf16.msrb.mxu0 %v4889_v41  ;;  %2437 = vmatpush.bf16.msrb.mxu2 %v5129_v58  ;;  %v4809_v41 = vor.u32 %v6130_v59, %v4808_v39  ;;  %v6252_v58 = vld [vmem:[#allocation11 + $0x7e4] sm:$0xf] }
 0x23a   :  { %v6140_v39 = vld [vmem:[#allocation11 + $0x464] sm:$0xf] }
 0x23b   :  { %2449 = vmatpush.bf16.msrb.mxu3 %v5273_v47  ;;  %v6156_v47 = vld [vmem:[#allocation11 + $0x4e4] sm:$0xf] }
 0x23c   :  { %v4925_v54 = vor.u32 %v6156_v47, %v4922_v49  ;;  %v4861_v49 = vor.u32 %v6140_v39, %v4858_v40  ;;  %v6224_v12 = vld [vmem:[#allocation11 + $0x704] sm:$0xf]  ;;  %v1535_v39 = vld [vmem:[#allocation14] sm:$0xf]  ;;  %v1536_v40 = vld [vmem:[#allocation16] sm:$0xf] }
 0x23d   :  { %2411 = vmatpush.bf16.msrb.mxu0 %v4873_v53  ;;  %v5050_v53 = vld [vmem:[#allocation11 + $0x5f0] sm:$0xf0] }
 0x23e   :  { %v5053_v55 = vor.u32 %v6188_v50, %v5050_v53  ;;  %v6136_v53 = vld [vmem:[#allocation11 + $0x444] sm:$0xf] }
 0x244   :  { %v1492_v2 = vpop.f32.mrf.mxu0 }
 0x245   :  { %v1505_v3 = vpop.f32.mrf.mxu1  ;;  %v1493_v6 = vadd.f32 %v1492_v2, %v682_v60  ;;  %v5256_v60 = vld [vmem:[#allocation11 + $0x780] sm:$0xf]  ;;  %v6142_v2 = vld [vmem:[#allocation11 + $0x46c] sm:$0xf0] }
 0x246   :  { %v5257_v63 = vor.u32 %v6242_v61, %v5256_v60  ;;  %v4857_v4 = vor.u32 %v6142_v2, %v4856_v0  ;;  %v5181_v60 = vor.u32 %v6220_v56, %v5178_v57  ;;  %v5306_v61 = vld [vmem:[#allocation11 + $0x7f0] sm:$0xf0]  ;;  %v6168_v56 = vld [vmem:[#allocation11 + $0x544] sm:$0xf] }
 0x247   :  { %v1506_v10 = vadd.f32 %v1505_v3, %v1493_v6  ;;  %v4984_v3 = vld [vmem:[#allocation11 + $0x560] sm:$0xf]  ;;  %v4906_v0 = vld [vmem:[#allocation11 + $0x4d0] sm:$0xf0]  ;;  %v5309_v2 = vor.u32 %v6252_v58, %v5306_v61  ;;  %v6200_v61 = vld [vmem:[#allocation11 + $0x644] sm:$0xf] }
 0x248   :  { %2450 = vmatpush.bf16.msrb.mxu3 %v5257_v63  ;;  %v5112_v6 = vld [vmem:[#allocation11 + $0x660] sm:$0xf]  ;;  %2412 = vmatpush.bf16.msrb.mxu0 %v4857_v4  ;;  %v6152_v63 = vld [vmem:[#allocation11 + $0x4c4] sm:$0xf]  ;;  %v4970_v57 = vld [vmem:[#allocation11 + $0x550] sm:$0xf0] }
 0x249   :  { %v6184_v4 = vld [vmem:[#allocation11 + $0x5c4] sm:$0xf] }
 0x24c   :  { %v1518_v11 = vpop.f32.mrf.mxu2  ;;  %v1494_v15 = vpop.f32.mrf.mxu0 }
 0x24d   :  { %v1519_v13 = vadd.f32 %v1518_v11, %v1506_v10  ;;  %v1531_v14 = vpop.f32.mrf.mxu3  ;;  %v1507_v18 = vpop.f32.mrf.mxu1  ;;  %v6206_v10 = vld [vmem:[#allocation11 + $0x66c] sm:$0xf0]  ;;  %v4985_v11 = vor.u32 %v6174_v5, %v4984_v3  ;;  %v4909_v3 = vor.u32 %v6152_v63, %v4906_v0  ;;  %v5034_v5 = vld [vmem:[#allocation11 + $0x5d0] sm:$0xf0]  ;;  %v6232_v0 = vld [vmem:[#allocation11 + $0x744] sm:$0xf] }
 0x24e   :  { %v6238_v15 = vld [vmem:[#allocation11 + $0x76c] sm:$0xf0]  ;;  %v4840_v18 = vld [vmem:[#allocation11 + $0x440] sm:$0xf]  ;;  %v5098_v63 = vld [vmem:[#allocation11 + $0x650] sm:$0xf0] }
 0x24f   :  { %v6964_v19 = vadd.f32 %v1531_v14, %v1519_v13  ;;  %v5113_v13 = vor.u32 %v6206_v10, %v5112_v6  ;;  %v5240_v14 = vld [vmem:[#allocation11 + $0x760] sm:$0xf]  ;;  %2425 = vmatpush.bf16.msrb.mxu1 %v4985_v11  ;;  %v6216_v6 = vld [vmem:[#allocation11 + $0x6c4] sm:$0xf]  ;;  %v5037_v10 = vor.u32 %v6184_v4, %v5034_v5  ;;  %v5162_v11 = vld [vmem:[#allocation11 + $0x6d0] sm:$0xf0]  ;;  %v4973_v5 = vor.u32 %v6168_v56, %v4970_v57 }
 0x250   :  { %v5241_v16 = vor.u32 %v6238_v15, %v5240_v14  ;;  %v5290_v14 = vld [vmem:[#allocation11 + $0x7d0] sm:$0xf0]  ;;  %v5165_v15 = vor.u32 %v6216_v6, %v5162_v11  ;;  %v6132_v6 = vld [vmem:[#allocation11 + $0x424] sm:$0xf] }
 0x251   :  { %v1539_v23 = vadd.f32 %v1538_v20, %v6964_v19  ;;  %v1545_v29 = vmul.f32 %v6964_v19, %v6964_v19  ;;  %2438 = vmatpush.bf16.msrb.mxu2 %v5113_v13  ;;  %v6138_v20 = vld [vmem:[#allocation11 + $0x44c] sm:$0xf0]  ;;  %v6248_v13 = vld [vmem:[#allocation11 + $0x7c4] sm:$0xf]  ;;  %v4826_v11 = vld [vmem:[#allocation11 + $0x430] sm:$0xf0] }
 0x252   :  { %2451 = vmatpush.bf16.msrb.mxu3 %v5241_v16  ;;  %v5293_v16 = vor.u32 %v6248_v13, %v5290_v14  ;;  %v6164_v13 = vld [vmem:[#allocation11 + $0x524] sm:$0xf]  ;;  %v4954_v14 = vld [vmem:[#allocation11 + $0x530] sm:$0xf0] }
 0x253   :  { %1540 = vadd.xlane.f32.xlu1 %v1539_v23  ;;  %v1548_v32 = vadd.f32 %v1547_v31, %v1545_v29  ;;  %v4841_v23 = vor.u32 %v6138_v20, %v4840_v18  ;;  %v6234_v31 = vld [vmem:[#allocation11 + $0x74c] sm:$0xf0]  ;;  %v6148_v20 = vld [vmem:[#allocation11 + $0x4a4] sm:$0xf] }
 0x254   :  { %v1520_v26 = vpop.f32.mrf.mxu2 }
 0x255   :  { %v1533_v28 = vpop.f32.mrf.mxu3  ;;  %v6202_v26 = vld [vmem:[#allocation11 + $0x64c] sm:$0xf0]  ;;  %2413 = vmatpush.bf16.msrb.mxu0 %v4841_v23  ;;  %v6180_v23 = vld [vmem:[#allocation11 + $0x5a4] sm:$0xf] }
 0x256   :  { %v4969_v28 = vor.u32 %v6170_v24, %v4968_v21  ;;  %v5097_v29 = vor.u32 %v6202_v26, %v5096_v25  ;;  %v4890_v21 = vld [vmem:[#allocation11 + $0x4b0] sm:$0xf0] }
 0x257   :  { %v4893_v25 = vor.u32 %v6148_v20, %v4890_v21  ;;  %v5018_v26 = vld [vmem:[#allocation11 + $0x5b0] sm:$0xf0]  ;;  %v6228_v20 = vld [vmem:[#allocation11 + $0x724] sm:$0xf] }
 0x258   :  { %2426 = vmatpush.bf16.msrb.mxu1 %v4969_v28  ;;  %2439 = vmatpush.bf16.msrb.mxu2 %v5097_v29  ;;  %v6212_v28 = vld [vmem:[#allocation11 + $0x6a4] sm:$0xf]  ;;  %v5021_v29 = vor.u32 %v6180_v23, %v5018_v26  ;;  %v5210_v21 = vld [vmem:[#allocation11 + $0x730] sm:$0xf0]  ;;  %v4829_v23 = vor.u32 %v6132_v6, %v4826_v11 }
 0x259   :  { %2414 = vmatpush.bf16.msrb.mxu0 %v4825_v35  ;;  %v6128_v26 = vld [vmem:[#allocation11 + $0x404] sm:$0xf] }
 0x25b   :  { %1549 = vadd.xlane.f32.xlu1 %v1548_v32  ;;  %v5225_v32 = vor.u32 %v6234_v31, %v5224_v30  ;;  %v5146_v30 = vld [vmem:[#allocation11 + $0x6b0] sm:$0xf0]  ;;  %v6244_v31 = vld [vmem:[#allocation11 + $0x7a4] sm:$0xf] }
 0x25c   :  { %2427 = vmatpush.bf16.msrb.mxu1 %v4953_v36  ;;  %2440 = vmatpush.bf16.msrb.mxu2 %v5081_v27  ;;  %v5149_v35 = vor.u32 %v6212_v28, %v5146_v30  ;;  %v5130_v36 = vld [vmem:[#allocation11 + $0x690] sm:$0xf0]  ;;  %v4877_v27 = vor.u32 %v6144_v33, %v4874_v34  ;;  %v6160_v30 = vld [vmem:[#allocation11 + $0x504] sm:$0xf] }
 0x25d   :  { %2452 = vmatpush.bf16.msrb.mxu3 %v5225_v32  ;;  %2415 = vmatpush.bf16.msrb.mxu0 %v4809_v41  ;;  %v5274_v32 = vld [vmem:[#allocation11 + $0x7b0] sm:$0xf0]  ;;  %v5133_v59 = vor.u32 %v6208_v22, %v5130_v36  ;;  %v6172_v41 = vld [vmem:[#allocation11 + $0x564] sm:$0xf] }
 0x25e   :  { %v5277_v17 = vor.u32 %v6244_v31, %v5274_v32  ;;  %v4989_v50 = vor.u32 %v6172_v41, %v4986_v62  ;;  %v4938_v31 = vld [vmem:[#allocation11 + $0x510] sm:$0xf0]  ;;  %v5213_v32 = vor.u32 %v6228_v20, %v5210_v21  ;;  %v6192_v33 = vld [vmem:[#allocation11 + $0x604] sm:$0xf] }
 0x25f   :  { %v5066_v34 = vld [vmem:[#allocation11 + $0x610] sm:$0xf0]  ;;  %v4941_v22 = vor.u32 %v6160_v30, %v4938_v31 }
 0x260   :  { %2428 = vmatpush.bf16.msrb.mxu1 %v4937_v43  ;;  %2441 = vmatpush.bf16.msrb.mxu2 %v5065_v44  ;;  %v5114_v43 = vld [vmem:[#allocation11 + $0x670] sm:$0xf0] }
 0x261   :  { %2453 = vmatpush.bf16.msrb.mxu3 %v5209_v38  ;;  %2460 = vmatpush.bf16.msra.mxu0 %v4925_v54  ;;  %v5258_v38 = vld [vmem:[#allocation11 + $0x790] sm:$0xf0]  ;;  %v5117_v54 = vor.u32 %v6204_v42, %v5114_v43 }
 0x262   :  { %v5261_v1 = vor.u32 %v6240_v52, %v5258_v38 }
 0x264   :  { %2473 = vmatpush.bf16.msra.mxu1 %v5053_v55  ;;  %2486 = vmatpush.bf16.msra.mxu2 %v5181_v60  ;;  %v4842_v55 = vld [vmem:[#allocation11 + $0x450] sm:$0xf0]  ;;  %v5245_v60 = vor.u32 %v6236_v45, %v5242_v46  ;;  %v1588_v45 = vperm.slane %v1536_v40, 0  ;;  %v1576_v46 = vperm.slane %v1535_v39, 1 }
 0x265   :  { %2454 = vmatpush.bf16.msrb.mxu3 %v5193_v48  ;;  %2461 = vmatpush.bf16.msra.mxu0 %v4909_v3  ;;  %v4845_v4 = vor.u32 %v6136_v53, %v4842_v55  ;;  %v1591_v53 = vperm.slane %v1536_v40, 3 }
 0x268   :  { %2474 = vmatpush.bf16.msra.mxu1 %v5037_v10  ;;  %2487 = vmatpush.bf16.msra.mxu2 %v5165_v15  ;;  %v5101_v10 = vor.u32 %v6200_v61, %v5098_v63 }
 0x269   :  { %2499 = vmatpush.bf16.msra.mxu3 %v5309_v2  ;;  %2462 = vmatpush.bf16.msra.mxu0 %v4893_v25  ;;  %v5226_v2 = vld [vmem:[#allocation11 + $0x750] sm:$0xf0]  ;;  %v4957_v25 = vor.u32 %v6164_v13, %v4954_v14  ;;  %v4928_v13 = vld [vmem:[#allocation11 + $0x4e8] sm:$0xf]  ;;  %v6159_v14 = vld [vmem:[#allocation11 + $0x4f4] sm:$0xf0] }
 0x26a   :  { %v5229_v15 = vor.u32 %v6232_v0, %v5226_v2 }
 0x26c   :  { %2475 = vmatpush.bf16.msra.mxu1 %v5021_v29  ;;  %2488 = vmatpush.bf16.msra.mxu2 %v5149_v35  ;;  %v4810_v29 = vld [vmem:[#allocation11 + $0x410] sm:$0xf0] }
 0x26d   :  { %2500 = vmatpush.bf16.msra.mxu3 %v5293_v16  ;;  %2463 = vmatpush.bf16.msra.mxu0 %v4877_v27  ;;  %v6196_v16 = vld [vmem:[#allocation11 + $0x624] sm:$0xf]  ;;  %v5194_v35 = vld [vmem:[#allocation11 + $0x710] sm:$0xf0]  ;;  %v4813_v51 = vor.u32 %v6128_v26, %v4810_v29  ;;  %v5069_v27 = vor.u32 %v6192_v33, %v5066_v34  ;;  %v4929_v26 = vor.u32 %v6159_v14, %v4928_v13  ;;  %v6223_v29 = vld [vmem:[#allocation11 + $0x6f4] sm:$0xf0] }
 0x26e   :  { %v5312_v34 = vld [vmem:[#allocation11 + $0x7e8] sm:$0xf] }
 0x26f   :  { %v4992_v14 = vld [vmem:[#allocation11 + $0x568] sm:$0xf] }
 0x270   :  { %2476 = vmatpush.bf16.msra.mxu1 %v5005_v37  ;;  %2489 = vmatpush.bf16.msra.mxu2 %v5133_v59  ;;  %v5197_v37 = vor.u32 %v6224_v12, %v5194_v35  ;;  %v6255_v12 = vld [vmem:[#allocation11 + $0x7f4] sm:$0xf0] }
 0x271   :  { %2501 = vmatpush.bf16.msra.mxu3 %v5277_v17  ;;  %2464 = vmatpush.bf16.msra.mxu0 %v4861_v49 }
 0x274   :  { %2477 = vmatpush.bf16.msra.mxu1 %v4989_v50  ;;  %2490 = vmatpush.bf16.msra.mxu2 %v5117_v54  ;;  %v1589_v50 = vperm.slane %v1536_v40, 1 }
 0x275   :  { %2502 = vmatpush.bf16.msra.mxu3 %v5261_v1  ;;  %2465 = vmatpush.bf16.msra.mxu0 %v4845_v4 }
 0x278   :  { %2478 = vmatpush.bf16.msra.mxu1 %v4973_v5  ;;  %2491 = vmatpush.bf16.msra.mxu2 %v5101_v10 }
 0x279   :  { %2503 = vmatpush.bf16.msra.mxu3 %v5245_v60  ;;  %2466 = vmatpush.bf16.msra.mxu0 %v4829_v23 }
 0x27c   :  { %2479 = vmatpush.bf16.msra.mxu1 %v4957_v25 }
 0x27d   :  { %2504 = vmatpush.bf16.msra.mxu3 %v5229_v15  ;;  %2467 = vmatpush.bf16.msra.mxu0 %v4813_v51 }
 0x280   :  { %2480 = vmatpush.bf16.msra.mxu1 %v4941_v22  ;;  %v4912_v22 = vld [vmem:[#allocation11 + $0x4c8] sm:$0xf] }
 0x281   :  { %2505 = vmatpush.bf16.msra.mxu3 %v5213_v32 }
 0x285   :  { %2506 = vmatpush.bf16.msra.mxu3 %v5197_v37 }
 0x2c6   :  { %v1541_v18 = vpop.xlane.xlu1 %1540 }
 0x2c7   :  { %v6976_v24 = vmul.f32 0.0025, %v1541_v18  ;;  %v5082_v18 = vld [vmem:[#allocation11 + $0x630] sm:$0xf0] }
 0x2c8   :  { %v5085_v28 = vor.u32 %v6196_v16, %v5082_v18  ;;  %v5056_v16 = vld [vmem:[#allocation11 + $0x5e8] sm:$0xf]  ;;  %v6191_v18 = vld [vmem:[#allocation11 + $0x5f4] sm:$0xf0] }
 0x2c9   :  { %v1553_v47 = vmul.f32 %v6976_v24, %v6976_v24  ;;  %v1555_v41 = vsub.f32 %v6958_v8, %v6976_v24  ;;  %v1556_v62 = vsub.f32 %v6956_v7, %v6976_v24  ;;  %v1557_v1 = vsub.f32 %v6960_v9, %v6976_v24 }
 0x2ca   :  { %2492 = vmatpush.bf16.msra.mxu2 %v5085_v28  ;;  %v1558_v42 = vsub.f32 %v6964_v19, %v6976_v24  ;;  %v1590_v8 = vperm.slane %v1536_v40, 2  ;;  %v5184_v28 = vld [vmem:[#allocation11 + $0x6e8] sm:$0xf]  ;;  %v5057_v33 = vor.u32 %v6191_v18, %v5056_v16 }
 0x2cb   :  { %v5120_v18 = vld [vmem:[#allocation11 + $0x668] sm:$0xf] }
 0x2ce   :  { %v1550_v44 = vpop.xlane.xlu1 %1549  ;;  %2493 = vmatpush.bf16.msra.mxu2 %v5069_v27 }
 0x2cf   :  { %v1552_v48 = vmul.f32 0.0025, %v1550_v44  ;;  %v1575_v44 = vperm.slane %v1535_v39, 0 }
 0x2d1   :  { %v1554_v58 = vsub.f32 %v1552_v48, %v1553_v47  ;;  %v1577_v47 = vperm.slane %v1535_v39, 2  ;;  %v1578_v48 = vperm.slane %v1535_v39, 3  ;;  %v6187_v39 = vld [vmem:[#allocation11 + $0x5d4] sm:$0xf0] }
 0x2d3   :  { %v1559_v3 = vadd.f32 1e-05, %v1554_v58 }
 0x2d5   :  { %6443 = vrsqrt.f32 %v1559_v3  ;;  %vm1566_vm8 = vweird.f32 %v1559_v3 }
 0x2db   :  { %v6444_v17 = vpop.eup %6443 }
 0x2dc   :  { %v1561_v36 = vmul.f32 %v6444_v17, %v1559_v3  ;;  %vm1567_vm7 = vweird.f32 %v6444_v17 }
 0x2dd   :  { %vm1568_vm9 = vmor %vm1566_vm8, %vm1567_vm7 }
 0x2de   :  { %v1562_v52 = vmul.f32 %v6444_v17, %v1561_v36  ;;  %v6155_v36 = vld [vmem:[#allocation11 + $0x4d4] sm:$0xf0] }
 0x2e0   :  { %v1563_v38 = vmul.f32 0.5, %v1562_v52  ;;  %v5185_v52 = vor.u32 %v6223_v29, %v5184_v28  ;;  %v4848_v28 = vld [vmem:[#allocation11 + $0x448] sm:$0xf]  ;;  %v6139_v29 = vld [vmem:[#allocation11 + $0x454] sm:$0xf0] }
 0x2e2   :  { %v1564_v59 = vsub.f32 1.5, %v1563_v38  ;;  %v5040_v38 = vld [vmem:[#allocation11 + $0x5c8] sm:$0xf] }
 0x2e4   :  { %v1565_v43 = vmul.f32 %v6444_v17, %v1564_v59 }
 0x2e6   :  { %v1569_v49 = vsel %vm1568_vm9, %v6444_v17, %v1565_v43  ;;  %v4913_v43 = vor.u32 %v6155_v36, %v4912_v22  ;;  %v6235_v22 = vld [vmem:[#allocation11 + $0x754] sm:$0xf0] }
 0x2e7   :  { %v1570_v54 = vmul.f32 %v1569_v49, %v1555_v41  ;;  %v1571_v7 = vmul.f32 %v1569_v49, %v1556_v62  ;;  %v1572_v55 = vmul.f32 %v1569_v49, %v1557_v1  ;;  %v1573_v56 = vmul.f32 %v1569_v49, %v1558_v42  ;;  %v5168_v62 = vld [vmem:[#allocation11 + $0x6c8] sm:$0xf]  ;;  %v6219_v1 = vld [vmem:[#allocation11 + $0x6d4] sm:$0xf0] }
 0x2e8   :  { %v5313_v41 = vor.u32 %v6255_v12, %v5312_v34  ;;  %v5169_v49 = vor.u32 %v6219_v1, %v5168_v62  ;;  %v5104_v34 = vld [vmem:[#allocation11 + $0x648] sm:$0xf]  ;;  %v6203_v12 = vld [vmem:[#allocation11 + $0x654] sm:$0xf0] }
 0x2e9   :  { %v1583_v9 = vmul.f32 %v1575_v44, %v1570_v54  ;;  %v1584_v57 = vmul.f32 %v1576_v46, %v1571_v7  ;;  %v1585_v58 = vmul.f32 %v1577_v47, %v1572_v55  ;;  %v1586_v19 = vmul.f32 %v1578_v48, %v1573_v56  ;;  %v5296_v44 = vld [vmem:[#allocation11 + $0x7c8] sm:$0xf]  ;;  %v6151_v48 = vld [vmem:[#allocation11 + $0x4b4] sm:$0xf0] }
 0x2ea   :  { %v5041_v46 = vor.u32 %v6187_v39, %v5040_v38  ;;  %v4896_v47 = vld [vmem:[#allocation11 + $0x4a8] sm:$0xf]  ;;  %v6215_v7 = vld [vmem:[#allocation11 + $0x6b4] sm:$0xf0]  ;;  %v5105_v38 = vor.u32 %v6203_v12, %v5104_v34  ;;  %v6213_v34 = vld [vmem:[#allocation11 + $0x6ac] sm:$0xf] }
 0x2eb   :  { %v1596_v24 = vadd.f32 %v1588_v45, %v1583_v9  ;;  %v1597_v60 = vadd.f32 %v1589_v50, %v1584_v57  ;;  %v1598_v61 = vadd.f32 %v1590_v8, %v1585_v58  ;;  %v1599_v63 = vadd.f32 %v1591_v53, %v1586_v19  ;;  %v6251_v45 = vld [vmem:[#allocation11 + $0x7d4] sm:$0xf0]  ;;  %v5024_v50 = vld [vmem:[#allocation11 + $0x5a8] sm:$0xf]  ;;  %v5154_v12 = vld [vmem:[#allocation11 + $0x6b8] sm:$0xf0] }
 0x2ec   :  { %v6183_v8 = vld [vmem:[#allocation11 + $0x5b4] sm:$0xf0]  ;;  %v5297_v53 = vor.u32 %v6251_v45, %v5296_v44  ;;  %v5152_v54 = vld [vmem:[#allocation11 + $0x6a8] sm:$0xf]  ;;  %v4897_v55 = vor.u32 %v6151_v48, %v4896_v47 }
 0x2ed   :  { %v1604_v0 = vmin.f32 %v1596_v24, 0.0  ;;  %v1605_v2 = vmin.f32 %v1597_v60, 0.0  ;;  %v1606_v3 = vmin.f32 %v1598_v61, 0.0  ;;  %v1607_v4 = vmin.f32 %v1599_v63, 0.0  ;;  %v5280_v56 = vld [vmem:[#allocation11 + $0x7a8] sm:$0xf] }
 0x2ee   :  { %vm1600_vm10 = vcmp.gt.f32.partialorder %v1596_v24, 0.0  ;;  %vm1601_vm11 = vcmp.gt.f32.partialorder %v1597_v60, 0.0  ;;  %vm1602_vm12 = vcmp.gt.f32.partialorder %v1598_v61, 0.0  ;;  %vm1603_vm13 = vcmp.gt.f32.partialorder %v1599_v63, 0.0  ;;  %v6247_v9 = vld [vmem:[#allocation11 + $0x7b4] sm:$0xf0] }
 0x2ef   :  { %v1608_v5 = vmul.f32 1.442695, %v1604_v0  ;;  %v1610_v6 = vmul.f32 1.442695, %v1605_v2  ;;  %v1612_v10 = vmul.f32 1.442695, %v1606_v3  ;;  %v5025_v57 = vor.u32 %v6183_v8, %v5024_v50 }
 0x2f0   :  { %v1614_v11 = vmul.f32 1.442695, %v1607_v4  ;;  %v4880_v58 = vld [vmem:[#allocation11 + $0x488] sm:$0xf]  ;;  %v6147_v19 = vld [vmem:[#allocation11 + $0x494] sm:$0xf0] }
 0x2f1   :  { %6445 = vpow2.f32 %v1608_v5  ;;  %v5136_v0 = vld [vmem:[#allocation11 + $0x688] sm:$0xf]  ;;  %v6211_v2 = vld [vmem:[#allocation11 + $0x694] sm:$0xf0]  ;;  %v4881_v3 = vor.u32 %v6147_v19, %v4880_v58  ;;  %v5058_v58 = vld [vmem:[#allocation11 + $0x5f8] sm:$0xf0] }
 0x2f2   :  { %6447 = vpow2.f32 %v1610_v6  ;;  %v5264_v4 = vld [vmem:[#allocation11 + $0x788] sm:$0xf]  ;;  %v6243_v5 = vld [vmem:[#allocation11 + $0x794] sm:$0xf0]  ;;  %v5137_v13 = vor.u32 %v6211_v2, %v5136_v0  ;;  %v6253_v2 = vld [vmem:[#allocation11 + $0x7ec] sm:$0xf] }
 0x2f3   :  { %6449 = vpow2.f32 %v1612_v10  ;;  %v4864_v10 = vld [vmem:[#allocation11 + $0x468] sm:$0xf]  ;;  %v5265_v16 = vor.u32 %v6243_v5, %v5264_v4  ;;  %v6199_v1 = vld [vmem:[#allocation11 + $0x634] sm:$0xf0] }
 0x2f4   :  { %6451 = vpow2.f32 %v1614_v11  ;;  %v6143_v11 = vld [vmem:[#allocation11 + $0x474] sm:$0xf0]  ;;  %v4960_v39 = vld [vmem:[#allocation11 + $0x528] sm:$0xf] }
 0x2f5   :  { %v5088_v62 = vld [vmem:[#allocation11 + $0x628] sm:$0xf]  ;;  %v6231_v45 = vld [vmem:[#allocation11 + $0x734] sm:$0xf0] }
 0x2f6   :  { %v6131_v47 = vld [vmem:[#allocation11 + $0x414] sm:$0xf0]  ;;  %v5072_v8 = vld [vmem:[#allocation11 + $0x608] sm:$0xf] }
 0x2f7   :  { %v6446_v15 = vpop.eup %6445  ;;  %v6163_v50 = vld [vmem:[#allocation11 + $0x514] sm:$0xf0] }
 0x2f8   :  { %v6448_v20 = vpop.eup %6447  ;;  %v4802_v21 = vadd.f32 -1.0, %v6446_v15  ;;  %v6175_v15 = vld [vmem:[#allocation11 + $0x574] sm:$0xf0] }
 0x2f9   :  { %v6450_v23 = vpop.eup %6449  ;;  %v4803_v25 = vadd.f32 -1.0, %v6448_v20  ;;  %v6207_v20 = vld [vmem:[#allocation11 + $0x674] sm:$0xf0] }
 0x2fa   :  { %v6452_v30 = vpop.eup %6451  ;;  %v1620_v31 = vsel %vm1600_vm10, %v1596_v24, %v4802_v21  ;;  %v4804_v32 = vadd.f32 -1.0, %v6450_v23  ;;  %v5153_v24 = vor.u32 %v6215_v7, %v5152_v54  ;;  %v4865_v21 = vor.u32 %v6143_v11, %v4864_v10  ;;  %v5248_v23 = vld [vmem:[#allocation11 + $0x768] sm:$0xf]  ;;  %v6195_v54 = vld [vmem:[#allocation11 + $0x614] sm:$0xf0] }
 0x2fb   :  { %v6988_v35 = vpack.c.bf16 %v1620_v31, %v1620_v31  ;;  %v1621_v17 = vsel %vm1601_vm11, %v1597_v60, %v4803_v25  ;;  %v4805_v51 = vadd.f32 -1.0, %v6452_v30  ;;  %v5008_v60 = vld [vmem:[#allocation11 + $0x588] sm:$0xf]  ;;  %v6239_v25 = vld [vmem:[#allocation11 + $0x774] sm:$0xf0]  ;;  %v5121_v30 = vor.u32 %v6207_v20, %v5120_v18 }
 0x2fc   :  { %v6990_v27 = vpack.c.bf16 %v1621_v17, %v1621_v17  ;;  %v1622_v37 = vsel %vm1602_vm12, %v1598_v61, %v4804_v32  ;;  %v6179_v61 = vld [vmem:[#allocation11 + $0x594] sm:$0xf0]  ;;  %v4976_v31 = vld [vmem:[#allocation11 + $0x548] sm:$0xf]  ;;  %v4849_v17 = vor.u32 %v6139_v29, %v4848_v28  ;;  %v6157_v7 = vld [vmem:[#allocation11 + $0x4ec] sm:$0xf]  ;;  %v5073_v4 = vor.u32 %v6195_v54, %v5072_v8 }
 0x2fd   :  { %2416 = vmatmul.bf16.vlgmr.msrb.gmra.mxu0 %v6988_v35  ;;  %v6993_v59 = vpack.c.bf16 %v1622_v37, %v1622_v37  ;;  %v1623_v40 = vsel %vm1603_vm13, %v1599_v63, %v4805_v51  ;;  %v5281_v63 = vor.u32 %v6247_v9, %v5280_v56  ;;  %v5009_v6 = vor.u32 %v6179_v61, %v5008_v60  ;;  %v6171_v32 = vld [vmem:[#allocation11 + $0x554] sm:$0xf0]  ;;  %v5232_v51 = vld [vmem:[#allocation11 + $0x748] sm:$0xf]  ;;  %v6221_v60 = vld [vmem:[#allocation11 + $0x6ec] sm:$0xf] }
 0x2fe   :  { %2429 = vmatmul.bf16.vlgmr.msrb.gmra.mxu1 %v6990_v27  ;;  %v6996_v42 = vpack.c.bf16 %v1623_v40, %v1623_v40  ;;  %2512 = vmatpush.bf16.msrb.mxu0 %v4929_v26  ;;  %v4993_v26 = vor.u32 %v6175_v15, %v4992_v14  ;;  %v4977_v36 = vor.u32 %v6171_v32, %v4976_v31  ;;  %v4832_v37 = vld [vmem:[#allocation11 + $0x428] sm:$0xf]  ;;  %v6167_v40 = vld [vmem:[#allocation11 + $0x534] sm:$0xf0]  ;;  %v5186_v61 = vld [vmem:[#allocation11 + $0x6f8] sm:$0xf0] }
 0x2ff   :  { %2442 = vmatmul.bf16.vlgmr.msrb.gmra.mxu2 %v6993_v59  ;;  %2525 = vmatpush.bf16.msrb.mxu1 %v5057_v33  ;;  %v5249_v33 = vor.u32 %v6239_v25, %v5248_v23  ;;  %v4961_v48 = vor.u32 %v6167_v40, %v4960_v39  ;;  %v5200_v9 = vld [vmem:[#allocation11 + $0x708] sm:$0xf]  ;;  %v5189_v10 = vor.u32 %v6221_v60, %v5186_v61  ;;  %v6153_v11 = vld [vmem:[#allocation11 + $0x4cc] sm:$0xf]  ;;  %v5170_v20 = vld [vmem:[#allocation11 + $0x6d8] sm:$0xf0] }
 0x300   :  { %2455 = vmatmul.bf16.vlgmr.msrb.gmra.mxu3 %v6996_v42  ;;  %2538 = vmatpush.bf16.msrb.mxu2 %v5185_v52  ;;  %v6135_v52 = vld [vmem:[#allocation11 + $0x434] sm:$0xf0]  ;;  %v6185_v14 = vld [vmem:[#allocation11 + $0x5cc] sm:$0xf]  ;;  %v5298_v23 = vld [vmem:[#allocation11 + $0x7d8] sm:$0xf0] }
 0x301   :  { %2551 = vmatpush.bf16.msrb.mxu3 %v5313_v41  ;;  %v5233_v41 = vor.u32 %v6235_v22, %v5232_v51  ;;  %v4833_v44 = vor.u32 %v6135_v52, %v4832_v37  ;;  %v6217_v18 = vld [vmem:[#allocation11 + $0x6cc] sm:$0xf]  ;;  %v5282_v51 = vld [vmem:[#allocation11 + $0x7b8] sm:$0xf0]  ;;  %v5157_v37 = vor.u32 %v6213_v34, %v5154_v12 }
 0x302   :  { %2513 = vmatpush.bf16.msrb.mxu0 %v4913_v43  ;;  %v5216_v43 = vld [vmem:[#allocation11 + $0x728] sm:$0xf]  ;;  %v5173_v28 = vor.u32 %v6217_v18, %v5170_v20  ;;  %v6149_v29 = vld [vmem:[#allocation11 + $0x4ac] sm:$0xf]  ;;  %v5090_v20 = vld [vmem:[#allocation11 + $0x638] sm:$0xf0] }
 0x303   :  { %2526 = vmatpush.bf16.msrb.mxu1 %v5041_v46  ;;  %v4816_v46 = vld [vmem:[#allocation11 + $0x408] sm:$0xf]  ;;  %v5217_v56 = vor.u32 %v6231_v45, %v5216_v43  ;;  %v6181_v31 = vld [vmem:[#allocation11 + $0x5ac] sm:$0xf]  ;;  %v5074_v12 = vld [vmem:[#allocation11 + $0x618] sm:$0xf0] }
 0x304   :  { %2539 = vmatpush.bf16.msrb.mxu2 %v5169_v49  ;;  %v4944_v49 = vld [vmem:[#allocation11 + $0x508] sm:$0xf]  ;;  %v4817_v19 = vor.u32 %v6131_v47, %v4816_v46  ;;  %v6145_v52 = vld [vmem:[#allocation11 + $0x48c] sm:$0xf] }
 0x305   :  { %2552 = vmatpush.bf16.msrb.mxu3 %v5297_v53  ;;  %v5089_v53 = vor.u32 %v6199_v1, %v5088_v62  ;;  %v6177_v39 = vld [vmem:[#allocation11 + $0x58c] sm:$0xf]  ;;  %v5138_v1 = vld [vmem:[#allocation11 + $0x698] sm:$0xf0] }
 0x306   :  { %2514 = vmatpush.bf16.msrb.mxu0 %v4897_v55  ;;  %v4930_v55 = vld [vmem:[#allocation11 + $0x4f8] sm:$0xf0]  ;;  %v6209_v62 = vld [vmem:[#allocation11 + $0x68c] sm:$0xf] }
 0x307   :  { %2527 = vmatpush.bf16.msrb.mxu1 %v5025_v57  ;;  %v6189_v57 = vld [vmem:[#allocation11 + $0x5ec] sm:$0xf]  ;;  %v4933_v0 = vor.u32 %v6157_v7, %v4930_v55  ;;  %v5141_v47 = vor.u32 %v6209_v62, %v5138_v1  ;;  %v5122_v7 = vld [vmem:[#allocation11 + $0x678] sm:$0xf0] }
 0x308   :  { %2540 = vmatpush.bf16.msrb.mxu2 %v5153_v24  ;;  %v6227_v24 = vld [vmem:[#allocation11 + $0x714] sm:$0xf0]  ;;  %v5061_v5 = vor.u32 %v6189_v57, %v5058_v58  ;;  %v6241_v43 = vld [vmem:[#allocation11 + $0x78c] sm:$0xf] }
 0x309   :  { %2553 = vmatpush.bf16.msrb.mxu3 %v5281_v63  ;;  %v4945_v63 = vor.u32 %v6163_v50, %v4944_v49  ;;  %v4866_v49 = vld [vmem:[#allocation11 + $0x478] sm:$0xf0]  ;;  %v6173_v50 = vld [vmem:[#allocation11 + $0x56c] sm:$0xf] }
 0x30a   :  { %2515 = vmatpush.bf16.msrb.mxu0 %v4881_v3  ;;  %v5314_v3 = vld [vmem:[#allocation11 + $0x7f8] sm:$0xf0]  ;;  %v6205_v54 = vld [vmem:[#allocation11 + $0x66c] sm:$0xf] }
 0x30b   :  { %2528 = vmatpush.bf16.msrb.mxu1 %v5009_v6  ;;  %v5201_v6 = vor.u32 %v6227_v24, %v5200_v9  ;;  %v5317_v15 = vor.u32 %v6253_v2, %v5314_v3  ;;  %v6237_v55 = vld [vmem:[#allocation11 + $0x76c] sm:$0xf]  ;;  %v5125_v58 = vor.u32 %v6205_v54, %v5122_v7  ;;  %v4850_v24 = vld [vmem:[#allocation11 + $0x458] sm:$0xf0] }
 0x30c   :  { %2541 = vmatpush.bf16.msrb.mxu2 %v5137_v13  ;;  %v4914_v13 = vld [vmem:[#allocation11 + $0x4d8] sm:$0xf0]  ;;  %v6169_v60 = vld [vmem:[#allocation11 + $0x54c] sm:$0xf] }
 0x30d   :  { %2554 = vmatpush.bf16.msrb.mxu3 %v5265_v16  ;;  %2468 = vmatmul.bf16.vlgmr.msra.gmra.mxu0 %v6988_v35  ;;  %v5042_v16 = vld [vmem:[#allocation11 + $0x5d8] sm:$0xf0]  ;;  %v4917_v25 = vor.u32 %v6153_v11, %v4914_v13  ;;  %v6233_v3 = vld [vmem:[#allocation11 + $0x74c] sm:$0xf] }
 0x30e   :  { %2481 = vmatmul.bf16.vlgmr.msra.gmra.mxu1 %v6990_v27  ;;  %2516 = vmatpush.bf16.msrb.mxu0 %v4865_v21  ;;  %v6249_v21 = vld [vmem:[#allocation11 + $0x7cc] sm:$0xf]  ;;  %v5106_v2 = vld [vmem:[#allocation11 + $0x658] sm:$0xf0] }
 0x30f   :  { %2494 = vmatmul.bf16.vlgmr.msra.gmra.mxu2 %v6993_v59  ;;  %2529 = vmatpush.bf16.msrb.mxu1 %v4993_v26  ;;  %v5045_v26 = vor.u32 %v6185_v14, %v5042_v16  ;;  %v5301_v32 = vor.u32 %v6249_v21, %v5298_v23  ;;  %v6133_v11 = vld [vmem:[#allocation11 + $0x42c] sm:$0xf]  ;;  %v4834_v13 = vld [vmem:[#allocation11 + $0x438] sm:$0xf0] }
 0x310   :  { %2507 = vmatmul.bf16.vlgmr.msra.gmra.mxu3 %v6996_v42  ;;  %2542 = vmatpush.bf16.msrb.mxu2 %v5121_v30  ;;  %v4898_v30 = vld [vmem:[#allocation11 + $0x4b8] sm:$0xf0]  ;;  %v6165_v14 = vld [vmem:[#allocation11 + $0x52c] sm:$0xf] }
 0x311   :  { %2555 = vmatpush.bf16.msrb.mxu3 %v5249_v33  ;;  %v5026_v33 = vld [vmem:[#allocation11 + $0x5b8] sm:$0xf0]  ;;  %v4901_v22 = vor.u32 %v6149_v29, %v4898_v30  ;;  %v6197_v18 = vld [vmem:[#allocation11 + $0x62c] sm:$0xf] }
 0x312   :  { %2517 = vmatpush.bf16.msrb.mxu0 %v4849_v17  ;;  %v6245_v17 = vld [vmem:[#allocation11 + $0x7ac] sm:$0xf]  ;;  %v4962_v16 = vld [vmem:[#allocation11 + $0x538] sm:$0xf0] }
 0x313   :  { %2530 = vmatpush.bf16.msrb.mxu1 %v4977_v36  ;;  %v5029_v36 = vor.u32 %v6181_v31, %v5026_v33  ;;  %v5285_v40 = vor.u32 %v6245_v17, %v5282_v51  ;;  %v6229_v21 = vld [vmem:[#allocation11 + $0x72c] sm:$0xf]  ;;  %v5218_v23 = vld [vmem:[#allocation11 + $0x738] sm:$0xf0] }
 0x314   :  { %2543 = vmatpush.bf16.msrb.mxu2 %v5105_v38  ;;  %v4882_v38 = vld [vmem:[#allocation11 + $0x498] sm:$0xf0]  ;;  %v6129_v29 = vld [vmem:[#allocation11 + $0x40c] sm:$0xf] }
 0x315   :  { %2556 = vmatpush.bf16.msrb.mxu3 %v5233_v41  ;;  %v5010_v41 = vld [vmem:[#allocation11 + $0x598] sm:$0xf0]  ;;  %v4885_v45 = vor.u32 %v6145_v52, %v4882_v38  ;;  %v6161_v31 = vld [vmem:[#allocation11 + $0x50c] sm:$0xf] }
 0x316   :  { %2518 = vmatpush.bf16.msrb.mxu0 %v4833_v44  ;;  %v5266_v44 = vld [vmem:[#allocation11 + $0x798] sm:$0xf0]  ;;  %v5013_v46 = vor.u32 %v6177_v39, %v5010_v41  ;;  %v6193_v34 = vld [vmem:[#allocation11 + $0x60c] sm:$0xf] }
 0x317   :  { %2531 = vmatpush.bf16.msrb.mxu1 %v4961_v48  ;;  %v6141_v48 = vld [vmem:[#allocation11 + $0x46c] sm:$0xf]  ;;  %v5269_v8 = vor.u32 %v6241_v43, %v5266_v44  ;;  %v4818_v30 = vld [vmem:[#allocation11 + $0x418] sm:$0xf0] }
 0x318   :  { %2544 = vmatpush.bf16.msrb.mxu2 %v5089_v53  ;;  %v4994_v53 = vld [vmem:[#allocation11 + $0x578] sm:$0xf0]  ;;  %v4869_v9 = vor.u32 %v6141_v48, %v4866_v49  ;;  %v6225_v17 = vld [vmem:[#allocation11 + $0x70c] sm:$0xf] }
 0x319   :  { %2557 = vmatpush.bf16.msrb.mxu3 %v5217_v56  ;;  %v5250_v56 = vld [vmem:[#allocation11 + $0x778] sm:$0xf0]  ;;  %v4997_v57 = vor.u32 %v6173_v50, %v4994_v53 }
 0x31a   :  { %2519 = vmatpush.bf16.msrb.mxu0 %v4817_v19  ;;  %v6137_v19 = vld [vmem:[#allocation11 + $0x44c] sm:$0xf]  ;;  %v5253_v61 = vor.u32 %v6237_v55, %v5250_v56  ;;  %v4946_v33 = vld [vmem:[#allocation11 + $0x518] sm:$0xf0] }
 0x31b   :  { %2532 = vmatpush.bf16.msrb.mxu1 %v4945_v63  ;;  %v4978_v63 = vld [vmem:[#allocation11 + $0x558] sm:$0xf0] }
 0x31c   :  { %2545 = vmatpush.bf16.msrb.mxu2 %v5073_v4  ;;  %v5234_v4 = vld [vmem:[#allocation11 + $0x758] sm:$0xf0] }
 0x31d   :  { %2558 = vmatpush.bf16.msrb.mxu3 %v5201_v6  ;;  %2520 = vmatmul.bf16.vlgmr.msrb.gmra.mxu0 %v6988_v35  ;;  %v4981_v6 = vor.u32 %v6169_v60, %v4978_v63  ;;  %v5202_v51 = vld [vmem:[#allocation11 + $0x718] sm:$0xf0]  ;;  %v5692_v63 = vld [vmem:[#allocation11 + $0xae0] sm:$0xf] }
 0x31e   :  { %2564 = vmatpush.bf16.msra.mxu0 %v4933_v0  ;;  %2533 = vmatmul.bf16.vlgmr.msrb.gmra.mxu1 %v6990_v27  ;;  %v6201_v0 = vld [vmem:[#allocation11 + $0x64c] sm:$0xf]  ;;  %v5205_v52 = vor.u32 %v6225_v17, %v5202_v51 }
 0x31f   :  { %2577 = vmatpush.bf16.msra.mxu1 %v5061_v5  ;;  %2546 = vmatmul.bf16.vlgmr.msrb.gmra.mxu2 %v6993_v59  ;;  %v4853_v5 = vor.u32 %v6137_v19, %v4850_v24  ;;  %v6286_v19 = vld [vmem:[#allocation11 + $0x8ec] sm:$0xf0]  ;;  %v5564_v24 = vld [vmem:[#allocation11 + $0x9e0] sm:$0xf] }
 0x320   :  { %2590 = vmatpush.bf16.msra.mxu2 %v5189_v10  ;;  %2559 = vmatmul.bf16.vlgmr.msrb.gmra.mxu3 %v6996_v42  ;;  %v5109_v10 = vor.u32 %v6201_v0, %v5106_v2  ;;  %v6350_v0 = vld [vmem:[#allocation11 + $0xaec] sm:$0xf0] }
 0x321   :  { %2603 = vmatpush.bf16.msra.mxu3 %v5317_v15  ;;  %v5237_v15 = vor.u32 %v6233_v3, %v5234_v4 }
 0x322   :  { %2565 = vmatpush.bf16.msra.mxu0 %v4917_v25  ;;  %v4837_v25 = vor.u32 %v6133_v11, %v4834_v13 }
 0x323   :  { %2578 = vmatpush.bf16.msra.mxu1 %v5045_v26  ;;  %v4965_v26 = vor.u32 %v6165_v14, %v4962_v16 }
 0x324   :  { %2591 = vmatpush.bf16.msra.mxu2 %v5173_v28  ;;  %v5093_v28 = vor.u32 %v6197_v18, %v5090_v20 }
 0x325   :  { %2604 = vmatpush.bf16.msra.mxu3 %v5301_v32  ;;  %v5221_v32 = vor.u32 %v6229_v21, %v5218_v23 }
 0x326   :  { %2566 = vmatpush.bf16.msra.mxu0 %v4901_v22  ;;  %v4821_v22 = vor.u32 %v6129_v29, %v4818_v30 }
 0x327   :  { %2579 = vmatpush.bf16.msra.mxu1 %v5029_v36  ;;  %v4949_v36 = vor.u32 %v6161_v31, %v4946_v33 }
 0x328   :  { %2592 = vmatpush.bf16.msra.mxu2 %v5157_v37  ;;  %v5077_v37 = vor.u32 %v6193_v34, %v5074_v12 }
 0x329   :  { %2605 = vmatpush.bf16.msra.mxu3 %v5285_v40 }
 0x32a   :  { %2567 = vmatpush.bf16.msra.mxu0 %v4885_v45 }
 0x32b   :  { %2580 = vmatpush.bf16.msra.mxu1 %v5013_v46 }
 0x32c   :  { %2593 = vmatpush.bf16.msra.mxu2 %v5141_v47 }
 0x32d   :  { %2606 = vmatpush.bf16.msra.mxu3 %v5269_v8 }
 0x32e   :  { %2568 = vmatpush.bf16.msra.mxu0 %v4869_v9  ;;  %v1758_v9 = vld [vmem:[#allocation13 + $0x4] sm:$0xf] }
 0x32f   :  { %2581 = vmatpush.bf16.msra.mxu1 %v4997_v57  ;;  %v1761_v57 = vperm.slane %v1758_v9, 1  ;;  %v1760_v2 = vperm.slane %v1758_v9, 0  ;;  %v1762_v3 = vperm.slane %v1758_v9, 2  ;;  %v1763_v18 = vperm.slane %v1758_v9, 3  ;;  %v6278_v9 = vld [vmem:[#allocation11 + $0x8ac] sm:$0xf0] }
 0x330   :  { %2594 = vmatpush.bf16.msra.mxu2 %v5125_v58  ;;  %v5436_v58 = vld [vmem:[#allocation11 + $0x8e0] sm:$0xf] }
 0x331   :  { %2607 = vmatpush.bf16.msra.mxu3 %v5253_v61  ;;  %v5437_v60 = vor.u32 %v6286_v19, %v5436_v58  ;;  %v6318_v61 = vld [vmem:[#allocation11 + $0x9ec] sm:$0xf0] }
 0x332   :  { %2569 = vmatpush.bf16.msra.mxu0 %v4853_v5  ;;  %v5565_v4 = vor.u32 %v6318_v61, %v5564_v24  ;;  %v5693_v5 = vor.u32 %v6350_v0, %v5692_v63  ;;  %v6310_v19 = vld [vmem:[#allocation11 + $0x9ac] sm:$0xf0]  ;;  %v5660_v24 = vld [vmem:[#allocation11 + $0xaa0] sm:$0xf] }
 0x333   :  { %2582 = vmatpush.bf16.msra.mxu1 %v4981_v6  ;;  %v5820_v6 = vld [vmem:[#allocation11 + $0xbe0] sm:$0xf] }
 0x334   :  { %2595 = vmatpush.bf16.msra.mxu2 %v5109_v10  ;;  %v6382_v10 = vld [vmem:[#allocation11 + $0xbec] sm:$0xf0]  ;;  %v5788_v0 = vld [vmem:[#allocation11 + $0xba0] sm:$0xf] }
 0x335   :  { %2608 = vmatpush.bf16.msra.mxu3 %v5237_v15  ;;  %v5821_v11 = vor.u32 %v6382_v10, %v5820_v6  ;;  %v5516_v6 = vld [vmem:[#allocation11 + $0x980] sm:$0xf] }
 0x336   :  { %2570 = vmatpush.bf16.msra.mxu0 %v4837_v25 }
 0x337   :  { %2583 = vmatpush.bf16.msra.mxu1 %v4965_v26 }
 0x338   :  { %2596 = vmatpush.bf16.msra.mxu2 %v5093_v28 }
 0x339   :  { %2609 = vmatpush.bf16.msra.mxu3 %v5221_v32 }
 0x33a   :  { %2571 = vmatpush.bf16.msra.mxu0 %v4821_v22 }
 0x33b   :  { %2584 = vmatpush.bf16.msra.mxu1 %v4949_v36 }
 0x33c   :  { %2597 = vmatpush.bf16.msra.mxu2 %v5077_v37 }
 0x33d   :  { %2610 = vmatpush.bf16.msra.mxu3 %v5205_v52  ;;  %2572 = vmatmul.bf16.vlgmr.msra.gmra.mxu0 %v6988_v35 }
 0x33e   :  { %2585 = vmatmul.bf16.vlgmr.msra.gmra.mxu1 %v6990_v27  ;;  %3491 = vmatpush.bf16.msrb.mxu0 %v5437_v60  ;;  %v6342_v60 = vld [vmem:[#allocation11 + $0xaac] sm:$0xf0] }
 0x33f   :  { %2598 = vmatmul.bf16.vlgmr.msra.gmra.mxu2 %v6993_v59  ;;  %3504 = vmatpush.bf16.msrb.mxu1 %v5565_v4  ;;  %v5661_v63 = vor.u32 %v6342_v60, %v5660_v24  ;;  %v5388_v4 = vld [vmem:[#allocation11 + $0x880] sm:$0xf]  ;;  %v6322_v60 = vld [vmem:[#allocation11 + $0xa0c] sm:$0xf0] }
 0x340   :  { %2611 = vmatmul.bf16.vlgmr.msra.gmra.mxu3 %v6996_v42  ;;  %3517 = vmatpush.bf16.msrb.mxu2 %v5693_v5  ;;  %v6274_v5 = vld [vmem:[#allocation11 + $0x88c] sm:$0xf0]  ;;  %v5580_v24 = vld [vmem:[#allocation11 + $0xa00] sm:$0xf] }
 0x341   :  { %3530 = vmatpush.bf16.msrb.mxu3 %v5821_v11  ;;  %v5389_v10 = vor.u32 %v6274_v5, %v5388_v4  ;;  %v6306_v11 = vld [vmem:[#allocation11 + $0x98c] sm:$0xf0]  ;;  %v5438_v5 = vld [vmem:[#allocation11 + $0x8f0] sm:$0xf0] }
 0x37a   :  { %v2417_v38 = vpop.f32.mrf.mxu0 }
 0x37b   :  { %v2430_v39 = vpop.f32.mrf.mxu1  ;;  %v2418_v14 = vadd.f32 %v2417_v38, %v1760_v2  ;;  %v6374_v2 = vld [vmem:[#allocation11 + $0xbac] sm:$0xf0] }
 0x37d   :  { %v2431_v20 = vadd.f32 %v2430_v39, %v2418_v14  ;;  %v6338_v14 = vld [vmem:[#allocation11 + $0xa8c] sm:$0xf0] }
 0x382   :  { %v2443_v40 = vpop.f32.mrf.mxu2  ;;  %v2419_v41 = vpop.f32.mrf.mxu0 }
 0x383   :  { %v2456_v62 = vpop.f32.mrf.mxu3  ;;  %v2432_v1 = vpop.f32.mrf.mxu1  ;;  %v2444_v28 = vadd.f32 %v2443_v40, %v2431_v20  ;;  %v6370_v20 = vld [vmem:[#allocation11 + $0xb8c] sm:$0xf0] }
 0x385   :  { %v7014_v32 = vadd.f32 %v2456_v62, %v2444_v28 }
 0x387   :  { %v2625_v41 = vmul.f32 %v7014_v32, %v7014_v32 }
 0x38a   :  { %v2445_v43 = vpop.f32.mrf.mxu2  ;;  %v2469_v44 = vpop.f32.mrf.mxu0 }
 0x38b   :  { %v2458_v45 = vpop.f32.mrf.mxu3  ;;  %v2482_v46 = vpop.f32.mrf.mxu1  ;;  %v2470_v13 = vadd.f32 %v2469_v44, %v1761_v57  ;;  %v5532_v57 = vld [vmem:[#allocation11 + $0x9a0] sm:$0xf] }
 0x38c   :  { %v5533_v61 = vor.u32 %v6310_v19, %v5532_v57  ;;  %v5452_v57 = vld [vmem:[#allocation11 + $0x900] sm:$0xf]  ;;  %v6290_v19 = vld [vmem:[#allocation11 + $0x90c] sm:$0xf0] }
 0x38d   :  { %v2483_v16 = vadd.f32 %v2482_v46, %v2470_v13  ;;  %v5644_v13 = vld [vmem:[#allocation11 + $0xa80] sm:$0xf] }
 0x392   :  { %v2495_v47 = vpop.f32.mrf.mxu2  ;;  %v2471_v48 = vpop.f32.mrf.mxu0 }
 0x393   :  { %v2508_v49 = vpop.f32.mrf.mxu3  ;;  %v2484_v35 = vpop.f32.mrf.mxu1  ;;  %v2496_v21 = vadd.f32 %v2495_v47, %v2483_v16  ;;  %v5420_v48 = vld [vmem:[#allocation11 + $0x8c0] sm:$0xf]  ;;  %v5645_v16 = vor.u32 %v6338_v14, %v5644_v13  ;;  %v6348_v14 = vld [vmem:[#allocation11 + $0xae4] sm:$0xf] }
 0x394   :  { %v5548_v35 = vld [vmem:[#allocation11 + $0x9c0] sm:$0xf] }
 0x395   :  { %v7012_v31 = vadd.f32 %v2508_v49, %v2496_v21  ;;  %v6282_v49 = vld [vmem:[#allocation11 + $0x8cc] sm:$0xf0] }
 0x397   :  { %v2620_v36 = vadd.f32 %v7012_v31, %v7014_v32  ;;  %v2626_v39 = vmul.f32 %v7012_v31, %v7012_v31 }
 0x399   :  { %v2629_v45 = vadd.f32 %v2626_v39, %v2625_v41  ;;  %v5484_v39 = vld [vmem:[#allocation11 + $0x940] sm:$0xf]  ;;  %v6298_v41 = vld [vmem:[#allocation11 + $0x94c] sm:$0xf0] }
 0x39a   :  { %v2497_v50 = vpop.f32.mrf.mxu2  ;;  %v2521_v8 = vpop.f32.mrf.mxu0 }
 0x39b   :  { %v2510_v27 = vpop.f32.mrf.mxu3  ;;  %v2534_v59 = vpop.f32.mrf.mxu1  ;;  %v2522_v15 = vadd.f32 %v2521_v8, %v1762_v3  ;;  %v5421_v50 = vor.u32 %v6282_v49, %v5420_v48  ;;  %v5676_v8 = vld [vmem:[#allocation11 + $0xac0] sm:$0xf]  ;;  %v5789_v3 = vor.u32 %v6374_v2, %v5788_v0  ;;  %v6262_v49 = vld [vmem:[#allocation11 + $0x82c] sm:$0xf0] }
 0x39c   :  { %v6314_v27 = vld [vmem:[#allocation11 + $0x9cc] sm:$0xf0]  ;;  %v5340_v48 = vld [vmem:[#allocation11 + $0x820] sm:$0xf] }
 0x39d   :  { %v2535_v23 = vadd.f32 %v2534_v59, %v2522_v15  ;;  %v6346_v59 = vld [vmem:[#allocation11 + $0xacc] sm:$0xf0]  ;;  %3492 = vmatpush.bf16.msrb.mxu0 %v5421_v50  ;;  %v5517_v15 = vor.u32 %v6306_v11, %v5516_v6  ;;  %v5341_v50 = vor.u32 %v6262_v49, %v5340_v48  ;;  %v5708_v0 = vld [vmem:[#allocation11 + $0xb00] sm:$0xf]  ;;  %v6316_v6 = vld [vmem:[#allocation11 + $0x9e4] sm:$0xf] }
 0x39e   :  { %v6354_v2 = vld [vmem:[#allocation11 + $0xb0c] sm:$0xf0]  ;;  %v6272_v48 = vld [vmem:[#allocation11 + $0x884] sm:$0xf]  ;;  %v5390_v49 = vld [vmem:[#allocation11 + $0x890] sm:$0xf0] }
 0x39f   :  { %v5709_v4 = vor.u32 %v6354_v2, %v5708_v0  ;;  %v6364_v0 = vld [vmem:[#allocation11 + $0xb64] sm:$0xf]  ;;  %v5758_v2 = vld [vmem:[#allocation11 + $0xb70] sm:$0xf0] }
 0x3a2   :  { %v2547_v53 = vpop.f32.mrf.mxu2  ;;  %v2523_v54 = vpop.f32.mrf.mxu0 }
 0x3a3   :  { %v2560_v42 = vpop.f32.mrf.mxu3  ;;  %v2536_v7 = vpop.f32.mrf.mxu1  ;;  %v2548_v29 = vadd.f32 %v2547_v53, %v2535_v23  ;;  %v5549_v53 = vor.u32 %v6314_v27, %v5548_v35  ;;  %v5804_v54 = vld [vmem:[#allocation11 + $0xbc0] sm:$0xf]  ;;  %v6294_v27 = vld [vmem:[#allocation11 + $0x92c] sm:$0xf0] }
 0x3a4   :  { %v6378_v7 = vld [vmem:[#allocation11 + $0xbcc] sm:$0xf0]  ;;  %v5372_v23 = vld [vmem:[#allocation11 + $0x860] sm:$0xf] }
 0x3a5   :  { %v7016_v33 = vadd.f32 %v2560_v42, %v2548_v29  ;;  %v5677_v42 = vor.u32 %v6346_v59, %v5676_v8  ;;  %3505 = vmatpush.bf16.msrb.mxu1 %v5549_v53  ;;  %v6302_v29 = vld [vmem:[#allocation11 + $0x96c] sm:$0xf0]  ;;  %v5468_v35 = vld [vmem:[#allocation11 + $0x920] sm:$0xf] }
 0x3a6   :  { %v5596_v8 = vld [vmem:[#allocation11 + $0xa20] sm:$0xf]  ;;  %v6326_v59 = vld [vmem:[#allocation11 + $0xa2c] sm:$0xf0]  ;;  %v5469_v53 = vor.u32 %v6294_v27, %v5468_v35  ;;  %v6304_v35 = vld [vmem:[#allocation11 + $0x984] sm:$0xf] }
 0x3a7   :  { %v2621_v38 = vadd.f32 %v2620_v36, %v7016_v33  ;;  %v2627_v62 = vmul.f32 %v7016_v33, %v7016_v33  ;;  %3518 = vmatpush.bf16.msrb.mxu2 %v5677_v42  ;;  %v5597_v42 = vor.u32 %v6326_v59, %v5596_v8  ;;  %v5518_v8 = vld [vmem:[#allocation11 + $0x990] sm:$0xf0]  ;;  %v6336_v59 = vld [vmem:[#allocation11 + $0xa84] sm:$0xf] }
 0x3a9   :  { %v2630_v46 = vadd.f32 %v2629_v45, %v2627_v62  ;;  %3506 = vmatpush.bf16.msrb.mxu1 %v5533_v61  ;;  %v5612_v62 = vld [vmem:[#allocation11 + $0xa40] sm:$0xf]  ;;  %v5453_v61 = vor.u32 %v6290_v19, %v5452_v57  ;;  %v5374_v57 = vld [vmem:[#allocation11 + $0x870] sm:$0xf0] }
 0x3aa   :  { %v2549_v55 = vpop.f32.mrf.mxu2  ;;  %v5740_v45 = vld [vmem:[#allocation11 + $0xb40] sm:$0xf]  ;;  %v5502_v19 = vld [vmem:[#allocation11 + $0x970] sm:$0xf0] }
 0x3ab   :  { %v2562_v56 = vpop.f32.mrf.mxu3  ;;  %v5805_v55 = vor.u32 %v6378_v7, %v5804_v54  ;;  %3519 = vmatpush.bf16.msrb.mxu2 %v5661_v63  ;;  %v5724_v54 = vld [vmem:[#allocation11 + $0xb20] sm:$0xf]  ;;  %v6358_v7 = vld [vmem:[#allocation11 + $0xb2c] sm:$0xf0]  ;;  %v5581_v63 = vor.u32 %v6322_v60, %v5580_v24  ;;  %v6332_v60 = vld [vmem:[#allocation11 + $0xa64] sm:$0xf] }
 0x3ac   :  { %v5404_v56 = vld [vmem:[#allocation11 + $0x8a0] sm:$0xf] }
 0x3ad   :  { %3531 = vmatpush.bf16.msrb.mxu3 %v5805_v55  ;;  %v5405_v58 = vor.u32 %v6278_v9, %v5404_v56  ;;  %3507 = vmatpush.bf16.msrb.mxu1 %v5517_v15  ;;  %v5725_v55 = vor.u32 %v6358_v7, %v5724_v54  ;;  %v5324_v56 = vld [vmem:[#allocation11 + $0x800] sm:$0xf]  ;;  %v6258_v9 = vld [vmem:[#allocation11 + $0x80c] sm:$0xf0]  ;;  %v5694_v15 = vld [vmem:[#allocation11 + $0xaf0] sm:$0xf0]  ;;  %v5521_v54 = vor.u32 %v6304_v35, %v5518_v8 }
 0x3ae   :  { %v6368_v7 = vld [vmem:[#allocation11 + $0xb84] sm:$0xf] }
 0x3af   :  { %3493 = vmatpush.bf16.msrb.mxu0 %v5405_v58  ;;  %3520 = vmatpush.bf16.msrb.mxu2 %v5645_v16  ;;  %v5325_v58 = vor.u32 %v6258_v9, %v5324_v56  ;;  %v6380_v16 = vld [vmem:[#allocation11 + $0xbe4] sm:$0xf] }
 0x3b0   :  { %v6268_v56 = vld [vmem:[#allocation11 + $0x864] sm:$0xf] }
 0x3b1   :  { %3532 = vmatpush.bf16.msrb.mxu3 %v5789_v3  ;;  %v6284_v3 = vld [vmem:[#allocation11 + $0x8e4] sm:$0xf] }
 0x3b2   :  { %v5441_v11 = vor.u32 %v6284_v3, %v5438_v5  ;;  %v5377_v5 = vor.u32 %v6268_v56, %v5374_v57  ;;  %v6352_v35 = vld [vmem:[#allocation11 + $0xb04] sm:$0xf]  ;;  %v2617_v56 = vld [vmem:[#allocation14 + $0x4] sm:$0xf]  ;;  %v2619_v57 = vld [vmem:[#allocation16 + $0x4] sm:$0xf] }
 0x3b3   :  { %3494 = vmatpush.bf16.msrb.mxu0 %v5389_v10  ;;  %v5566_v10 = vld [vmem:[#allocation11 + $0x9f0] sm:$0xf0] }
 0x3b4   :  { %v5569_v13 = vor.u32 %v6316_v6, %v5566_v10  ;;  %v6264_v10 = vld [vmem:[#allocation11 + $0x844] sm:$0xf] }
 0x3ba   :  { %v2573_v25 = vpop.f32.mrf.mxu0 }
 0x3bb   :  { %v2586_v26 = vpop.f32.mrf.mxu1  ;;  %v2574_v30 = vadd.f32 %v2573_v25, %v1763_v18  ;;  %v5772_v18 = vld [vmem:[#allocation11 + $0xb80] sm:$0xf]  ;;  %v6270_v25 = vld [vmem:[#allocation11 + $0x86c] sm:$0xf0] }
 0x3bc   :  { %v5773_v21 = vor.u32 %v6370_v20, %v5772_v18  ;;  %v5373_v28 = vor.u32 %v6270_v25, %v5372_v23  ;;  %v5697_v18 = vor.u32 %v6348_v14, %v5694_v15  ;;  %v5822_v20 = vld [vmem:[#allocation11 + $0xbf0] sm:$0xf0]  ;;  %v6296_v14 = vld [vmem:[#allocation11 + $0x944] sm:$0xf] }
 0x3bd   :  { %v2587_v34 = vadd.f32 %v2586_v26, %v2574_v30  ;;  %v5500_v26 = vld [vmem:[#allocation11 + $0x960] sm:$0xf]  ;;  %v5422_v23 = vld [vmem:[#allocation11 + $0x8d0] sm:$0xf0]  ;;  %v5825_v25 = vor.u32 %v6380_v16, %v5822_v20  ;;  %v6328_v20 = vld [vmem:[#allocation11 + $0xa44] sm:$0xf] }
 0x3be   :  { %3533 = vmatpush.bf16.msrb.mxu3 %v5773_v21  ;;  %v5628_v30 = vld [vmem:[#allocation11 + $0xa60] sm:$0xf]  ;;  %3495 = vmatpush.bf16.msrb.mxu0 %v5373_v28  ;;  %v6280_v21 = vld [vmem:[#allocation11 + $0x8c4] sm:$0xf]  ;;  %v5486_v15 = vld [vmem:[#allocation11 + $0x950] sm:$0xf0] }
 0x3bf   :  { %v6312_v28 = vld [vmem:[#allocation11 + $0x9c4] sm:$0xf] }
 0x3c2   :  { %v2599_v12 = vpop.f32.mrf.mxu2  ;;  %v2575_v22 = vpop.f32.mrf.mxu0 }
 0x3c3   :  { %v2600_v17 = vadd.f32 %v2599_v12, %v2587_v34  ;;  %v2612_v51 = vpop.f32.mrf.mxu3  ;;  %v2588_v37 = vpop.f32.mrf.mxu1  ;;  %v6334_v34 = vld [vmem:[#allocation11 + $0xa6c] sm:$0xf0]  ;;  %v5501_v12 = vor.u32 %v6302_v29, %v5500_v26  ;;  %v5425_v26 = vor.u32 %v6280_v21, %v5422_v23  ;;  %v5550_v29 = vld [vmem:[#allocation11 + $0x9d0] sm:$0xf0]  ;;  %v6360_v23 = vld [vmem:[#allocation11 + $0xb44] sm:$0xf] }
 0x3c4   :  { %v6366_v22 = vld [vmem:[#allocation11 + $0xb6c] sm:$0xf0]  ;;  %v5356_v37 = vld [vmem:[#allocation11 + $0x840] sm:$0xf]  ;;  %v5614_v21 = vld [vmem:[#allocation11 + $0xa50] sm:$0xf0] }
 0x3c5   :  { %v7020_v52 = vadd.f32 %v2612_v51, %v2600_v17  ;;  %v5629_v17 = vor.u32 %v6334_v34, %v5628_v30  ;;  %v5756_v51 = vld [vmem:[#allocation11 + $0xb60] sm:$0xf]  ;;  %3508 = vmatpush.bf16.msrb.mxu1 %v5501_v12  ;;  %v6344_v30 = vld [vmem:[#allocation11 + $0xac4] sm:$0xf]  ;;  %v5553_v34 = vor.u32 %v6312_v28, %v5550_v29  ;;  %v5678_v12 = vld [vmem:[#allocation11 + $0xad0] sm:$0xf0]  ;;  %v5489_v29 = vor.u32 %v6296_v14, %v5486_v15 }
 0x3c6   :  { %v5757_v36 = vor.u32 %v6366_v22, %v5756_v51  ;;  %v5806_v51 = vld [vmem:[#allocation11 + $0xbd0] sm:$0xf0]  ;;  %v5681_v22 = vor.u32 %v6344_v30, %v5678_v12  ;;  %v6260_v30 = vld [vmem:[#allocation11 + $0x824] sm:$0xf] }
 0x3c7   :  { %v2622_v40 = vadd.f32 %v2621_v38, %v7020_v52  ;;  %v2628_v44 = vmul.f32 %v7020_v52, %v7020_v52  ;;  %3521 = vmatpush.bf16.msrb.mxu2 %v5629_v17  ;;  %v6266_v38 = vld [vmem:[#allocation11 + $0x84c] sm:$0xf0]  ;;  %v6376_v17 = vld [vmem:[#allocation11 + $0xbc4] sm:$0xf]  ;;  %v5342_v12 = vld [vmem:[#allocation11 + $0x830] sm:$0xf0] }
 0x3c8   :  { %3534 = vmatpush.bf16.msrb.mxu3 %v5757_v36  ;;  %v5809_v36 = vor.u32 %v6376_v17, %v5806_v51  ;;  %v6292_v17 = vld [vmem:[#allocation11 + $0x924] sm:$0xf]  ;;  %v5470_v51 = vld [vmem:[#allocation11 + $0x930] sm:$0xf0] }
 0x3c9   :  { %2623 = vadd.xlane.f32.xlu2 %v2622_v40  ;;  %v2631_v47 = vadd.f32 %v2630_v46, %v2628_v44  ;;  %v5357_v40 = vor.u32 %v6266_v38, %v5356_v37  ;;  %v6362_v46 = vld [vmem:[#allocation11 + $0xb4c] sm:$0xf0]  ;;  %v6276_v38 = vld [vmem:[#allocation11 + $0x8a4] sm:$0xf] }
 0x3ca   :  { %v2601_v1 = vpop.f32.mrf.mxu2 }
 0x3cb   :  { %v2614_v43 = vpop.f32.mrf.mxu3  ;;  %v6330_v1 = vld [vmem:[#allocation11 + $0xa4c] sm:$0xf0]  ;;  %3496 = vmatpush.bf16.msrb.mxu0 %v5357_v40  ;;  %v6308_v40 = vld [vmem:[#allocation11 + $0x9a4] sm:$0xf] }
 0x3cc   :  { %v5485_v43 = vor.u32 %v6298_v41, %v5484_v39  ;;  %v5613_v44 = vor.u32 %v6330_v1, %v5612_v62  ;;  %v5406_v39 = vld [vmem:[#allocation11 + $0x8b0] sm:$0xf0] }
 0x3cd   :  { %v5409_v62 = vor.u32 %v6276_v38, %v5406_v39  ;;  %v5534_v1 = vld [vmem:[#allocation11 + $0x9b0] sm:$0xf0]  ;;  %v6356_v38 = vld [vmem:[#allocation11 + $0xb24] sm:$0xf] }
 0x3ce   :  { %3509 = vmatpush.bf16.msrb.mxu1 %v5485_v43  ;;  %3522 = vmatpush.bf16.msrb.mxu2 %v5613_v44  ;;  %v6340_v43 = vld [vmem:[#allocation11 + $0xaa4] sm:$0xf]  ;;  %v5537_v44 = vor.u32 %v6308_v40, %v5534_v1  ;;  %v5726_v39 = vld [vmem:[#allocation11 + $0xb30] sm:$0xf0]  ;;  %v5345_v40 = vor.u32 %v6260_v30, %v5342_v12 }
 0x3cf   :  { %3497 = vmatpush.bf16.msrb.mxu0 %v5341_v50  ;;  %v6256_v1 = vld [vmem:[#allocation11 + $0x804] sm:$0xf] }
 0x3d1   :  { %2632 = vadd.xlane.f32.xlu2 %v2631_v47  ;;  %v5741_v47 = vor.u32 %v6362_v46, %v5740_v45  ;;  %v5662_v45 = vld [vmem:[#allocation11 + $0xab0] sm:$0xf0]  ;;  %v6372_v46 = vld [vmem:[#allocation11 + $0xba4] sm:$0xf] }
 0x3d2   :  { %3510 = vmatpush.bf16.msrb.mxu1 %v5469_v53  ;;  %3523 = vmatpush.bf16.msrb.mxu2 %v5597_v42  ;;  %v5665_v50 = vor.u32 %v6340_v43, %v5662_v45  ;;  %v5646_v53 = vld [vmem:[#allocation11 + $0xa90] sm:$0xf0]  ;;  %v5393_v42 = vor.u32 %v6272_v48, %v5390_v49  ;;  %v6288_v45 = vld [vmem:[#allocation11 + $0x904] sm:$0xf] }
 0x3d3   :  { %3535 = vmatpush.bf16.msrb.mxu3 %v5741_v47  ;;  %3498 = vmatpush.bf16.msrb.mxu0 %v5325_v58  ;;  %v5790_v47 = vld [vmem:[#allocation11 + $0xbb0] sm:$0xf0]  ;;  %v5649_v9 = vor.u32 %v6336_v59, %v5646_v53  ;;  %v6300_v58 = vld [vmem:[#allocation11 + $0x964] sm:$0xf] }
 0x3d4   :  { %v5793_v27 = vor.u32 %v6372_v46, %v5790_v47  ;;  %v5505_v6 = vor.u32 %v6300_v58, %v5502_v19  ;;  %v5454_v46 = vld [vmem:[#allocation11 + $0x910] sm:$0xf0]  ;;  %v5729_v47 = vor.u32 %v6356_v38, %v5726_v39  ;;  %v6320_v48 = vld [vmem:[#allocation11 + $0xa04] sm:$0xf] }
 0x3d5   :  { %v5582_v49 = vld [vmem:[#allocation11 + $0xa10] sm:$0xf0]  ;;  %v5457_v59 = vor.u32 %v6288_v45, %v5454_v46 }
 0x3d6   :  { %3511 = vmatpush.bf16.msrb.mxu1 %v5453_v61  ;;  %3524 = vmatpush.bf16.msrb.mxu2 %v5581_v63  ;;  %v5630_v61 = vld [vmem:[#allocation11 + $0xa70] sm:$0xf0] }
 0x3d7   :  { %3536 = vmatpush.bf16.msrb.mxu3 %v5725_v55  ;;  %3543 = vmatpush.bf16.msra.mxu0 %v5441_v11  ;;  %v5774_v55 = vld [vmem:[#allocation11 + $0xb90] sm:$0xf0]  ;;  %v5633_v11 = vor.u32 %v6332_v60, %v5630_v61 }
 0x3d8   :  { %v5777_v24 = vor.u32 %v6368_v7, %v5774_v55 }
 0x3da   :  { %3556 = vmatpush.bf16.msra.mxu1 %v5569_v13  ;;  %3569 = vmatpush.bf16.msra.mxu2 %v5697_v18  ;;  %v5358_v13 = vld [vmem:[#allocation11 + $0x850] sm:$0xf0]  ;;  %v5761_v18 = vor.u32 %v6364_v0, %v5758_v2  ;;  %v2671_v0 = vperm.slane %v2619_v57, 0  ;;  %v2659_v2 = vperm.slane %v2617_v56, 1 }
 0x3db   :  { %3537 = vmatpush.bf16.msrb.mxu3 %v5709_v4  ;;  %3544 = vmatpush.bf16.msra.mxu0 %v5425_v26  ;;  %v5361_v28 = vor.u32 %v6264_v10, %v5358_v13  ;;  %v2674_v10 = vperm.slane %v2619_v57, 3 }
 0x3de   :  { %3557 = vmatpush.bf16.msra.mxu1 %v5553_v34  ;;  %3570 = vmatpush.bf16.msra.mxu2 %v5681_v22  ;;  %v5617_v34 = vor.u32 %v6328_v20, %v5614_v21 }
 0x3df   :  { %3582 = vmatpush.bf16.msra.mxu3 %v5825_v25  ;;  %3545 = vmatpush.bf16.msra.mxu0 %v5409_v62  ;;  %v5742_v25 = vld [vmem:[#allocation11 + $0xb50] sm:$0xf0]  ;;  %v5473_v62 = vor.u32 %v6292_v17, %v5470_v51  ;;  %v5444_v17 = vld [vmem:[#allocation11 + $0x8e8] sm:$0xf]  ;;  %v6287_v51 = vld [vmem:[#allocation11 + $0x8f4] sm:$0xf0] }
 0x3e0   :  { %v5745_v22 = vor.u32 %v6360_v23, %v5742_v25 }
 0x3e2   :  { %3558 = vmatpush.bf16.msra.mxu1 %v5537_v44  ;;  %3571 = vmatpush.bf16.msra.mxu2 %v5665_v50  ;;  %v5326_v44 = vld [vmem:[#allocation11 + $0x810] sm:$0xf0] }
 0x3e3   :  { %3583 = vmatpush.bf16.msra.mxu3 %v5809_v36  ;;  %3546 = vmatpush.bf16.msra.mxu0 %v5393_v42  ;;  %v6324_v36 = vld [vmem:[#allocation11 + $0xa24] sm:$0xf]  ;;  %v5710_v50 = vld [vmem:[#allocation11 + $0xb10] sm:$0xf0]  ;;  %v5329_v8 = vor.u32 %v6256_v1, %v5326_v44  ;;  %v5585_v42 = vor.u32 %v6320_v48, %v5582_v49  ;;  %v5445_v1 = vor.u32 %v6287_v51, %v5444_v17  ;;  %v6351_v44 = vld [vmem:[#allocation11 + $0xaf4] sm:$0xf0] }
 0x3e4   :  { %v5828_v49 = vld [vmem:[#allocation11 + $0xbe8] sm:$0xf] }
 0x3e5   :  { %v5508_v51 = vld [vmem:[#allocation11 + $0x968] sm:$0xf] }
 0x3e6   :  { %3559 = vmatpush.bf16.msra.mxu1 %v5521_v54  ;;  %3572 = vmatpush.bf16.msra.mxu2 %v5649_v9  ;;  %v5713_v54 = vor.u32 %v6352_v35, %v5710_v50  ;;  %v6383_v35 = vld [vmem:[#allocation11 + $0xbf4] sm:$0xf0] }
 0x3e7   :  { %3584 = vmatpush.bf16.msra.mxu3 %v5793_v27  ;;  %3547 = vmatpush.bf16.msra.mxu0 %v5377_v5 }
 0x3ea   :  { %3560 = vmatpush.bf16.msra.mxu1 %v5505_v6  ;;  %3573 = vmatpush.bf16.msra.mxu2 %v5633_v11  ;;  %v2672_v6 = vperm.slane %v2619_v57, 1 }
 0x3eb   :  { %3585 = vmatpush.bf16.msra.mxu3 %v5777_v24  ;;  %3548 = vmatpush.bf16.msra.mxu0 %v5361_v28 }
 0x3ee   :  { %3561 = vmatpush.bf16.msra.mxu1 %v5489_v29  ;;  %3574 = vmatpush.bf16.msra.mxu2 %v5617_v34 }
 0x3ef   :  { %3586 = vmatpush.bf16.msra.mxu3 %v5761_v18  ;;  %3549 = vmatpush.bf16.msra.mxu0 %v5345_v40 }
 0x3f2   :  { %3562 = vmatpush.bf16.msra.mxu1 %v5473_v62 }
 0x3f3   :  { %3587 = vmatpush.bf16.msra.mxu3 %v5745_v22  ;;  %3550 = vmatpush.bf16.msra.mxu0 %v5329_v8 }
 0x3f6   :  { %3563 = vmatpush.bf16.msra.mxu1 %v5457_v59  ;;  %v5428_v59 = vld [vmem:[#allocation11 + $0x8c8] sm:$0xf] }
 0x3f7   :  { %3588 = vmatpush.bf16.msra.mxu3 %v5729_v47 }
 0x3fb   :  { %3589 = vmatpush.bf16.msra.mxu3 %v5713_v54 }
 0x43c   :  { %v2624_v37 = vpop.xlane.xlu2 %2623 }
 0x43d   :  { %v7032_v41 = vmul.f32 0.0025, %v2624_v37  ;;  %v5598_v37 = vld [vmem:[#allocation11 + $0xa30] sm:$0xf0] }
 0x43e   :  { %v5601_v43 = vor.u32 %v6324_v36, %v5598_v37  ;;  %v5572_v36 = vld [vmem:[#allocation11 + $0x9e8] sm:$0xf]  ;;  %v6319_v37 = vld [vmem:[#allocation11 + $0x9f4] sm:$0xf0] }
 0x43f   :  { %v2636_v3 = vmul.f32 %v7032_v41, %v7032_v41  ;;  %v2638_v58 = vsub.f32 %v7014_v32, %v7032_v41  ;;  %v2639_v19 = vsub.f32 %v7012_v31, %v7032_v41  ;;  %v2640_v24 = vsub.f32 %v7016_v33, %v7032_v41 }
 0x440   :  { %3575 = vmatpush.bf16.msra.mxu2 %v5601_v43  ;;  %v2641_v60 = vsub.f32 %v7020_v52, %v7032_v41  ;;  %v2673_v32 = vperm.slane %v2619_v57, 2  ;;  %v5700_v43 = vld [vmem:[#allocation11 + $0xae8] sm:$0xf]  ;;  %v5573_v48 = vor.u32 %v6319_v37, %v5572_v36 }
 0x441   :  { %v5636_v37 = vld [vmem:[#allocation11 + $0xa68] sm:$0xf] }
 0x444   :  { %v2633_v63 = vpop.xlane.xlu2 %2632  ;;  %3576 = vmatpush.bf16.msra.mxu2 %v5585_v42 }
 0x445   :  { %v2635_v4 = vmul.f32 0.0025, %v2633_v63  ;;  %v2658_v63 = vperm.slane %v2617_v56, 0 }
 0x447   :  { %v2637_v16 = vsub.f32 %v2635_v4, %v2636_v3  ;;  %v2660_v3 = vperm.slane %v2617_v56, 2  ;;  %v2661_v4 = vperm.slane %v2617_v56, 3  ;;  %v6315_v56 = vld [vmem:[#allocation11 + $0x9d4] sm:$0xf0] }
 0x449   :  { %v2642_v26 = vadd.f32 1e-05, %v2637_v16 }
 0x44b   :  { %6453 = vrsqrt.f32 %v2642_v26  ;;  %vm2649_vm15 = vweird.f32 %v2642_v26 }
 0x451   :  { %v6454_v27 = vpop.eup %6453 }
 0x452   :  { %v2644_v53 = vmul.f32 %v6454_v27, %v2642_v26  ;;  %vm2650_vm14 = vweird.f32 %v6454_v27 }
 0x453   :  { %vm2651_vm0 = vmor %vm2649_vm15, %vm2650_vm14 }
 0x454   :  { %v2645_v7 = vmul.f32 %v6454_v27, %v2644_v53  ;;  %v6283_v53 = vld [vmem:[#allocation11 + $0x8d4] sm:$0xf0] }
 0x456   :  { %v2646_v55 = vmul.f32 0.5, %v2645_v7  ;;  %v5701_v7 = vor.u32 %v6351_v44, %v5700_v43  ;;  %v5364_v43 = vld [vmem:[#allocation11 + $0x848] sm:$0xf]  ;;  %v6267_v44 = vld [vmem:[#allocation11 + $0x854] sm:$0xf0] }
 0x458   :  { %v2647_v9 = vsub.f32 1.5, %v2646_v55  ;;  %v5556_v55 = vld [vmem:[#allocation11 + $0x9c8] sm:$0xf] }
 0x45a   :  { %v2648_v61 = vmul.f32 %v6454_v27, %v2647_v9 }
 0x45c   :  { %v2652_v5 = vsel %vm2651_vm0, %v6454_v27, %v2648_v61  ;;  %v5429_v61 = vor.u32 %v6283_v53, %v5428_v59  ;;  %v6363_v59 = vld [vmem:[#allocation11 + $0xb54] sm:$0xf0] }
 0x45d   :  { %v2653_v11 = vmul.f32 %v2652_v5, %v2638_v58  ;;  %v2654_v31 = vmul.f32 %v2652_v5, %v2639_v19  ;;  %v2655_v13 = vmul.f32 %v2652_v5, %v2640_v24  ;;  %v2656_v14 = vmul.f32 %v2652_v5, %v2641_v60  ;;  %v5684_v19 = vld [vmem:[#allocation11 + $0xac8] sm:$0xf]  ;;  %v6347_v24 = vld [vmem:[#allocation11 + $0xad4] sm:$0xf0] }
 0x45e   :  { %v5829_v58 = vor.u32 %v6383_v35, %v5828_v49  ;;  %v5685_v5 = vor.u32 %v6347_v24, %v5684_v19  ;;  %v5620_v49 = vld [vmem:[#allocation11 + $0xa48] sm:$0xf]  ;;  %v6331_v35 = vld [vmem:[#allocation11 + $0xa54] sm:$0xf0] }
 0x45f   :  { %v2666_v33 = vmul.f32 %v2658_v63, %v2653_v11  ;;  %v2667_v15 = vmul.f32 %v2659_v2, %v2654_v31  ;;  %v2668_v16 = vmul.f32 %v2660_v3, %v2655_v13  ;;  %v2669_v52 = vmul.f32 %v2661_v4, %v2656_v14  ;;  %v5812_v63 = vld [vmem:[#allocation11 + $0xbc8] sm:$0xf]  ;;  %v6279_v4 = vld [vmem:[#allocation11 + $0x8b4] sm:$0xf0] }
 0x460   :  { %v5557_v2 = vor.u32 %v6315_v56, %v5556_v55  ;;  %v5412_v3 = vld [vmem:[#allocation11 + $0x8a8] sm:$0xf]  ;;  %v6343_v31 = vld [vmem:[#allocation11 + $0xab4] sm:$0xf0]  ;;  %v5621_v55 = vor.u32 %v6331_v35, %v5620_v49  ;;  %v6341_v49 = vld [vmem:[#allocation11 + $0xaac] sm:$0xf] }
 0x461   :  { %v2679_v41 = vadd.f32 %v2671_v0, %v2666_v33  ;;  %v2680_v18 = vadd.f32 %v2672_v6, %v2667_v15  ;;  %v2681_v20 = vadd.f32 %v2673_v32, %v2668_v16  ;;  %v2682_v21 = vadd.f32 %v2674_v10, %v2669_v52  ;;  %v6379_v0 = vld [vmem:[#allocation11 + $0xbd4] sm:$0xf0]  ;;  %v5540_v6 = vld [vmem:[#allocation11 + $0x9a8] sm:$0xf]  ;;  %v5670_v35 = vld [vmem:[#allocation11 + $0xab8] sm:$0xf0] }
 0x462   :  { %v6311_v32 = vld [vmem:[#allocation11 + $0x9b4] sm:$0xf0]  ;;  %v5813_v10 = vor.u32 %v6379_v0, %v5812_v63  ;;  %v5668_v11 = vld [vmem:[#allocation11 + $0xaa8] sm:$0xf]  ;;  %v5413_v13 = vor.u32 %v6279_v4, %v5412_v3 }
 0x463   :  { %v2687_v23 = vmin.f32 %v2679_v41, 0.0  ;;  %v2688_v25 = vmin.f32 %v2680_v18, 0.0  ;;  %v2689_v26 = vmin.f32 %v2681_v20, 0.0  ;;  %v2690_v28 = vmin.f32 %v2682_v21, 0.0  ;;  %v5796_v14 = vld [vmem:[#allocation11 + $0xba8] sm:$0xf] }
 0x464   :  { %vm2683_vm1 = vcmp.gt.f32.partialorder %v2679_v41, 0.0  ;;  %vm2684_vm2 = vcmp.gt.f32.partialorder %v2680_v18, 0.0  ;;  %vm2685_vm3 = vcmp.gt.f32.partialorder %v2681_v20, 0.0  ;;  %vm2686_vm4 = vcmp.gt.f32.partialorder %v2682_v21, 0.0  ;;  %v6375_v33 = vld [vmem:[#allocation11 + $0xbb4] sm:$0xf0] }
 0x465   :  { %v2691_v29 = vmul.f32 1.442695, %v2687_v23  ;;  %v2693_v30 = vmul.f32 1.442695, %v2688_v25  ;;  %v2695_v34 = vmul.f32 1.442695, %v2689_v26  ;;  %v5541_v15 = vor.u32 %v6311_v32, %v5540_v6 }
 0x466   :  { %v2697_v12 = vmul.f32 1.442695, %v2690_v28  ;;  %v5396_v16 = vld [vmem:[#allocation11 + $0x888] sm:$0xf]  ;;  %v6275_v52 = vld [vmem:[#allocation11 + $0x894] sm:$0xf0] }
 0x467   :  { %6455 = vpow2.f32 %v2691_v29  ;;  %v5652_v23 = vld [vmem:[#allocation11 + $0xa88] sm:$0xf]  ;;  %v6339_v25 = vld [vmem:[#allocation11 + $0xa94] sm:$0xf0]  ;;  %v5397_v26 = vor.u32 %v6275_v52, %v5396_v16  ;;  %v5574_v16 = vld [vmem:[#allocation11 + $0x9f8] sm:$0xf0] }
 0x468   :  { %6457 = vpow2.f32 %v2693_v30  ;;  %v5780_v28 = vld [vmem:[#allocation11 + $0xb88] sm:$0xf]  ;;  %v6371_v29 = vld [vmem:[#allocation11 + $0xb94] sm:$0xf0]  ;;  %v5653_v17 = vor.u32 %v6339_v25, %v5652_v23  ;;  %v6381_v25 = vld [vmem:[#allocation11 + $0xbec] sm:$0xf] }
 0x469   :  { %6459 = vpow2.f32 %v2695_v34  ;;  %v5380_v34 = vld [vmem:[#allocation11 + $0x868] sm:$0xf]  ;;  %v5781_v36 = vor.u32 %v6371_v29, %v5780_v28  ;;  %v6327_v24 = vld [vmem:[#allocation11 + $0xa34] sm:$0xf0] }
 0x46a   :  { %6461 = vpow2.f32 %v2697_v12  ;;  %v6271_v12 = vld [vmem:[#allocation11 + $0x874] sm:$0xf0]  ;;  %v5476_v56 = vld [vmem:[#allocation11 + $0x928] sm:$0xf] }
 0x46b   :  { %v5604_v19 = vld [vmem:[#allocation11 + $0xa28] sm:$0xf]  ;;  %v6359_v0 = vld [vmem:[#allocation11 + $0xb34] sm:$0xf0] }
 0x46c   :  { %v6259_v3 = vld [vmem:[#allocation11 + $0x814] sm:$0xf0]  ;;  %v5588_v32 = vld [vmem:[#allocation11 + $0xa08] sm:$0xf] }
 0x46d   :  { %v6456_v22 = vpop.eup %6455  ;;  %v6291_v6 = vld [vmem:[#allocation11 + $0x914] sm:$0xf0] }
 0x46e   :  { %v6458_v38 = vpop.eup %6457  ;;  %v5318_v39 = vadd.f32 -1.0, %v6456_v22  ;;  %v6303_v22 = vld [vmem:[#allocation11 + $0x974] sm:$0xf0] }
 0x46f   :  { %v6460_v40 = vpop.eup %6459  ;;  %v5319_v62 = vadd.f32 -1.0, %v6458_v38  ;;  %v6335_v38 = vld [vmem:[#allocation11 + $0xa74] sm:$0xf0] }
 0x470   :  { %v6462_v45 = vpop.eup %6461  ;;  %v2703_v46 = vsel %vm2683_vm1, %v2679_v41, %v5318_v39  ;;  %v5320_v47 = vadd.f32 -1.0, %v6460_v40  ;;  %v5669_v41 = vor.u32 %v6343_v31, %v5668_v11  ;;  %v5381_v39 = vor.u32 %v6271_v12, %v5380_v34  ;;  %v5764_v40 = vld [vmem:[#allocation11 + $0xb68] sm:$0xf]  ;;  %v6323_v11 = vld [vmem:[#allocation11 + $0xa14] sm:$0xf0] }
 0x471   :  { %v7044_v50 = vpack.c.bf16 %v2703_v46, %v2703_v46  ;;  %v2704_v27 = vsel %vm2684_vm2, %v2680_v18, %v5319_v62  ;;  %v5321_v8 = vadd.f32 -1.0, %v6462_v45  ;;  %v5524_v18 = vld [vmem:[#allocation11 + $0x988] sm:$0xf]  ;;  %v6367_v62 = vld [vmem:[#allocation11 + $0xb74] sm:$0xf0]  ;;  %v5637_v45 = vor.u32 %v6335_v38, %v5636_v37 }
 0x472   :  { %v7046_v42 = vpack.c.bf16 %v2704_v27, %v2704_v27  ;;  %v2705_v54 = vsel %vm2685_vm3, %v2681_v20, %v5320_v47  ;;  %v6307_v20 = vld [vmem:[#allocation11 + $0x994] sm:$0xf0]  ;;  %v5492_v46 = vld [vmem:[#allocation11 + $0x948] sm:$0xf]  ;;  %v5365_v27 = vor.u32 %v6267_v44, %v5364_v43  ;;  %v6285_v31 = vld [vmem:[#allocation11 + $0x8ec] sm:$0xf]  ;;  %v5589_v28 = vor.u32 %v6323_v11, %v5588_v32 }
 0x473   :  { %3499 = vmatmul.bf16.vlgmr.msrb.gmra.mxu0 %v7044_v50  ;;  %v7049_v9 = vpack.c.bf16 %v2705_v54, %v2705_v54  ;;  %v2706_v57 = vsel %vm2686_vm4, %v2682_v21, %v5321_v8  ;;  %v5797_v21 = vor.u32 %v6375_v33, %v5796_v14  ;;  %v5525_v30 = vor.u32 %v6307_v20, %v5524_v18  ;;  %v6299_v47 = vld [vmem:[#allocation11 + $0x954] sm:$0xf0]  ;;  %v5748_v8 = vld [vmem:[#allocation11 + $0xb48] sm:$0xf]  ;;  %v6349_v18 = vld [vmem:[#allocation11 + $0xaec] sm:$0xf] }
 0x474   :  { %3512 = vmatmul.bf16.vlgmr.msrb.gmra.mxu1 %v7046_v42  ;;  %v7052_v60 = vpack.c.bf16 %v2706_v57, %v2706_v57  ;;  %3595 = vmatpush.bf16.msrb.mxu0 %v5445_v1  ;;  %v5509_v1 = vor.u32 %v6303_v22, %v5508_v51  ;;  %v5493_v53 = vor.u32 %v6299_v47, %v5492_v46  ;;  %v5348_v54 = vld [vmem:[#allocation11 + $0x828] sm:$0xf]  ;;  %v6295_v57 = vld [vmem:[#allocation11 + $0x934] sm:$0xf0]  ;;  %v5702_v20 = vld [vmem:[#allocation11 + $0xaf8] sm:$0xf0] }
 0x475   :  { %3525 = vmatmul.bf16.vlgmr.msrb.gmra.mxu2 %v7049_v9  ;;  %3608 = vmatpush.bf16.msrb.mxu1 %v5573_v48  ;;  %v5765_v48 = vor.u32 %v6367_v62, %v5764_v40  ;;  %v5477_v4 = vor.u32 %v6295_v57, %v5476_v56  ;;  %v5716_v33 = vld [vmem:[#allocation11 + $0xb08] sm:$0xf]  ;;  %v5705_v34 = vor.u32 %v6349_v18, %v5702_v20  ;;  %v6281_v12 = vld [vmem:[#allocation11 + $0x8cc] sm:$0xf]  ;;  %v5686_v38 = vld [vmem:[#allocation11 + $0xad8] sm:$0xf0] }
 0x476   :  { %3538 = vmatmul.bf16.vlgmr.msrb.gmra.mxu3 %v7052_v60  ;;  %3621 = vmatpush.bf16.msrb.mxu2 %v5701_v7  ;;  %v6263_v7 = vld [vmem:[#allocation11 + $0x834] sm:$0xf0]  ;;  %v6313_v51 = vld [vmem:[#allocation11 + $0x9cc] sm:$0xf]  ;;  %v5814_v40 = vld [vmem:[#allocation11 + $0xbd8] sm:$0xf0] }
 0x477   :  { %3634 = vmatpush.bf16.msrb.mxu3 %v5829_v58  ;;  %v5749_v58 = vor.u32 %v6363_v59, %v5748_v8  ;;  %v5349_v63 = vor.u32 %v6263_v7, %v5348_v54  ;;  %v6345_v37 = vld [vmem:[#allocation11 + $0xacc] sm:$0xf]  ;;  %v5798_v8 = vld [vmem:[#allocation11 + $0xbb8] sm:$0xf0]  ;;  %v5673_v54 = vor.u32 %v6341_v49, %v5670_v35 }
 0x478   :  { %3596 = vmatpush.bf16.msrb.mxu0 %v5429_v61  ;;  %v5732_v61 = vld [vmem:[#allocation11 + $0xb28] sm:$0xf]  ;;  %v5689_v43 = vor.u32 %v6345_v37, %v5686_v38  ;;  %v6277_v44 = vld [vmem:[#allocation11 + $0x8ac] sm:$0xf]  ;;  %v5606_v38 = vld [vmem:[#allocation11 + $0xa38] sm:$0xf0] }
 0x479   :  { %3609 = vmatpush.bf16.msrb.mxu1 %v5557_v2  ;;  %v5332_v2 = vld [vmem:[#allocation11 + $0x808] sm:$0xf]  ;;  %v5733_v14 = vor.u32 %v6359_v0, %v5732_v61  ;;  %v6309_v46 = vld [vmem:[#allocation11 + $0x9ac] sm:$0xf]  ;;  %v5590_v35 = vld [vmem:[#allocation11 + $0xa18] sm:$0xf0] }
 0x47a   :  { %3622 = vmatpush.bf16.msrb.mxu2 %v5685_v5  ;;  %v5460_v5 = vld [vmem:[#allocation11 + $0x908] sm:$0xf]  ;;  %v5333_v52 = vor.u32 %v6259_v3, %v5332_v2  ;;  %v6273_v7 = vld [vmem:[#allocation11 + $0x88c] sm:$0xf] }
 0x47b   :  { %3635 = vmatpush.bf16.msrb.mxu3 %v5813_v10  ;;  %v5605_v10 = vor.u32 %v6327_v24, %v5604_v19  ;;  %v6305_v56 = vld [vmem:[#allocation11 + $0x98c] sm:$0xf]  ;;  %v5654_v24 = vld [vmem:[#allocation11 + $0xa98] sm:$0xf0] }
 0x47c   :  { %3597 = vmatpush.bf16.msrb.mxu0 %v5413_v13  ;;  %v5446_v13 = vld [vmem:[#allocation11 + $0x8f8] sm:$0xf0]  ;;  %v6337_v19 = vld [vmem:[#allocation11 + $0xa8c] sm:$0xf] }
 0x47d   :  { %3610 = vmatpush.bf16.msrb.mxu1 %v5541_v15  ;;  %v6317_v15 = vld [vmem:[#allocation11 + $0x9ec] sm:$0xf]  ;;  %v5449_v23 = vor.u32 %v6285_v31, %v5446_v13  ;;  %v5657_v3 = vor.u32 %v6337_v19, %v5654_v24  ;;  %v5638_v31 = vld [vmem:[#allocation11 + $0xa78] sm:$0xf0] }
 0x47e   :  { %3623 = vmatpush.bf16.msrb.mxu2 %v5669_v41  ;;  %v6355_v41 = vld [vmem:[#allocation11 + $0xb14] sm:$0xf0]  ;;  %v5577_v29 = vor.u32 %v6317_v15, %v5574_v16  ;;  %v6369_v61 = vld [vmem:[#allocation11 + $0xb8c] sm:$0xf] }
 0x47f   :  { %3636 = vmatpush.bf16.msrb.mxu3 %v5797_v21  ;;  %v5461_v21 = vor.u32 %v6291_v6, %v5460_v5  ;;  %v5382_v5 = vld [vmem:[#allocation11 + $0x878] sm:$0xf0]  ;;  %v6301_v6 = vld [vmem:[#allocation11 + $0x96c] sm:$0xf] }
 0x480   :  { %3598 = vmatpush.bf16.msrb.mxu0 %v5397_v26  ;;  %v5830_v26 = vld [vmem:[#allocation11 + $0xbf8] sm:$0xf0]  ;;  %v6333_v11 = vld [vmem:[#allocation11 + $0xa6c] sm:$0xf] }
 0x481   :  { %3611 = vmatpush.bf16.msrb.mxu1 %v5525_v30  ;;  %v5717_v30 = vor.u32 %v6355_v41, %v5716_v33  ;;  %v5833_v22 = vor.u32 %v6381_v25, %v5830_v26  ;;  %v6365_v13 = vld [vmem:[#allocation11 + $0xb6c] sm:$0xf]  ;;  %v5641_v16 = vor.u32 %v6333_v11, %v5638_v31  ;;  %v5366_v41 = vld [vmem:[#allocation11 + $0x858] sm:$0xf0] }
 0x482   :  { %3624 = vmatpush.bf16.msrb.mxu2 %v5653_v17  ;;  %v5430_v17 = vld [vmem:[#allocation11 + $0x8d8] sm:$0xf0]  ;;  %v6297_v18 = vld [vmem:[#allocation11 + $0x94c] sm:$0xf] }
 0x483   :  { %3637 = vmatpush.bf16.msrb.mxu3 %v5781_v36  ;;  %3551 = vmatmul.bf16.vlgmr.msra.gmra.mxu0 %v7044_v50  ;;  %v5558_v36 = vld [vmem:[#allocation11 + $0x9d8] sm:$0xf0]  ;;  %v5433_v62 = vor.u32 %v6281_v12, %v5430_v17  ;;  %v6361_v26 = vld [vmem:[#allocation11 + $0xb4c] sm:$0xf] }
 0x484   :  { %3564 = vmatmul.bf16.vlgmr.msra.gmra.mxu1 %v7046_v42  ;;  %3599 = vmatpush.bf16.msrb.mxu0 %v5381_v39  ;;  %v6377_v39 = vld [vmem:[#allocation11 + $0xbcc] sm:$0xf]  ;;  %v5622_v25 = vld [vmem:[#allocation11 + $0xa58] sm:$0xf0] }
 0x485   :  { %3577 = vmatmul.bf16.vlgmr.msra.gmra.mxu2 %v7049_v9  ;;  %3612 = vmatpush.bf16.msrb.mxu1 %v5509_v1  ;;  %v5561_v1 = vor.u32 %v6313_v51, %v5558_v36  ;;  %v5817_v47 = vor.u32 %v6377_v39, %v5814_v40  ;;  %v6261_v12 = vld [vmem:[#allocation11 + $0x82c] sm:$0xf]  ;;  %v5350_v17 = vld [vmem:[#allocation11 + $0x838] sm:$0xf0] }
 0x486   :  { %3590 = vmatmul.bf16.vlgmr.msra.gmra.mxu3 %v7052_v60  ;;  %3625 = vmatpush.bf16.msrb.mxu2 %v5637_v45  ;;  %v5414_v45 = vld [vmem:[#allocation11 + $0x8b8] sm:$0xf0]  ;;  %v6293_v51 = vld [vmem:[#allocation11 + $0x92c] sm:$0xf] }
 0x487   :  { %3638 = vmatpush.bf16.msrb.mxu3 %v5765_v48  ;;  %v5542_v48 = vld [vmem:[#allocation11 + $0x9b8] sm:$0xf0]  ;;  %v5417_v59 = vor.u32 %v6277_v44, %v5414_v45  ;;  %v6325_v37 = vld [vmem:[#allocation11 + $0xa2c] sm:$0xf] }
 0x488   :  { %3600 = vmatpush.bf16.msrb.mxu0 %v5365_v27  ;;  %v6373_v27 = vld [vmem:[#allocation11 + $0xbac] sm:$0xf]  ;;  %v5478_v36 = vld [vmem:[#allocation11 + $0x938] sm:$0xf0] }
 0x489   :  { %3613 = vmatpush.bf16.msrb.mxu1 %v5493_v53  ;;  %v5545_v53 = vor.u32 %v6309_v46, %v5542_v48  ;;  %v5801_v57 = vor.u32 %v6373_v27, %v5798_v8  ;;  %v6357_v39 = vld [vmem:[#allocation11 + $0xb2c] sm:$0xf]  ;;  %v5734_v40 = vld [vmem:[#allocation11 + $0xb38] sm:$0xf0] }
 0x48a   :  { %3626 = vmatpush.bf16.msrb.mxu2 %v5621_v55  ;;  %v5398_v55 = vld [vmem:[#allocation11 + $0x898] sm:$0xf0]  ;;  %v6257_v44 = vld [vmem:[#allocation11 + $0x80c] sm:$0xf] }
 0x48b   :  { %3639 = vmatpush.bf16.msrb.mxu3 %v5749_v58  ;;  %v5526_v58 = vld [vmem:[#allocation11 + $0x998] sm:$0xf0]  ;;  %v5401_v0 = vor.u32 %v6273_v7, %v5398_v55  ;;  %v6289_v46 = vld [vmem:[#allocation11 + $0x90c] sm:$0xf] }
 0x48c   :  { %3601 = vmatpush.bf16.msrb.mxu0 %v5349_v63  ;;  %v5782_v63 = vld [vmem:[#allocation11 + $0xb98] sm:$0xf0]  ;;  %v5529_v2 = vor.u32 %v6305_v56, %v5526_v58  ;;  %v6321_v49 = vld [vmem:[#allocation11 + $0xa0c] sm:$0xf] }
 0x48d   :  { %3614 = vmatpush.bf16.msrb.mxu1 %v5477_v4  ;;  %v6269_v4 = vld [vmem:[#allocation11 + $0x86c] sm:$0xf]  ;;  %v5785_v32 = vor.u32 %v6369_v61, %v5782_v63  ;;  %v5334_v45 = vld [vmem:[#allocation11 + $0x818] sm:$0xf0] }
 0x48e   :  { %3627 = vmatpush.bf16.msrb.mxu2 %v5605_v10  ;;  %v5510_v10 = vld [vmem:[#allocation11 + $0x978] sm:$0xf0]  ;;  %v5385_v33 = vor.u32 %v6269_v4, %v5382_v5  ;;  %v6353_v27 = vld [vmem:[#allocation11 + $0xb0c] sm:$0xf] }
 0x48f   :  { %3640 = vmatpush.bf16.msrb.mxu3 %v5733_v14  ;;  %v5766_v14 = vld [vmem:[#allocation11 + $0xb78] sm:$0xf0]  ;;  %v5513_v15 = vor.u32 %v6301_v6, %v5510_v10 }
 0x490   :  { %3602 = vmatpush.bf16.msrb.mxu0 %v5333_v52  ;;  %v6265_v52 = vld [vmem:[#allocation11 + $0x84c] sm:$0xf]  ;;  %v5769_v20 = vor.u32 %v6365_v13, %v5766_v14  ;;  %v5462_v48 = vld [vmem:[#allocation11 + $0x918] sm:$0xf0]  ;;  %v2841_v14 = vld [vmem:[#allocation13 + $0x8] sm:$0xf] }
 0x491   :  { %3615 = vmatpush.bf16.msrb.mxu1 %v5461_v21  ;;  %v5494_v21 = vld [vmem:[#allocation11 + $0x958] sm:$0xf0] }
 0x492   :  { %3628 = vmatpush.bf16.msrb.mxu2 %v5589_v28  ;;  %v5750_v28 = vld [vmem:[#allocation11 + $0xb58] sm:$0xf0] }
 0x493   :  { %3641 = vmatpush.bf16.msrb.mxu3 %v5717_v30  ;;  %3603 = vmatmul.bf16.vlgmr.msrb.gmra.mxu0 %v7044_v50  ;;  %v5497_v30 = vor.u32 %v6297_v18, %v5494_v21  ;;  %v5718_v8 = vld [vmem:[#allocation11 + $0xb18] sm:$0xf0] }
 0x494   :  { %3647 = vmatpush.bf16.msra.mxu0 %v5449_v23  ;;  %3616 = vmatmul.bf16.vlgmr.msrb.gmra.mxu1 %v7046_v42  ;;  %v6329_v23 = vld [vmem:[#allocation11 + $0xa4c] sm:$0xf]  ;;  %v5721_v7 = vor.u32 %v6353_v27, %v5718_v8 }
 0x495   :  { %3660 = vmatpush.bf16.msra.mxu1 %v5577_v29  ;;  %3629 = vmatmul.bf16.vlgmr.msrb.gmra.mxu2 %v7049_v9  ;;  %v5369_v29 = vor.u32 %v6265_v52, %v5366_v41  ;;  %v2845_v52 = vperm.slane %v2841_v14, 2 }
 0x496   :  { %3673 = vmatpush.bf16.msra.mxu2 %v5705_v34  ;;  %3642 = vmatmul.bf16.vlgmr.msrb.gmra.mxu3 %v7052_v60  ;;  %v5625_v34 = vor.u32 %v6329_v23, %v5622_v25 }
 0x497   :  { %3686 = vmatpush.bf16.msra.mxu3 %v5833_v22  ;;  %v5753_v22 = vor.u32 %v6361_v26, %v5750_v28  ;;  %v2846_v28 = vperm.slane %v2841_v14, 3 }
 0x498   :  { %3648 = vmatpush.bf16.msra.mxu0 %v5433_v62  ;;  %v5353_v62 = vor.u32 %v6261_v12, %v5350_v17 }
 0x499   :  { %3661 = vmatpush.bf16.msra.mxu1 %v5561_v1  ;;  %v5481_v1 = vor.u32 %v6293_v51, %v5478_v36 }
 0x49a   :  { %3674 = vmatpush.bf16.msra.mxu2 %v5689_v43  ;;  %v5609_v43 = vor.u32 %v6325_v37, %v5606_v38 }
 0x49b   :  { %3687 = vmatpush.bf16.msra.mxu3 %v5817_v47  ;;  %v5737_v47 = vor.u32 %v6357_v39, %v5734_v40 }
 0x49c   :  { %3649 = vmatpush.bf16.msra.mxu0 %v5417_v59  ;;  %v5337_v59 = vor.u32 %v6257_v44, %v5334_v45 }
 0x49d   :  { %3662 = vmatpush.bf16.msra.mxu1 %v5545_v53  ;;  %v5465_v53 = vor.u32 %v6289_v46, %v5462_v48 }
 0x49e   :  { %3675 = vmatpush.bf16.msra.mxu2 %v5673_v54  ;;  %v5593_v54 = vor.u32 %v6321_v49, %v5590_v35 }
 0x49f   :  { %3688 = vmatpush.bf16.msra.mxu3 %v5801_v57 }
 0x4a0   :  { %3650 = vmatpush.bf16.msra.mxu0 %v5401_v0 }
 0x4a1   :  { %3663 = vmatpush.bf16.msra.mxu1 %v5529_v2 }
 0x4a2   :  { %3676 = vmatpush.bf16.msra.mxu2 %v5657_v3 }
 0x4a3   :  { %3689 = vmatpush.bf16.msra.mxu3 %v5785_v32 }
 0x4a4   :  { %3651 = vmatpush.bf16.msra.mxu0 %v5385_v33 }
 0x4a5   :  { %3664 = vmatpush.bf16.msra.mxu1 %v5513_v15  ;;  %v2844_v15 = vperm.slane %v2841_v14, 1 }
 0x4a6   :  { %3677 = vmatpush.bf16.msra.mxu2 %v5641_v16  ;;  %v2843_v16 = vperm.slane %v2841_v14, 0 }
 0x4a7   :  { %3690 = vmatpush.bf16.msra.mxu3 %v5769_v20 }
 0x4a8   :  { %3652 = vmatpush.bf16.msra.mxu0 %v5369_v29 }
 0x4a9   :  { %3665 = vmatpush.bf16.msra.mxu1 %v5497_v30 }
 0x4aa   :  { %3678 = vmatpush.bf16.msra.mxu2 %v5625_v34 }
 0x4ab   :  { %3691 = vmatpush.bf16.msra.mxu3 %v5753_v22 }
 0x4ac   :  { %3653 = vmatpush.bf16.msra.mxu0 %v5353_v62 }
 0x4ad   :  { %3666 = vmatpush.bf16.msra.mxu1 %v5481_v1 }
 0x4ae   :  { %3679 = vmatpush.bf16.msra.mxu2 %v5609_v43 }
 0x4af   :  { %3692 = vmatpush.bf16.msra.mxu3 %v5737_v47 }
 0x4b0   :  { %3654 = vmatpush.bf16.msra.mxu0 %v5337_v59 }
 0x4b1   :  { %3667 = vmatpush.bf16.msra.mxu1 %v5465_v53 }
 0x4b2   :  { %3680 = vmatpush.bf16.msra.mxu2 %v5593_v54 }
 0x4b3   :  { %3693 = vmatpush.bf16.msra.mxu3 %v5721_v7  ;;  %3655 = vmatmul.bf16.vlgmr.msra.gmra.mxu0 %v7044_v50  ;;  %v6391_v7 = vld [vmem:[#allocation17 + $0x38] sm:$0xff] }
 0x4b4   :  { %3668 = vmatmul.bf16.vlgmr.msra.gmra.mxu1 %v7046_v42  ;;  %4054 = vmatpush.bf16.msrb.mxu0 %v6391_v7 }
 0x4b5   :  { %3681 = vmatmul.bf16.vlgmr.msra.gmra.mxu2 %v7049_v9 }
 0x4b6   :  { %3694 = vmatmul.bf16.vlgmr.msra.gmra.mxu3 %v7052_v60 }
 0x4f0   :  { %v3500_v55 = vpop.f32.mrf.mxu0 }
 0x4f1   :  { %v3513_v56 = vpop.f32.mrf.mxu1  ;;  %v3501_v18 = vadd.f32 %v3500_v55, %v2843_v16  ;;  %v6399_v55 = vld [vmem:[#allocation17 + $0x78] sm:$0xff]  ;;  %v6402_v16 = vld [vmem:[#allocation17 + $0x90] sm:$0xff] }
 0x4f2   :  { %4067 = vmatpush.bf16.msrb.mxu1 %v6399_v55 }
 0x4f3   :  { %v3514_v23 = vadd.f32 %v3513_v56, %v3501_v18  ;;  %v6407_v56 = vld [vmem:[#allocation17 + $0xb8] sm:$0xff]  ;;  %v6385_v18 = vld [vmem:[#allocation17 + $0x8] sm:$0xff] }
 0x4f4   :  { %4080 = vmatpush.bf16.msrb.mxu2 %v6407_v56 }
 0x4f8   :  { %v3526_v57 = vpop.f32.mrf.mxu2  ;;  %v3502_v58 = vpop.f32.mrf.mxu0 }
 0x4f9   :  { %v3539_v19 = vpop.f32.mrf.mxu3  ;;  %v3515_v24 = vpop.f32.mrf.mxu1  ;;  %v3527_v29 = vadd.f32 %v3526_v57, %v3514_v23  ;;  %v6415_v57 = vld [vmem:[#allocation17 + $0xf8] sm:$0xff]  ;;  %v6390_v58 = vld [vmem:[#allocation17 + $0x30] sm:$0xff]  ;;  %v6401_v23 = vld [vmem:[#allocation17 + $0x88] sm:$0xff] }
 0x4fa   :  { %4093 = vmatpush.bf16.msrb.mxu3 %v6415_v57  ;;  %v6406_v24 = vld [vmem:[#allocation17 + $0xb0] sm:$0xff]  ;;  %4055 = vmatpush.bf16.msrb.mxu0 %v6390_v58 }
 0x4fb   :  { %v7070_v22 = vadd.f32 %v3539_v19, %v3527_v29  ;;  %v6398_v19 = vld [vmem:[#allocation17 + $0x70] sm:$0xff]  ;;  %4081 = vmatpush.bf16.msrb.mxu2 %v6406_v24  ;;  %v6400_v29 = vld [vmem:[#allocation17 + $0x80] sm:$0xff] }
 0x4fc   :  { %4068 = vmatpush.bf16.msrb.mxu1 %v6398_v19 }
 0x4fd   :  { %v3708_v40 = vmul.f32 %v7070_v22, %v7070_v22 }
 0x500   :  { %v3528_v61 = vpop.f32.mrf.mxu2  ;;  %v3552_v63 = vpop.f32.mrf.mxu0 }
 0x501   :  { %v3541_v0 = vpop.f32.mrf.mxu3  ;;  %v3565_v2 = vpop.f32.mrf.mxu1  ;;  %v3553_v41 = vadd.f32 %v3552_v63, %v2844_v15  ;;  %v6414_v61 = vld [vmem:[#allocation17 + $0xf0] sm:$0xff]  ;;  %v6389_v63 = vld [vmem:[#allocation17 + $0x28] sm:$0xff] }
 0x502   :  { %4094 = vmatpush.bf16.msrb.mxu3 %v6414_v61  ;;  %v6397_v0 = vld [vmem:[#allocation17 + $0x68] sm:$0xff]  ;;  %4056 = vmatpush.bf16.msrb.mxu0 %v6389_v63  ;;  %v6394_v15 = vld [vmem:[#allocation17 + $0x50] sm:$0xff] }
 0x503   :  { %v3566_v21 = vadd.f32 %v3565_v2, %v3553_v41  ;;  %v6405_v2 = vld [vmem:[#allocation17 + $0xa8] sm:$0xff]  ;;  %4069 = vmatpush.bf16.msrb.mxu1 %v6397_v0 }
 0x504   :  { %4082 = vmatpush.bf16.msrb.mxu2 %v6405_v2 }
 0x508   :  { %v3578_v3 = vpop.f32.mrf.mxu2  ;;  %v3554_v4 = vpop.f32.mrf.mxu0 }
 0x509   :  { %v3591_v5 = vpop.f32.mrf.mxu3  ;;  %v3567_v50 = vpop.f32.mrf.mxu1  ;;  %v3579_v25 = vadd.f32 %v3578_v3, %v3566_v21  ;;  %v6413_v3 = vld [vmem:[#allocation17 + $0xe8] sm:$0xff]  ;;  %v6388_v4 = vld [vmem:[#allocation17 + $0x20] sm:$0xff] }
 0x50a   :  { %4095 = vmatpush.bf16.msrb.mxu3 %v6413_v3  ;;  %v6404_v50 = vld [vmem:[#allocation17 + $0xa0] sm:$0xff]  ;;  %4057 = vmatpush.bf16.msrb.mxu0 %v6388_v4  ;;  %v6393_v21 = vld [vmem:[#allocation17 + $0x48] sm:$0xff] }
 0x50b   :  { %v7068_v17 = vadd.f32 %v3591_v5, %v3579_v25  ;;  %v6396_v5 = vld [vmem:[#allocation17 + $0x60] sm:$0xff]  ;;  %4083 = vmatpush.bf16.msrb.mxu2 %v6404_v50  ;;  %v6409_v25 = vld [vmem:[#allocation17 + $0xc8] sm:$0xff] }
 0x50c   :  { %4070 = vmatpush.bf16.msrb.mxu1 %v6396_v5 }
 0x50d   :  { %v3709_v37 = vmul.f32 %v7068_v17, %v7068_v17  ;;  %v3703_v62 = vadd.f32 %v7068_v17, %v7070_v22 }
 0x50f   :  { %v3712_v49 = vadd.f32 %v3709_v37, %v3708_v40  ;;  %v3700_v37 = vld [vmem:[#allocation14 + $0x8] sm:$0xf]  ;;  %v3702_v40 = vld [vmem:[#allocation16 + $0x8] sm:$0xf] }
 0x510   :  { %v3580_v6 = vpop.f32.mrf.mxu2  ;;  %v3604_v32 = vpop.f32.mrf.mxu0 }
 0x511   :  { %v3593_v42 = vpop.f32.mrf.mxu3  ;;  %v3617_v9 = vpop.f32.mrf.mxu1  ;;  %v3605_v20 = vadd.f32 %v3604_v32, %v2845_v52  ;;  %v6412_v6 = vld [vmem:[#allocation17 + $0xe0] sm:$0xff]  ;;  %v6410_v52 = vld [vmem:[#allocation17 + $0xd0] sm:$0xff] }
 0x512   :  { %v6387_v42 = vld [vmem:[#allocation17 + $0x18] sm:$0xff]  ;;  %4096 = vmatpush.bf16.msrb.mxu3 %v6412_v6 }
 0x513   :  { %v3618_v26 = vadd.f32 %v3617_v9, %v3605_v20  ;;  %v6395_v9 = vld [vmem:[#allocation17 + $0x58] sm:$0xff]  ;;  %4058 = vmatpush.bf16.msrb.mxu0 %v6387_v42 }
 0x514   :  { %4071 = vmatpush.bf16.msrb.mxu1 %v6395_v9 }
 0x518   :  { %v3630_v10 = vpop.f32.mrf.mxu2  ;;  %v3606_v11 = vpop.f32.mrf.mxu0  ;;  %4072 = vmatpush.bf16.msrb.mxu1 %v6394_v15 }
 0x519   :  { %v3643_v60 = vpop.f32.mrf.mxu3  ;;  %v3619_v31 = vpop.f32.mrf.mxu1  ;;  %v3631_v30 = vadd.f32 %v3630_v10, %v3618_v26  ;;  %v6403_v10 = vld [vmem:[#allocation17 + $0x98] sm:$0xff]  ;;  %v6384_v26 = vld [vmem:[#allocation17] sm:$0xff] }
 0x51a   :  { %v6411_v11 = vld [vmem:[#allocation17 + $0xd8] sm:$0xff]  ;;  %4084 = vmatpush.bf16.msrb.mxu2 %v6403_v10 }
 0x51b   :  { %v7072_v36 = vadd.f32 %v3643_v60, %v3631_v30  ;;  %4097 = vmatpush.bf16.msrb.mxu3 %v6411_v11  ;;  %v6408_v30 = vld [vmem:[#allocation17 + $0xc0] sm:$0xff] }
 0x51c   :  { %4073 = vmatpush.bf16.msrb.mxu1 %v6393_v21  ;;  %v6432_v21 = vld [vmem:[#allocation19] ss:$0 sm:$0xff] }
 0x51d   :  { %v3710_v1 = vmul.f32 %v7072_v36, %v7072_v36  ;;  %v3704_v48 = vadd.f32 %v3703_v62, %v7072_v36  ;;  %v3741_v62 = vperm.slane %v3700_v37, 0 }
 0x51e   :  { %4085 = vmatpush.bf16.msrb.mxu2 %v6402_v16 }
 0x51f   :  { %v3713_v8 = vadd.f32 %v3712_v49, %v3710_v1  ;;  %4098 = vmatpush.bf16.msrb.mxu3 %v6410_v52  ;;  %v3742_v1 = vperm.slane %v3700_v37, 1 }
 0x520   :  { %v3632_v13 = vpop.f32.mrf.mxu2 }
 0x521   :  { %v3645_v33 = vpop.f32.mrf.mxu3  ;;  %v6386_v13 = vld [vmem:[#allocation17 + $0x10] sm:$0xff] }
 0x522   :  { %4059 = vmatpush.bf16.msrb.mxu0 %v6386_v13  ;;  %4086 = vmatpush.bf16.msrb.mxu2 %v6401_v23 }
 0x523   :  { %4099 = vmatpush.bf16.msrb.mxu3 %v6409_v25 }
 0x526   :  { %4060 = vmatpush.bf16.msrb.mxu0 %v6385_v18  ;;  %4087 = vmatpush.bf16.msrb.mxu2 %v6400_v29 }
 0x527   :  { %4100 = vmatpush.bf16.msrb.mxu3 %v6408_v30 }
 0x52a   :  { %4061 = vmatpush.bf16.msrb.mxu0 %v6384_v26 }
 0x530   :  { %v3656_v34 = vpop.f32.mrf.mxu0 }
 0x531   :  { %v3669_v12 = vpop.f32.mrf.mxu1  ;;  %v3657_v51 = vadd.f32 %v3656_v34, %v2846_v28  ;;  %v6392_v28 = vld [vmem:[#allocation17 + $0x40] sm:$0xff] }
 0x532   :  { %4074 = vmatpush.bf16.msrb.mxu1 %v6392_v28  ;;  %v4106_v28 = vlaneseq }
 0x533   :  { %v3670_v38 = vadd.f32 %v3669_v12, %v3657_v51 }
 0x538   :  { %v3682_v39 = vpop.f32.mrf.mxu2  ;;  %v3658_v45 = vpop.f32.mrf.mxu0 }
 0x539   :  { %v3683_v43 = vadd.f32 %v3682_v39, %v3670_v38  ;;  %v3695_v44 = vpop.f32.mrf.mxu3  ;;  %v3671_v46 = vpop.f32.mrf.mxu1  ;;  %v3744_v45 = vperm.slane %v3700_v37, 3 }
 0x53b   :  { %v7082_v47 = vadd.f32 %v3695_v44, %v3683_v43  ;;  %v3743_v43 = vperm.slane %v3700_v37, 2 }
 0x53d   :  { %v3705_v35 = vadd.f32 %v3704_v48, %v7082_v47  ;;  %v3711_v27 = vmul.f32 %v7082_v47, %v7082_v47 }
 0x53f   :  { %3706 = vadd.xlane.f32.xlu0 %v3705_v35  ;;  %v3714_v59 = vadd.f32 %v3713_v8, %v3711_v27  ;;  %v3754_v27 = vperm.slane %v3702_v40, 0 }
 0x540   :  { %v3684_v53 = vpop.f32.mrf.mxu2 }
 0x541   :  { %v3697_v54 = vpop.f32.mrf.mxu3  ;;  %3715 = vadd.xlane.f32.xlu1 %v3714_v59  ;;  %v3755_v59 = vperm.slane %v3702_v40, 1  ;;  %v3756_v53 = vperm.slane %v3702_v40, 2 }
 0x542   :  { %v3757_v54 = vperm.slane %v3702_v40, 3 }
 0x5b2   :  { %v3707_v32 = vpop.xlane.xlu0 %3706 }
 0x5b3   :  { %v7088_v60 = vmul.f32 0.0025, %v3707_v32 }
 0x5b4   :  { %v3716_v31 = vpop.xlane.xlu1 %3715 }
 0x5b5   :  { %v3718_v14 = vmul.f32 0.0025, %v3716_v31  ;;  %v3719_v33 = vmul.f32 %v7088_v60, %v7088_v60  ;;  %v3721_v44 = vsub.f32 %v7070_v22, %v7088_v60  ;;  %v3722_v48 = vsub.f32 %v7068_v17, %v7088_v60 }
 0x5b6   :  { %v3723_v49 = vsub.f32 %v7072_v36, %v7088_v60  ;;  %v3724_v35 = vsub.f32 %v7082_v47, %v7088_v60 }
 0x5b7   :  { %v3720_v41 = vsub.f32 %v3718_v14, %v3719_v33 }
 0x5b9   :  { %v3725_v20 = vadd.f32 1e-05, %v3720_v41 }
 0x5bb   :  { %6463 = vrsqrt.f32 %v3725_v20  ;;  %vm3732_vm6 = vweird.f32 %v3725_v20 }
 0x5c1   :  { %v6464_v34 = vpop.eup %6463 }
 0x5c2   :  { %v3727_v12 = vmul.f32 %v6464_v34, %v3725_v20  ;;  %vm3733_vm5 = vweird.f32 %v6464_v34 }
 0x5c3   :  { %vm3734_vm7 = vmor %vm3732_vm6, %vm3733_vm5 }
 0x5c4   :  { %v3728_v51 = vmul.f32 %v6464_v34, %v3727_v12  ;;  %v4107_v12 = vand.u32 127, %v4106_v28 }
 0x5c6   :  { %v3729_v38 = vmul.f32 0.5, %v3728_v51  ;;  %vm4108_vm12 = vcmp.lt.s32.totalorder %v4107_v12, 6 }
 0x5c8   :  { %v3730_v39 = vsub.f32 1.5, %v3729_v38 }
 0x5ca   :  { %v3731_v46 = vmul.f32 %v6464_v34, %v3730_v39 }
 0x5cc   :  { %v3735_v8 = vsel %vm3734_vm7, %v6464_v34, %v3731_v46 }
 0x5cd   :  { %v3736_v7 = vmul.f32 %v3735_v8, %v3721_v44  ;;  %v3737_v22 = vmul.f32 %v3735_v8, %v3722_v48  ;;  %v3738_v55 = vmul.f32 %v3735_v8, %v3723_v49  ;;  %v3739_v56 = vmul.f32 %v3735_v8, %v3724_v35 }
 0x5cf   :  { %v3749_v57 = vmul.f32 %v3741_v62, %v3736_v7  ;;  %v3750_v58 = vmul.f32 %v3742_v1, %v3737_v22  ;;  %v3751_v19 = vmul.f32 %v3743_v43, %v3738_v55  ;;  %v3752_v17 = vmul.f32 %v3744_v45, %v3739_v56 }
 0x5d1   :  { %v3762_v24 = vadd.f32 %v3754_v27, %v3749_v57  ;;  %v3763_v61 = vadd.f32 %v3755_v59, %v3750_v58  ;;  %v3764_v36 = vadd.f32 %v3756_v53, %v3751_v19  ;;  %v3765_v63 = vadd.f32 %v3757_v54, %v3752_v17 }
 0x5d3   :  { %v3770_v0 = vmin.f32 %v3762_v24, 0.0  ;;  %v3771_v47 = vmin.f32 %v3763_v61, 0.0  ;;  %v3772_v2 = vmin.f32 %v3764_v36, 0.0  ;;  %v3773_v3 = vmin.f32 %v3765_v63, 0.0 }
 0x5d4   :  { %vm3766_vm8 = vcmp.gt.f32.partialorder %v3762_v24, 0.0  ;;  %vm3767_vm9 = vcmp.gt.f32.partialorder %v3763_v61, 0.0  ;;  %vm3768_vm10 = vcmp.gt.f32.partialorder %v3764_v36, 0.0  ;;  %vm3769_vm11 = vcmp.gt.f32.partialorder %v3765_v63, 0.0 }
 0x5d5   :  { %v3774_v4 = vmul.f32 1.442695, %v3770_v0  ;;  %v3776_v5 = vmul.f32 1.442695, %v3771_v47  ;;  %v3778_v50 = vmul.f32 1.442695, %v3772_v2 }
 0x5d6   :  { %v3780_v6 = vmul.f32 1.442695, %v3773_v3 }
 0x5d7   :  { %6465 = vpow2.f32 %v3774_v4 }
 0x5d8   :  { %6467 = vpow2.f32 %v3776_v5 }
 0x5d9   :  { %6469 = vpow2.f32 %v3778_v50 }
 0x5da   :  { %6471 = vpow2.f32 %v3780_v6 }
 0x5dd   :  { %v6466_v42 = vpop.eup %6465 }
 0x5de   :  { %v6468_v32 = vpop.eup %6467  ;;  %v5834_v9 = vadd.f32 -1.0, %v6466_v42 }
 0x5df   :  { %v6470_v10 = vpop.eup %6469  ;;  %v5835_v60 = vadd.f32 -1.0, %v6468_v32 }
 0x5e0   :  { %v6472_v11 = vpop.eup %6471  ;;  %v3786_v31 = vsel %vm3766_vm8, %v3762_v24, %v5834_v9  ;;  %v5836_v13 = vadd.f32 -1.0, %v6470_v10 }
 0x5e1   :  { %v3790_v14 = vpack.c.bf16 %v3786_v31, %v3786_v31  ;;  %v3787_v33 = vsel %vm3767_vm9, %v3763_v61, %v5835_v60  ;;  %v5837_v15 = vadd.f32 -1.0, %v6472_v11 }
 0x5e2   :  { %v3791_v16 = vpack.c.bf16 %v3787_v33, %v3787_v33  ;;  %v3788_v52 = vsel %vm3768_vm10, %v3764_v36, %v5836_v13 }
 0x5e3   :  { %4062 = vmatmul.bf16.vlgmr.msrb.gmra.mxu0 %v3790_v14  ;;  %v3792_v41 = vpack.c.bf16 %v3788_v52, %v3788_v52  ;;  %v3789_v18 = vsel %vm3769_vm11, %v3765_v63, %v5837_v15 }
 0x5e4   :  { %4075 = vmatmul.bf16.vlgmr.msrb.gmra.mxu1 %v3791_v16  ;;  %v3793_v20 = vpack.c.bf16 %v3789_v18, %v3789_v18 }
 0x5e5   :  { %4088 = vmatmul.bf16.vlgmr.msrb.gmra.mxu2 %v3792_v41 }
 0x5e6   :  { %4101 = vmatmul.bf16.vlgmr.msrb.gmra.mxu3 %v3793_v20 }
 0x660   :  { %v4063_v23 = vpop.f32.mrf.mxu0 }
 0x661   :  { %v4076_v25 = vpop.f32.mrf.mxu1  ;;  %v4064_v26 = vadd.f32 %v6432_v21, %v4063_v23 }
 0x663   :  { %v4077_v29 = vadd.f32 %v4076_v25, %v4064_v26 }
 0x668   :  { %v4089_v30 = vpop.f32.mrf.mxu2  ;;  %v4065_v34 = vpop.f32.mrf.mxu0 }
 0x669   :  { %v4090_v51 = vadd.f32 %v4089_v30, %v4077_v29  ;;  %v4102_v37 = vpop.f32.mrf.mxu3  ;;  %v4078_v38 = vpop.f32.mrf.mxu1 }
 0x66b   :  { %v4103_v39 = vadd.f32 %v4102_v37, %v4090_v51 }
 0x66d   :  { %v4109_v40 = vmul.f32 2.0, %v4103_v39  ;;  %v4110_v62 = vmul.f32 0.5, %v4103_v39 }
 0x66f   :  { %v4111_v1 = vsel %vm4108_vm12, %v4109_v40, %v4110_v62 }
 0x670   :  { %v4091_v43 = vpop.f32.mrf.mxu2  ;;  %v5966_v44 = vmul.f32 -1.442695, %v4111_v1 }
 0x671   :  { %v4104_v45 = vpop.f32.mrf.mxu3 }
 0x672   :  { %6473 = vpow2.f32 %v5966_v44 }
 0x678   :  { %v6474_v46 = vpop.eup %6473 }
 0x679   :  { %v4115_v48 = vadd.f32 1.0, %v6474_v46 }
 0x67b   :  { %6475 = vrcp.f32 %v4115_v48  ;;  %v4127_v8 = vand.u32 2147483648, %v4115_v48  ;;  %v4125_v53 = vand.u32 2147483647, %v4115_v48  ;;  %vm4121_vm14 = vweird.f32 %v4115_v48 }
 0x67d   :  { %v4128_v7 = vor.u32 1.1754944e-38, %v4127_v8  ;;  %vm4126_vm0 = vcmp.eq.f32.partialorder %v4125_v53, 8.507059e+37 }
 0x681   :  { %v6476_v49 = vpop.eup %6475 }
 0x682   :  { %v4117_v35 = vmul.f32 %v6476_v49, %v4115_v48  ;;  %vm4122_vm13 = vweird.f32 %v6476_v49 }
 0x683   :  { %vm4123_vm15 = vmor %vm4121_vm14, %vm4122_vm13 }
 0x684   :  { %v4118_v27 = vsub.f32 1.0, %v4117_v35 }
 0x686   :  { %v4119_v59 = vmul.f32 %v6476_v49, %v4118_v27 }
 0x688   :  { %v4120_v54 = vadd.f32 %v6476_v49, %v4119_v59 }
 0x68a   :  { %v4124_v22 = vsel %vm4123_vm15, %v6476_v49, %v4120_v54 }
 0x68b   :  { %v4129_v55 = vsel %vm4126_vm0, %v4128_v7, %v4124_v22 }
 0x68c   :  { %v4131_v56 = vmul.f32 2.0, %v4129_v55 }
 0x68e   :  { %v5967_v57 = vadd.f32 -1.0, %v4131_v56  ;;  %v4133_v58 = vadd.f32 0.1, %v4131_v56 }
 0x690   :  { %v4134_v19 = vsel %vm4108_vm12, %v5967_v57, %v4133_v58 }
 0x691   :  { %4135 = vst [vmem:[#allocation20] sm:$0xff] %v4134_v19 }
 0x692   :  { %4146 = dma.vmem_to_hbm [thread:$0]  %s4142_s5, 128, %s4144_s26, [#allocation4]  }
 0x693   :  { %6777 = dma.done.wait [#allocation4], 128  }
 0x694   :  { %6778 = vsyncadd [#allocation4], 4294967168 }
 0x695   :  { %4151 = vsyncpa [#allocation3], 1 }
 0x696   :  { %4152 = vsyncpa [#allocation6], 1 }
 0x697   :  { %4153 = vsyncpa [#allocation9], 1 }
 0x698   :  { %4154 = vsyncpa [#allocation12], 1 }
 0x699   :  { %4155 = vsyncpa [#allocation15], 1 }
 0x69a   :  { %4156 = vsyncpa [#allocation18], 1 }
 0x69b   :  { %4157 = vsyncpa [#allocation4], 1 }

</bundles_post_ra>
